<compile_context>
chip_gen: v6e
topology: v6e:2x2x1
jax: 0.10.0
libtpu: 0.0.40
codegen_flags: <defaults>
</compile_context>

<pallas_src>
import functools

import jax
import jax.numpy as jnp
from jax.experimental import pallas as pl
from jax.experimental.pallas import tpu as pltpu


def _gelu_exact(x):
    # torch.nn.GELU() default: exact erf-based GELU.
    return 0.5 * x * (1.0 + jax.lax.erf(x * 0.7071067811865476))


def _gelu_tanh(x):
    # EUP-native tanh approximation (opt-in; diverges slightly from torch default).
    return jax.nn.gelu(x, approximate=True)


def _fused_kernel(x_ref, w1d1_ref, b1d1_ref, w1d2bd_ref, b1d2_ref,
                  w2d2bd_ref, b2d2_ref, w2d1_ref, b2d1_ref, o_ref,
                  *, k, approx_gelu):
    """Whole Adj_Embedding forward for one chunk of Bt row-stacked graphs.

    x_ref      : (Bt*N, N)       row-stacked adjacency matrices (dot dtype)
    w1d1_ref   : (N, H1)         H1 = c*N                        (dot dtype)
    b1d1_ref   : (1, H1)         f32
    w1d2bd_ref : (H1, c*H2)      kron(I_c, W1d2)                 (dot dtype)
    b1d2_ref   : (1, c*H2)       tile(b1d2, c), f32
    w2d2bd_ref : (c*H2, c*OUT)   kron(I_c, W2d2)                 (dot dtype)
    b2d2_ref   : (1, c*OUT)      tile(b2d2, c), f32
    w2d1_ref   : (H1, OUT)       row blocks already in block order (dot dtype)
    b2d1_ref   : (1, OUT)        f32
    o_ref      : (Bt, OUT, OUT)  f32, with OUT == N
    """
    gelu = _gelu_tanh if approx_gelu else _gelu_exact

    def dot_f32(lhs_f32, rhs_ref):
        rhs = rhs_ref[...]
        return jnp.dot(lhs_f32.astype(rhs.dtype), rhs,
                       preferred_element_type=jnp.float32)

    bt, out_r, out_c = o_ref.shape

    # ---- fused MLP stages on the whole (Bt*N, .) slab -----------------------
    # The torch module's two row-major reshapes are eliminated algebraically
    # (see wrapper docstring); the block structure lives in the block-diagonal
    # weights, so this is just 4 dots.
    x = x_ref[...]
    a = gelu(jnp.dot(x, w1d1_ref[...], preferred_element_type=jnp.float32)
             + b1d1_ref[...])                               # (Bt*N, H1)
    h = gelu(dot_f32(a, w1d2bd_ref) + b1d2_ref[...])        # (Bt*N, c*H2)
    e_blk = dot_f32(h, w2d2bd_ref) + b2d2_ref[...]          # (Bt*N, c*OUT)
    z = dot_f32(e_blk, w2d1_ref) + b2d1_ref[...]            # (Bt*N, OUT)

    # ---- per-graph softmax(dim=0) + top-k threshold mask --------------------
    z3 = z.reshape(bt, out_r, out_c)                 # split of the major dim: free
    zmax = jnp.max(z3, axis=1, keepdims=True)
    e = jnp.exp(z3 - zmax)                           # positive per-column scale of softmax
    s = e * pl.reciprocal(jnp.sum(e, axis=1, keepdims=True), approx=True)

    # Rank counting on `e` (same ranks as the softmax, decoupled from the EUP
    # reciprocal).  4 partial accumulators expose ILP across the 4 VALU slots;
    # lax.top_k / sort have no Mosaic lowering in-kernel and OUT is tiny, so the
    # O(OUT) lane-vectorised compare loop over the whole (Bt, N, OUT) slab stays.
    n_acc = 4
    cnt = [jnp.zeros_like(e) for _ in range(n_acc)]
    for i in range(out_r):
        cnt[i % n_acc] = cnt[i % n_acc] + (e[:, i:i + 1, :] > e).astype(e.dtype)
    total = (cnt[0] + cnt[1]) + (cnt[2] + cnt[3])
    kth = jnp.min(jnp.where(total < float(k), e, jnp.inf), axis=1, keepdims=True)

    # torch: where(softmax < topk.values[-1], 0, softmax) -- boundary ties kept,
    # exactly like the reference formulation.
    o_ref[...] = jnp.where(e < kth, 0.0, s)


def _tensorcores_per_chip():
    """Best-effort TensorCores-per-chip (v5e/v6e: 1, v7x: 2); falls back to 1."""
    try:
        dev = jax.devices()[0]
        for attr in ("num_cores", "core_count"):
            v = getattr(dev, attr, None)
            if isinstance(v, int) and v > 0:
                return min(int(v), 2)
        if "v7" in str(getattr(dev, "device_kind", "")).lower():
            return 2
    except Exception:
        pass
    return 1


def adj_embedding_forward(x, params, k, *, num_chunks=None,
                          dot_dtype=jnp.bfloat16, approx_gelu=False):
    """Pallas implementation of Adj_Embedding.forward.

    x: (N, N) adjacency matrix (the module's forward signature), or (B, N, N)
       batch of them (preferred perf path: the whole batch is folded into at
       most one grid step per TensorCore).

    Reshape elimination: reshape (N,H1)->(H1,N) splits each row of the first
    MLP's output into c = H1//N column blocks and reshape (H1,OUT)->(OUT,H1)
    regroups them, so (for OUT == N)
        MLP2_d1(reshape(.)) == concat_u[ MLP2_d2(GELU(MLP1_d2(GELU(A)_u))) ] @ W2d1 + b2d1
    which is realised with block-diagonal kron(I_c, .) weights built once in the
    wrapper -- no in-kernel reshapes or lane slicing, just 4 dots.
    """
    (w1d1, b1d1, w2d1, b2d1, w1d2, b1d2, w2d2, b2d2) = params
    n, h1 = w1d1.shape
    h2 = w1d2.shape[1]
    out = w2d2.shape[1]

    # Preconditions for the reshape-free fused formulation.
    # TODO(synk): general output_dim != N / h1 % N != 0 would need explicit
    # in-kernel row regrouping; not needed for the HAGEN configuration.
    assert h1 % n == 0, "hidden_dim_1 must be a multiple of input_dim"
    assert out == n, "output_dim must equal input_dim for the fused kernel"
    assert 1 <= k <= out, "k must be in [1, output_dim]"
    c = h1 // n

    squeeze = (x.ndim == 2)
    xb = x[None] if squeeze else x
    bsz = xb.shape[0]

    if num_chunks is None:
        # One chunk per TensorCore: grid=(1,) on single-TC chips (v5e/v6e) keeps
        # per-step pipeline overhead to a single prologue; grid=(2,) on v7x lets
        # the "parallel" grid axis feed both cores.
        num_chunks = min(bsz, _tensorcores_per_chip())
    num_chunks = max(1, min(int(num_chunks), bsz))

    pad = (-bsz) % num_chunks
    if pad:
        xb = jnp.concatenate(
            [xb, jnp.zeros((pad,) + xb.shape[1:], xb.dtype)], axis=0)
    bp = bsz + pad
    bt = bp // num_chunks

    # Row-stacked slab per chunk: (num_chunks, Bt*N, N).  Last dim unchanged, so
    # this is a free row-major view in XLA; the kernel never reshapes its inputs.
    x_slab = xb.astype(dot_dtype).reshape(num_chunks, bt * n, n)

    # Weight plumbing (tiny arrays, done once): block-diagonal forms collapse the
    # per-column-block loop into plain dots; dot operands pre-cast to the MXU
    # dtype, biases stay f32 (elementwise math stays f32 in-kernel).
    eye_c = jnp.eye(c, dtype=jnp.float32)
    w1d1_k = w1d1.astype(dot_dtype)                      # (N, H1)
    w1d2_bd = jnp.kron(eye_c, w1d2).astype(dot_dtype)    # (H1, c*H2)
    w2d2_bd = jnp.kron(eye_c, w2d2).astype(dot_dtype)    # (c*H2, c*OUT)
    w2d1_k = w2d1.astype(dot_dtype)                      # (H1, OUT) = block rows in order
    b1d1_f = b1d1.astype(jnp.float32)
    b1d2_t = jnp.tile(b1d2.astype(jnp.float32), (1, c))
    b2d2_t = jnp.tile(b2d2.astype(jnp.float32), (1, c))
    b2d1_f = b2d1.astype(jnp.float32)

    result = pl.pallas_call(
        functools.partial(_fused_kernel, k=k, approx_gelu=approx_gelu),
        out_shape=jax.ShapeDtypeStruct((num_chunks, bt, out, out), jnp.float32),
        grid=(num_chunks,),
        in_specs=[
            pl.BlockSpec((None, bt * n, n), lambda g: (g, 0, 0)),   # x slab
            pl.BlockSpec((n, h1), lambda g: (0, 0)),                # W1d1
            pl.BlockSpec((1, h1), lambda g: (0, 0)),                # b1d1
            pl.BlockSpec((h1, c * h2), lambda g: (0, 0)),           # kron(I,W1d2)
            pl.BlockSpec((1, c * h2), lambda g: (0, 0)),            # tiled b1d2
            pl.BlockSpec((c * h2, c * out), lambda g: (0, 0)),      # kron(I,W2d2)
            pl.BlockSpec((1, c * out), lambda g: (0, 0)),           # tiled b2d2
            pl.BlockSpec((h1, out), lambda g: (0, 0)),              # W2d1
            pl.BlockSpec((1, out), lambda g: (0, 0)),               # b2d1
        ],
        out_specs=pl.BlockSpec((None, bt, out, out), lambda g: (g, 0, 0, 0)),
        compiler_params=pltpu.CompilerParams(
            dimension_semantics=("parallel",)),   # chunk axis -> both TCs on v7x
    )(x_slab, w1d1_k, b1d1_f, w1d2_bd, b1d2_t, w2d2_bd, b2d2_t, w2d1_k, b2d1_f)

    result = result.reshape(bp, out, out)[:bsz]
    return result[0] if squeeze else result


def _init_linear(kw, kb, fan_in, fan_out):
    # deterministic, torch.nn.Linear-style uniform(-1/sqrt(fan_in), +1/sqrt(fan_in))
    bound = 1.0 / (fan_in ** 0.5)
    w = jax.random.uniform(kw, (fan_in, fan_out), jnp.float32, -bound, bound)
    b = jax.random.uniform(kb, (1, fan_out), jnp.float32, -bound, bound)
    return w, b


if __name__ == "__main__":
    # small shapes: adj (16x16), hidden_dim_1=32, hidden_dim_2=24, output_dim=16, k=4
    N, H1, H2, OUT, K, B = 16, 32, 24, 16, 4, 8

    key = jax.random.PRNGKey(0)
    keys = jax.random.split(key, 9)
    w1d1, b1d1 = _init_linear(keys[0], keys[1], N, H1)    # MLP1_d1
    w2d1, b2d1 = _init_linear(keys[2], keys[3], H1, OUT)  # MLP2_d1
    w1d2, b1d2 = _init_linear(keys[4], keys[5], N, H2)    # MLP1_d2
    w2d2, b2d2 = _init_linear(keys[6], keys[7], H2, OUT)  # MLP2_d2
    params = (w1d1, b1d1, w2d1, b2d1, w1d2, b1d2, w2d2, b2d2)

    # synthetic batch of binary adjacency matrices
    x_batch = (jax.random.uniform(keys[8], (B, N, N), jnp.float32) > 0.7).astype(
        jnp.float32)

    # batched path; chunk count auto-selected (one chunk per TensorCore)
    out_b = jax.block_until_ready(adj_embedding_forward(x_batch, params, K))
    assert out_b.shape == (B, OUT, OUT) and out_b.dtype == jnp.float32
    assert bool(jnp.all(jnp.isfinite(out_b)))

    # explicit 2-chunk path (what v7x's two TensorCores would run); per-graph
    # results must not depend on the chunking.
    out_2 = jax.block_until_ready(
        adj_embedding_forward(x_batch, params, K, num_chunks=2))
    assert out_2.shape == (B, OUT, OUT)
    assert bool(jnp.allclose(out_b, out_2, atol=1e-6, rtol=1e-6))

    # module-faithful single-matrix path (batch of 1 internally)
    out_1 = jax.block_until_ready(adj_embedding_forward(x_batch[0], params, K))
    assert out_1.shape == (OUT, OUT) and out_1.dtype == jnp.float32
    assert bool(jnp.allclose(out_1, out_b[0], atol=1e-6, rtol=1e-6))

    print("KERNEL_OK")
</pallas_src>

<mosaic_0001>
module attributes {stable_mosaic.version = 11 : i64} {
  func.func @_fused_kernel(%arg0: i32, %arg1: memref<1x128x16xbf16, #tpu.memory_space<vmem>>, %arg2: memref<16x32xbf16, #tpu.memory_space<vmem>>, %arg3: memref<1x32xf32, #tpu.memory_space<vmem>>, %arg4: memref<32x48xbf16, #tpu.memory_space<vmem>>, %arg5: memref<1x48xf32, #tpu.memory_space<vmem>>, %arg6: memref<48x32xbf16, #tpu.memory_space<vmem>>, %arg7: memref<1x32xf32, #tpu.memory_space<vmem>>, %arg8: memref<32x16xbf16, #tpu.memory_space<vmem>>, %arg9: memref<1x16xf32, #tpu.memory_space<vmem>>, %arg10: memref<1x8x16x16xf32, #tpu.memory_space<vmem>>) attributes {dimension_semantics = [#tpu.dimension_semantics<parallel>], iteration_bounds = array<i64: 1>, scalar_prefetch = 0 : i64, scratch_operands = 0 : i64, tpu.core_type = #tpu.core_type<tc>, window_params = [{transform_indices = @transform_0, window_bounds = array<i64: 1, 128, 16>}, {pipeline_mode = #tpu.pipeline_mode<synchronous>, transform_indices = @transform_1, window_bounds = array<i64: 16, 32>}, {pipeline_mode = #tpu.pipeline_mode<synchronous>, transform_indices = @transform_2, window_bounds = array<i64: 1, 32>}, {pipeline_mode = #tpu.pipeline_mode<synchronous>, transform_indices = @transform_3, window_bounds = array<i64: 32, 48>}, {pipeline_mode = #tpu.pipeline_mode<synchronous>, transform_indices = @transform_4, window_bounds = array<i64: 1, 48>}, {pipeline_mode = #tpu.pipeline_mode<synchronous>, transform_indices = @transform_5, window_bounds = array<i64: 48, 32>}, {pipeline_mode = #tpu.pipeline_mode<synchronous>, transform_indices = @transform_6, window_bounds = array<i64: 1, 32>}, {pipeline_mode = #tpu.pipeline_mode<synchronous>, transform_indices = @transform_7, window_bounds = array<i64: 32, 16>}, {pipeline_mode = #tpu.pipeline_mode<synchronous>, transform_indices = @transform_8, window_bounds = array<i64: 1, 16>}, {transform_indices = @transform_9, window_bounds = array<i64: 1, 8, 16, 16>}]} {
    %c0 = arith.constant 0 : index
    %c0_0 = arith.constant 0 : index
    %c0_1 = arith.constant 0 : index
    %0 = vector.load %arg1[%c0, %c0_0, %c0_1] : memref<1x128x16xbf16, #tpu.memory_space<vmem>>, vector<1x128x16xbf16>
    %1 = vector.shape_cast %0 : vector<1x128x16xbf16> to vector<128x16xbf16>
    %c0_2 = arith.constant 0 : index
    %c0_3 = arith.constant 0 : index
    %2 = vector.load %arg2[%c0_2, %c0_3] : memref<16x32xbf16, #tpu.memory_space<vmem>>, vector<16x32xbf16>
    %cst = arith.constant dense<0.000000e+00> : vector<128x32xf32>
    %3 = tpu.matmul %1, %2, %cst {dimension_numbers = #tpu.dot_dimension_numbers<[1], [0], [0], [1], [0, 0, 1, 1], [], []>} : vector<128x16xbf16>, vector<16x32xbf16>, vector<128x32xf32> -> vector<128x32xf32>
    %c0_4 = arith.constant 0 : index
    %c0_5 = arith.constant 0 : index
    %4 = vector.load %arg3[%c0_4, %c0_5] : memref<1x32xf32, #tpu.memory_space<vmem>>, vector<1x32xf32>
    %5 = vector.broadcast %4 : vector<1x32xf32> to vector<128x32xf32>
    %6 = arith.addf %3, %5 : vector<128x32xf32>
    %cst_6 = arith.constant 5.000000e-01 : f32
    %7 = vector.broadcast %cst_6 : f32 to vector<128x32xf32>
    %8 = arith.mulf %7, %6 : vector<128x32xf32>
    %cst_7 = arith.constant 0.707106769 : f32
    %9 = vector.broadcast %cst_7 : f32 to vector<128x32xf32>
    %10 = arith.mulf %6, %9 : vector<128x32xf32>
    %11 = math.erf %10 : vector<128x32xf32>
    %cst_8 = arith.constant 1.000000e+00 : f32
    %12 = vector.broadcast %cst_8 : f32 to vector<128x32xf32>
    %13 = arith.addf %12, %11 : vector<128x32xf32>
    %14 = arith.mulf %8, %13 : vector<128x32xf32>
    %c0_9 = arith.constant 0 : index
    %c0_10 = arith.constant 0 : index
    %15 = vector.load %arg4[%c0_9, %c0_10] : memref<32x48xbf16, #tpu.memory_space<vmem>>, vector<32x48xbf16>
    %16 = arith.truncf %14 : vector<128x32xf32> to vector<128x32xbf16>
    %cst_11 = arith.constant dense<0.000000e+00> : vector<128x48xf32>
    %17 = tpu.matmul %16, %15, %cst_11 {dimension_numbers = #tpu.dot_dimension_numbers<[1], [0], [0], [1], [0, 0, 1, 1], [], []>} : vector<128x32xbf16>, vector<32x48xbf16>, vector<128x48xf32> -> vector<128x48xf32>
    %c0_12 = arith.constant 0 : index
    %c0_13 = arith.constant 0 : index
    %18 = vector.load %arg5[%c0_12, %c0_13] : memref<1x48xf32, #tpu.memory_space<vmem>>, vector<1x48xf32>
    %19 = vector.broadcast %18 : vector<1x48xf32> to vector<128x48xf32>
    %20 = arith.addf %17, %19 : vector<128x48xf32>
    %cst_14 = arith.constant 5.000000e-01 : f32
    %21 = vector.broadcast %cst_14 : f32 to vector<128x48xf32>
    %22 = arith.mulf %21, %20 : vector<128x48xf32>
    %cst_15 = arith.constant 0.707106769 : f32
    %23 = vector.broadcast %cst_15 : f32 to vector<128x48xf32>
    %24 = arith.mulf %20, %23 : vector<128x48xf32>
    %25 = math.erf %24 : vector<128x48xf32>
    %cst_16 = arith.constant 1.000000e+00 : f32
    %26 = vector.broadcast %cst_16 : f32 to vector<128x48xf32>
    %27 = arith.addf %26, %25 : vector<128x48xf32>
    %28 = arith.mulf %22, %27 : vector<128x48xf32>
    %c0_17 = arith.constant 0 : index
    %c0_18 = arith.constant 0 : index
    %29 = vector.load %arg6[%c0_17, %c0_18] : memref<48x32xbf16, #tpu.memory_space<vmem>>, vector<48x32xbf16>
    %30 = arith.truncf %28 : vector<128x48xf32> to vector<128x48xbf16>
    %cst_19 = arith.constant dense<0.000000e+00> : vector<128x32xf32>
    %31 = tpu.matmul %30, %29, %cst_19 {dimension_numbers = #tpu.dot_dimension_numbers<[1], [0], [0], [1], [0, 0, 1, 1], [], []>} : vector<128x48xbf16>, vector<48x32xbf16>, vector<128x32xf32> -> vector<128x32xf32>
    %c0_20 = arith.constant 0 : index
    %c0_21 = arith.constant 0 : index
    %32 = vector.load %arg7[%c0_20, %c0_21] : memref<1x32xf32, #tpu.memory_space<vmem>>, vector<1x32xf32>
    %33 = vector.broadcast %32 : vector<1x32xf32> to vector<128x32xf32>
    %34 = arith.addf %31, %33 : vector<128x32xf32>
    %c0_22 = arith.constant 0 : index
    %c0_23 = arith.constant 0 : index
    %35 = vector.load %arg8[%c0_22, %c0_23] : memref<32x16xbf16, #tpu.memory_space<vmem>>, vector<32x16xbf16>
    %36 = arith.truncf %34 : vector<128x32xf32> to vector<128x32xbf16>
    %cst_24 = arith.constant dense<0.000000e+00> : vector<128x16xf32>
    %37 = tpu.matmul %36, %35, %cst_24 {dimension_numbers = #tpu.dot_dimension_numbers<[1], [0], [0], [1], [0, 0, 1, 1], [], []>} : vector<128x32xbf16>, vector<32x16xbf16>, vector<128x16xf32> -> vector<128x16xf32>
    %c0_25 = arith.constant 0 : index
    %c0_26 = arith.constant 0 : index
    %38 = vector.load %arg9[%c0_25, %c0_26] : memref<1x16xf32, #tpu.memory_space<vmem>>, vector<1x16xf32>
    %39 = vector.broadcast %38 : vector<1x16xf32> to vector<128x16xf32>
    %40 = arith.addf %37, %39 : vector<128x16xf32>
    %41 = vector.shape_cast %40 : vector<128x16xf32> to vector<8x16x16xf32>
    %cst_27 = arith.constant dense<0xFF800000> : vector<8x16xf32>
    %42 = vector.multi_reduction <maximumf>, %41, %cst_27 [1] : vector<8x16x16xf32> to vector<8x16xf32>
    %43 = vector.shape_cast %42 : vector<8x16xf32> to vector<8x1x16xf32>
    %44 = vector.broadcast %43 : vector<8x1x16xf32> to vector<8x16x16xf32>
    %45 = arith.subf %41, %44 : vector<8x16x16xf32>
    %46 = math.exp %45 : vector<8x16x16xf32>
    %cst_28 = arith.constant dense<0.000000e+00> : vector<8x16xf32>
    %47 = vector.multi_reduction <add>, %46, %cst_28 [1] : vector<8x16x16xf32> to vector<8x16xf32>
    %48 = vector.shape_cast %47 : vector<8x16xf32> to vector<8x1x16xf32>
    %49 = tpu.reciprocal %48 {approx = true} : vector<8x1x16xf32> -> vector<8x1x16xf32>
    %50 = vector.broadcast %49 : vector<8x1x16xf32> to vector<8x16x16xf32>
    %51 = arith.mulf %46, %50 : vector<8x16x16xf32>
    %cst_29 = arith.constant 0.000000e+00 : f32
    %52 = vector.broadcast %cst_29 : f32 to vector<8x16x16xf32>
    %cst_30 = arith.constant 0.000000e+00 : f32
    %53 = vector.broadcast %cst_30 : f32 to vector<8x16x16xf32>
    %cst_31 = arith.constant 0.000000e+00 : f32
    %54 = vector.broadcast %cst_31 : f32 to vector<8x16x16xf32>
    %cst_32 = arith.constant 0.000000e+00 : f32
    %55 = vector.broadcast %cst_32 : f32 to vector<8x16x16xf32>
    %56 = vector.extract_strided_slice %46 {offsets = [0, 0, 0], sizes = [8, 1, 16], strides = [1, 1, 1]} : vector<8x16x16xf32> to vector<8x1x16xf32>
    %57 = vector.broadcast %56 : vector<8x1x16xf32> to vector<8x16x16xf32>
    %58 = arith.cmpf ogt, %57, %46 : vector<8x16x16xf32>
    %59 = arith.extui %58 : vector<8x16x16xi1> to vector<8x16x16xi32>
    %60 = arith.sitofp %59 : vector<8x16x16xi32> to vector<8x16x16xf32>
    %61 = arith.addf %52, %60 : vector<8x16x16xf32>
    %62 = vector.extract_strided_slice %46 {offsets = [0, 1, 0], sizes = [8, 1, 16], strides = [1, 1, 1]} : vector<8x16x16xf32> to vector<8x1x16xf32>
    %63 = vector.broadcast %62 : vector<8x1x16xf32> to vector<8x16x16xf32>
    %64 = arith.cmpf ogt, %63, %46 : vector<8x16x16xf32>
    %65 = arith.extui %64 : vector<8x16x16xi1> to vector<8x16x16xi32>
    %66 = arith.sitofp %65 : vector<8x16x16xi32> to vector<8x16x16xf32>
    %67 = arith.addf %53, %66 : vector<8x16x16xf32>
    %68 = vector.extract_strided_slice %46 {offsets = [0, 2, 0], sizes = [8, 1, 16], strides = [1, 1, 1]} : vector<8x16x16xf32> to vector<8x1x16xf32>
    %69 = vector.broadcast %68 : vector<8x1x16xf32> to vector<8x16x16xf32>
    %70 = arith.cmpf ogt, %69, %46 : vector<8x16x16xf32>
    %71 = arith.extui %70 : vector<8x16x16xi1> to vector<8x16x16xi32>
    %72 = arith.sitofp %71 : vector<8x16x16xi32> to vector<8x16x16xf32>
    %73 = arith.addf %54, %72 : vector<8x16x16xf32>
    %74 = vector.extract_strided_slice %46 {offsets = [0, 3, 0], sizes = [8, 1, 16], strides = [1, 1, 1]} : vector<8x16x16xf32> to vector<8x1x16xf32>
    %75 = vector.broadcast %74 : vector<8x1x16xf32> to vector<8x16x16xf32>
    %76 = arith.cmpf ogt, %75, %46 : vector<8x16x16xf32>
    %77 = arith.extui %76 : vector<8x16x16xi1> to vector<8x16x16xi32>
    %78 = arith.sitofp %77 : vector<8x16x16xi32> to vector<8x16x16xf32>
    %79 = arith.addf %55, %78 : vector<8x16x16xf32>
    %80 = vector.extract_strided_slice %46 {offsets = [0, 4, 0], sizes = [8, 1, 16], strides = [1, 1, 1]} : vector<8x16x16xf32> to vector<8x1x16xf32>
    %81 = vector.broadcast %80 : vector<8x1x16xf32> to vector<8x16x16xf32>
    %82 = arith.cmpf ogt, %81, %46 : vector<8x16x16xf32>
    %83 = arith.extui %82 : vector<8x16x16xi1> to vector<8x16x16xi32>
    %84 = arith.sitofp %83 : vector<8x16x16xi32> to vector<8x16x16xf32>
    %85 = arith.addf %61, %84 : vector<8x16x16xf32>
    %86 = vector.extract_strided_slice %46 {offsets = [0, 5, 0], sizes = [8, 1, 16], strides = [1, 1, 1]} : vector<8x16x16xf32> to vector<8x1x16xf32>
    %87 = vector.broadcast %86 : vector<8x1x16xf32> to vector<8x16x16xf32>
    %88 = arith.cmpf ogt, %87, %46 : vector<8x16x16xf32>
    %89 = arith.extui %88 : vector<8x16x16xi1> to vector<8x16x16xi32>
    %90 = arith.sitofp %89 : vector<8x16x16xi32> to vector<8x16x16xf32>
    %91 = arith.addf %67, %90 : vector<8x16x16xf32>
    %92 = vector.extract_strided_slice %46 {offsets = [0, 6, 0], sizes = [8, 1, 16], strides = [1, 1, 1]} : vector<8x16x16xf32> to vector<8x1x16xf32>
    %93 = vector.broadcast %92 : vector<8x1x16xf32> to vector<8x16x16xf32>
    %94 = arith.cmpf ogt, %93, %46 : vector<8x16x16xf32>
    %95 = arith.extui %94 : vector<8x16x16xi1> to vector<8x16x16xi32>
    %96 = arith.sitofp %95 : vector<8x16x16xi32> to vector<8x16x16xf32>
    %97 = arith.addf %73, %96 : vector<8x16x16xf32>
    %98 = vector.extract_strided_slice %46 {offsets = [0, 7, 0], sizes = [8, 1, 16], strides = [1, 1, 1]} : vector<8x16x16xf32> to vector<8x1x16xf32>
    %99 = vector.broadcast %98 : vector<8x1x16xf32> to vector<8x16x16xf32>
    %100 = arith.cmpf ogt, %99, %46 : vector<8x16x16xf32>
    %101 = arith.extui %100 : vector<8x16x16xi1> to vector<8x16x16xi32>
    %102 = arith.sitofp %101 : vector<8x16x16xi32> to vector<8x16x16xf32>
    %103 = arith.addf %79, %102 : vector<8x16x16xf32>
    %104 = vector.extract_strided_slice %46 {offsets = [0, 8, 0], sizes = [8, 1, 16], strides = [1, 1, 1]} : vector<8x16x16xf32> to vector<8x1x16xf32>
    %105 = vector.broadcast %104 : vector<8x1x16xf32> to vector<8x16x16xf32>
    %106 = arith.cmpf ogt, %105, %46 : vector<8x16x16xf32>
    %107 = arith.extui %106 : vector<8x16x16xi1> to vector<8x16x16xi32>
    %108 = arith.sitofp %107 : vector<8x16x16xi32> to vector<8x16x16xf32>
    %109 = arith.addf %85, %108 : vector<8x16x16xf32>
    %110 = vector.extract_strided_slice %46 {offsets = [0, 9, 0], sizes = [8, 1, 16], strides = [1, 1, 1]} : vector<8x16x16xf32> to vector<8x1x16xf32>
    %111 = vector.broadcast %110 : vector<8x1x16xf32> to vector<8x16x16xf32>
    %112 = arith.cmpf ogt, %111, %46 : vector<8x16x16xf32>
    %113 = arith.extui %112 : vector<8x16x16xi1> to vector<8x16x16xi32>
    %114 = arith.sitofp %113 : vector<8x16x16xi32> to vector<8x16x16xf32>
    %115 = arith.addf %91, %114 : vector<8x16x16xf32>
    %116 = vector.extract_strided_slice %46 {offsets = [0, 10, 0], sizes = [8, 1, 16], strides = [1, 1, 1]} : vector<8x16x16xf32> to vector<8x1x16xf32>
    %117 = vector.broadcast %116 : vector<8x1x16xf32> to vector<8x16x16xf32>
    %118 = arith.cmpf ogt, %117, %46 : vector<8x16x16xf32>
    %119 = arith.extui %118 : vector<8x16x16xi1> to vector<8x16x16xi32>
    %120 = arith.sitofp %119 : vector<8x16x16xi32> to vector<8x16x16xf32>
    %121 = arith.addf %97, %120 : vector<8x16x16xf32>
    %122 = vector.extract_strided_slice %46 {offsets = [0, 11, 0], sizes = [8, 1, 16], strides = [1, 1, 1]} : vector<8x16x16xf32> to vector<8x1x16xf32>
    %123 = vector.broadcast %122 : vector<8x1x16xf32> to vector<8x16x16xf32>
    %124 = arith.cmpf ogt, %123, %46 : vector<8x16x16xf32>
    %125 = arith.extui %124 : vector<8x16x16xi1> to vector<8x16x16xi32>
    %126 = arith.sitofp %125 : vector<8x16x16xi32> to vector<8x16x16xf32>
    %127 = arith.addf %103, %126 : vector<8x16x16xf32>
    %128 = vector.extract_strided_slice %46 {offsets = [0, 12, 0], sizes = [8, 1, 16], strides = [1, 1, 1]} : vector<8x16x16xf32> to vector<8x1x16xf32>
    %129 = vector.broadcast %128 : vector<8x1x16xf32> to vector<8x16x16xf32>
    %130 = arith.cmpf ogt, %129, %46 : vector<8x16x16xf32>
    %131 = arith.extui %130 : vector<8x16x16xi1> to vector<8x16x16xi32>
    %132 = arith.sitofp %131 : vector<8x16x16xi32> to vector<8x16x16xf32>
    %133 = arith.addf %109, %132 : vector<8x16x16xf32>
    %134 = vector.extract_strided_slice %46 {offsets = [0, 13, 0], sizes = [8, 1, 16], strides = [1, 1, 1]} : vector<8x16x16xf32> to vector<8x1x16xf32>
    %135 = vector.broadcast %134 : vector<8x1x16xf32> to vector<8x16x16xf32>
    %136 = arith.cmpf ogt, %135, %46 : vector<8x16x16xf32>
    %137 = arith.extui %136 : vector<8x16x16xi1> to vector<8x16x16xi32>
    %138 = arith.sitofp %137 : vector<8x16x16xi32> to vector<8x16x16xf32>
    %139 = arith.addf %115, %138 : vector<8x16x16xf32>
    %140 = vector.extract_strided_slice %46 {offsets = [0, 14, 0], sizes = [8, 1, 16], strides = [1, 1, 1]} : vector<8x16x16xf32> to vector<8x1x16xf32>
    %141 = vector.broadcast %140 : vector<8x1x16xf32> to vector<8x16x16xf32>
    %142 = arith.cmpf ogt, %141, %46 : vector<8x16x16xf32>
    %143 = arith.extui %142 : vector<8x16x16xi1> to vector<8x16x16xi32>
    %144 = arith.sitofp %143 : vector<8x16x16xi32> to vector<8x16x16xf32>
    %145 = arith.addf %121, %144 : vector<8x16x16xf32>
    %146 = vector.extract_strided_slice %46 {offsets = [0, 15, 0], sizes = [8, 1, 16], strides = [1, 1, 1]} : vector<8x16x16xf32> to vector<8x1x16xf32>
    %147 = vector.broadcast %146 : vector<8x1x16xf32> to vector<8x16x16xf32>
    %148 = arith.cmpf ogt, %147, %46 : vector<8x16x16xf32>
    %149 = arith.extui %148 : vector<8x16x16xi1> to vector<8x16x16xi32>
    %150 = arith.sitofp %149 : vector<8x16x16xi32> to vector<8x16x16xf32>
    %151 = arith.addf %127, %150 : vector<8x16x16xf32>
    %152 = arith.addf %133, %139 : vector<8x16x16xf32>
    %153 = arith.addf %145, %151 : vector<8x16x16xf32>
    %154 = arith.addf %152, %153 : vector<8x16x16xf32>
    %cst_33 = arith.constant 4.000000e+00 : f32
    %155 = vector.broadcast %cst_33 : f32 to vector<8x16x16xf32>
    %156 = arith.cmpf olt, %154, %155 : vector<8x16x16xf32>
    %cst_34 = arith.constant 0x7F800000 : f32
    %157 = vector.broadcast %cst_34 : f32 to vector<8x16x16xf32>
    %158 = arith.select %156, %46, %157 : vector<8x16x16xi1>, vector<8x16x16xf32>
    %cst_35 = arith.constant dense<0x7F800000> : vector<8x16xf32>
    %159 = vector.multi_reduction <minimumf>, %158, %cst_35 [1] : vector<8x16x16xf32> to vector<8x16xf32>
    %160 = vector.shape_cast %159 : vector<8x16xf32> to vector<8x1x16xf32>
    %161 = vector.broadcast %160 : vector<8x1x16xf32> to vector<8x16x16xf32>
    %162 = arith.cmpf olt, %46, %161 : vector<8x16x16xf32>
    %cst_36 = arith.constant 0.000000e+00 : f32
    %163 = vector.broadcast %cst_36 : f32 to vector<8x16x16xf32>
    %164 = arith.select %162, %163, %51 : vector<8x16x16xi1>, vector<8x16x16xf32>
    %c0_37 = arith.constant 0 : index
    %c0_38 = arith.constant 0 : index
    %c0_39 = arith.constant 0 : index
    %c0_40 = arith.constant 0 : index
    %165 = vector.load %arg10[%c0_37, %c0_38, %c0_39, %c0_40] : memref<1x8x16x16xf32, #tpu.memory_space<vmem>>, vector<1x8x16x16xf32>
    %166 = vector.shape_cast %165 : vector<1x8x16x16xf32> to vector<8x16x16xf32>
    %167 = vector.shape_cast %164 : vector<8x16x16xf32> to vector<1x8x16x16xf32>
    tpu.vector_store %arg10[%c0_37, %c0_38, %c0_39, %c0_40], %167 {strides = array<i32>} : memref<1x8x16x16xf32, #tpu.memory_space<vmem>>, vector<1x8x16x16xf32>,
    return
  }
  func.func @transform_0(%arg0: i32) -> (i32, i32, i32) {
    %c0_i32 = arith.constant 0 : i32
    %c0_i32_0 = arith.constant 0 : i32
    %c0_i32_1 = arith.constant 0 : i32
    return %arg0, %c0_i32, %c0_i32_0 : i32, i32, i32
  }
  func.func @transform_1(%arg0: i32) -> (i32, i32) {
    %c0_i32 = arith.constant 0 : i32
    %c0_i32_0 = arith.constant 0 : i32
    %c0_i32_1 = arith.constant 0 : i32
    return %c0_i32, %c0_i32_0 : i32, i32
  }
  func.func @transform_2(%arg0: i32) -> (i32, i32) {
    %c0_i32 = arith.constant 0 : i32
    %c0_i32_0 = arith.constant 0 : i32
    %c0_i32_1 = arith.constant 0 : i32
    return %c0_i32, %c0_i32_0 : i32, i32
  }
  func.func @transform_3(%arg0: i32) -> (i32, i32) {
    %c0_i32 = arith.constant 0 : i32
    %c0_i32_0 = arith.constant 0 : i32
    %c0_i32_1 = arith.constant 0 : i32
    return %c0_i32, %c0_i32_0 : i32, i32
  }
  func.func @transform_4(%arg0: i32) -> (i32, i32) {
    %c0_i32 = arith.constant 0 : i32
    %c0_i32_0 = arith.constant 0 : i32
    %c0_i32_1 = arith.constant 0 : i32
    return %c0_i32, %c0_i32_0 : i32, i32
  }
  func.func @transform_5(%arg0: i32) -> (i32, i32) {
    %c0_i32 = arith.constant 0 : i32
    %c0_i32_0 = arith.constant 0 : i32
    %c0_i32_1 = arith.constant 0 : i32
    return %c0_i32, %c0_i32_0 : i32, i32
  }
  func.func @transform_6(%arg0: i32) -> (i32, i32) {
    %c0_i32 = arith.constant 0 : i32
    %c0_i32_0 = arith.constant 0 : i32
    %c0_i32_1 = arith.constant 0 : i32
    return %c0_i32, %c0_i32_0 : i32, i32
  }
  func.func @transform_7(%arg0: i32) -> (i32, i32) {
    %c0_i32 = arith.constant 0 : i32
    %c0_i32_0 = arith.constant 0 : i32
    %c0_i32_1 = arith.constant 0 : i32
    return %c0_i32, %c0_i32_0 : i32, i32
  }
  func.func @transform_8(%arg0: i32) -> (i32, i32) {
    %c0_i32 = arith.constant 0 : i32
    %c0_i32_0 = arith.constant 0 : i32
    %c0_i32_1 = arith.constant 0 : i32
    return %c0_i32, %c0_i32_0 : i32, i32
  }
  func.func @transform_9(%arg0: i32) -> (i32, i32, i32, i32) {
    %c0_i32 = arith.constant 0 : i32
    %c0_i32_0 = arith.constant 0 : i32
    %c0_i32_1 = arith.constant 0 : i32
    %c0_i32_2 = arith.constant 0 : i32
    return %arg0, %c0_i32, %c0_i32_0, %c0_i32_1 : i32, i32, i32, i32
  }
}

</mosaic_0001>

<bundles_post_ra>
// kernel: tpu_custom_call.1
= control target key start
LH: loop header
LB: loop body
LE: loop exit
PB: predicated region body
PF: predicated region fallthrough
CT: control target
= control target key end

     0   :  { %vm6024_vm0 = vcmask 130048   ;;  %s6014_s0 = inlined_call_operand.vmem [shape: bf16[1,128,16], index: 0, kind: input, shape index: {}]   ;;  %s6015_s1 = inlined_call_operand.vmem [shape: bf16[16,32], index: 1, kind: input, shape index: {}]   ;;  %s6016_s2 = inlined_call_operand.vmem [shape: f32[1,32], index: 2, kind: input, shape index: {}]   ;;  %s6017_s3 = inlined_call_operand.vmem [shape: bf16[32,48], index: 3, kind: input, shape index: {}]   ;;  %s6018_s4 = inlined_call_operand.vmem [shape: f32[1,48], index: 4, kind: input, shape index: {}]   ;;  %s6019_s5 = inlined_call_operand.vmem [shape: bf16[48,32], index: 5, kind: input, shape index: {}]   ;;  %s6020_s6 = inlined_call_operand.vmem [shape: f32[1,32], index: 6, kind: input, shape index: {}]   ;;  %s6021_s7 = inlined_call_operand.vmem [shape: bf16[32,16], index: 7, kind: input, shape index: {}]   ;;  %s6022_s8 = inlined_call_operand.vmem [shape: f32[1,16], index: 8, kind: input, shape index: {}]   ;;  %s6023_s9 = inlined_call_operand.hbm [shape: f32[1,8,16,16], index: 9, kind: output, shape index: {}]  }
   0x1   :  { %v3253_v0 = vld [vmem:[%s6015_s1] sm:$0xff]   ;;  %v3255_v2 = vld [vmem:[%s6014_s0 + $0x8] sm:$0xff]   ;;  %v3256_v3 = vld [vmem:[%s6014_s0 + $0x10] sm:$0xff]  }
   0x2   :  { %v3254_v1 = vld [vmem:[%s6014_s0] sm:$0xff]   ;;  %3169 = vmatprep.subr.bf16.mxu0 %v3253_v0  ;;  %v3257_v4 = vld [vmem:[%s6014_s0 + $0x18] sm:$0xff]  }
   0x3   :  { %3170 = vmatpush3.bf16.msra.mxu0 %v3253_v0  ;;  %3171 = vmatprep.mubr.msk.bf16.mxu0 %vm6024_vm0, %v3254_v1  ;;  %v3258_v5 = vld [vmem:[%s6014_s0 + $0x20] sm:$0xff]  }
   0x6   :  { %3172 = vmatmul.mubr.msk.bf16.vlgmr.msra.gmra.mxu0 %vm6024_vm0, %v3255_v2 }
   0x7   :  { %3175 = vmatprep.mubr.msk.bf16.mxu0 %vm6024_vm0, %v3256_v3 }
   0x8   :  { %14 = vsyncpa [#allocation3], 0  ;;  %v3259_v6 = vld [vmem:[%s6014_s0 + $0x28] sm:$0xff]   ;;  %v3260_v7 = vld [vmem:[%s6014_s0 + $0x30] sm:$0xff]   ;;  %vm338_vm1 = vcmask 261120   ;;  %vm579_vm2 = vcmask 392192  }
   0x9   :  { %v3261_v8 = vld [vmem:[%s6014_s0 + $0x38] sm:$0xff]   ;;  %v3262_v9 = vld [vmem:[%s6017_s3 + $0x8] sm:$0xff]   ;;  %v3263_v10 = vld [vmem:[%s6017_s3] sm:$0xff]  }
   0xa   :  { %3187 = vmatprep.subr.bf16.mxu1 %v3262_v9  ;;  %v3264_v11 = vld [vmem:[%s6019_s5 + $0x10] sm:$0xff]   ;;  %v3504_v12 = vld [vmem:[%s6016_s2] ss:$0 sm:$0xff] }
   0xb   :  { %3188 = vmatpush3.bf16.msra.mxu1 %v3262_v9  ;;  %3207 = vmatprep.subr.bf16.mxu0 %v3264_v11 }
   0xc   :  { %3189 = vmatprep.subr.bf16.mxu1 %v3263_v10  ;;  %3208 = vmatpush3.bf16.msra.mxu0 %v3264_v11 }
   0xe   :  { %3176 = vmatmul.mubr.msk.bf16.gmra.mxu0 %vm6024_vm0, %v3257_v4 }
   0xf   :  { %3179 = vmatprep.mubr.msk.bf16.mxu0 %vm6024_vm0, %v3258_v5  ;;  %3190 = vmatpush3.bf16.msra.mxu1 %v3263_v10 }
  0x16   :  { %3180 = vmatmul.mubr.msk.bf16.gmra.mxu0 %vm6024_vm0, %v3259_v6 }
  0x17   :  { %3183 = vmatprep.mubr.msk.bf16.mxu0 %vm6024_vm0, %v3260_v7 }
  0x1e   :  { %3184 = vmatmul.mubr.msk.bf16.gmra.mxu0 %vm6024_vm0, %v3261_v8 }
  0xc6   :  { %v3173_v13 = vpop.f32.mrf.mxu0 }
  0xc7   :  { %v173_v14 = vadd.f32 %v3173_v13, %v3504_v12 }
  0xc8   :  { %v164_v15 = vpop.f32.mrf.mxu0 }
  0xc9   :  { %v245_v16 = vmul.f32 0.70710677, %v173_v14  ;;  %v165_v17 = vadd.f32 %v3504_v12, %v164_v15  ;;  %v229_v57 = vmul.f32 0.5, %v173_v14 }
  0xca   :  { %v3174_v18 = vpop.f32.mrf.mxu0 }
  0xcb   :  { %v243_v19 = vmul.f32 0.70710677, %v165_v17  ;;  %v176_v20 = vadd.f32 %v3174_v18, %v3504_v12  ;;  %3269 = verf.f32 %v245_v16  ;;  %v227_v58 = vmul.f32 0.5, %v165_v17 }
  0xcc   :  { %v167_v21 = vpop.f32.mrf.mxu0 }
  0xcd   :  { %v246_v22 = vmul.f32 0.70710677, %v176_v20  ;;  %v168_v23 = vadd.f32 %v3504_v12, %v167_v21  ;;  %3271 = verf.f32 %v243_v19  ;;  %v230_v54 = vmul.f32 0.5, %v176_v20 }
  0xce   :  { %v3177_v24 = vpop.f32.mrf.mxu0 }
  0xcf   :  { %3273 = verf.f32 %v246_v22  ;;  %v244_v25 = vmul.f32 0.70710677, %v168_v23  ;;  %v3511_v26 = vadd.f32 %v3177_v24, %v3504_v12  ;;  %v228_v61 = vmul.f32 0.5, %v168_v23 }
  0xd0   :  { %v180_v27 = vpop.f32.mrf.mxu0 }
  0xd1   :  { %3275 = verf.f32 %v244_v25  ;;  %v3514_v28 = vadd.f32 %v3504_v12, %v180_v27  ;;  %v249_v29 = vmul.f32 0.70710677, %v3511_v26 }
  0xd2   :  { %v3178_v30 = vpop.f32.mrf.mxu0 }
  0xd3   :  { %v247_v31 = vmul.f32 0.70710677, %v3514_v28  ;;  %v192_v32 = vadd.f32 %v3178_v30, %v3504_v12  ;;  %v231_v20 = vmul.f32 0.5, %v3514_v28 }
  0xd4   :  { %v183_v33 = vpop.f32.mrf.mxu0 }
  0xd5   :  { %3277 = verf.f32 %v247_v31  ;;  %v250_v34 = vmul.f32 0.70710677, %v192_v32  ;;  %v184_v35 = vadd.f32 %v3504_v12, %v183_v33  ;;  %v234_v21 = vmul.f32 0.5, %v192_v32 }
  0xd6   :  { %3279 = verf.f32 %v249_v29  ;;  %v3181_v36 = vpop.f32.mrf.mxu0  ;;  %v233_v29 = vmul.f32 0.5, %v3511_v26 }
  0xd7   :  { %3281 = verf.f32 %v250_v34  ;;  %v248_v37 = vmul.f32 0.70710677, %v184_v35  ;;  %v3521_v38 = vadd.f32 %v3181_v36, %v3504_v12  ;;  %v232_v22 = vmul.f32 0.5, %v184_v35 }
  0xd8   :  { %v196_v39 = vpop.f32.mrf.mxu0  ;;  %v3270_v41 = vpop.eup %3269 }
  0xd9   :  { %3283 = verf.f32 %v248_v37  ;;  %v253_v40 = vmul.f32 0.70710677, %v3521_v38  ;;  %v3525_v42 = vadd.f32 %v3504_v12, %v196_v39  ;;  %v277_v53 = vadd.f32 1.0, %v3270_v41 }
  0xda   :  { %v3182_v43 = vpop.f32.mrf.mxu0  ;;  %v3272_v44 = vpop.eup %3271 }
  0xdb   :  { %v3528_v45 = vadd.f32 %v3182_v43, %v3504_v12  ;;  %v251_v47 = vmul.f32 0.70710677, %v3525_v42  ;;  %3285 = verf.f32 %v253_v40  ;;  %v275_v56 = vadd.f32 1.0, %v3272_v44 }
  0xdc   :  { %v3274_v46 = vpop.eup %3273  ;;  %v199_v48 = vpop.f32.mrf.mxu0  ;;  %v293_v3 = vmul.f32 %v277_v53, %v229_v57  ;;  %v235_v41 = vmul.f32 0.5, %v3525_v42 }
  0xdd   :  { %v278_v49 = vadd.f32 1.0, %v3274_v46  ;;  %v254_v50 = vmul.f32 0.70710677, %v3528_v45  ;;  %v3533_v51 = vadd.f32 %v3504_v12, %v199_v48  ;;  %3287 = verf.f32 %v251_v47 }
  0xde   :  { %v3276_v52 = vpop.eup %3275  ;;  %v3185_v55 = vpop.f32.mrf.mxu0  ;;  %v291_v5 = vmul.f32 %v275_v56, %v227_v58  ;;  %v238_v26 = vmul.f32 0.5, %v3528_v45  ;;  %v237_v47 = vmul.f32 0.5, %v3521_v38 }
  0xdf   :  { %3289 = verf.f32 %v254_v50  ;;  %v252_v59 = vmul.f32 0.70710677, %v3533_v51  ;;  %v294_v60 = vmul.f32 %v278_v49, %v230_v54  ;;  %v3537_v62 = vadd.f32 %v3185_v55, %v3504_v12 }
  0xe0   :  { %v212_v63 = vpop.f32.mrf.mxu0  ;;  %v276_v0 = vadd.f32 1.0, %v3276_v52  ;;  %v236_v44 = vmul.f32 0.5, %v3533_v51 }
  0xe1   :  { %3291 = verf.f32 %v252_v59  ;;  %v3540_v1 = vadd.f32 %v3504_v12, %v212_v63  ;;  %v257_v8 = vmul.f32 0.70710677, %v3537_v62  ;;  %v312_v11 = vpack.c.bf16 %v294_v60, %v293_v3 }
  0xe2   :  { %v3278_v2 = vpop.eup %3277  ;;  %v3186_v4 = vpop.f32.mrf.mxu0  ;;  %v292_v6 = vmul.f32 %v276_v0, %v228_v61  ;;  %v241_v63 = vmul.f32 0.5, %v3537_v62  ;;  %v3266_v62 = vld [vmem:[%s6019_s5] sm:$0xff]  }
  0xe3   :  { %v3280_v7 = vpop.eup %3279  ;;  %v255_v9 = vmul.f32 0.70710677, %v3540_v1  ;;  %v224_v13 = vadd.f32 %v3186_v4, %v3504_v12  ;;  %v279_v16 = vadd.f32 1.0, %v3278_v2  ;;  %v239_v51 = vmul.f32 0.5, %v3540_v1  ;;  %v3265_v1 = vld [vmem:[%s6019_s5 + $0x8] sm:$0xff]  }
  0xe4   :  { %v3282_v10 = vpop.eup %3281  ;;  %v215_v14 = vpop.f32.mrf.mxu0  ;;  %v311_v15 = vpack.c.bf16 %v292_v6, %v291_v5  ;;  %v281_v24 = vadd.f32 1.0, %v3280_v7  ;;  %3209 = vmatprep.subr.bf16.mxu0 %v3265_v1  ;;  %v3267_v7 = vld [vmem:[%s6021_s7 + $0x8] sm:$0xff]  }
  0xe5   :  { %v282_v17 = vadd.f32 1.0, %v3282_v10  ;;  %3293 = verf.f32 %v255_v9  ;;  %v216_v18 = vadd.f32 %v3504_v12, %v215_v14  ;;  %v258_v23 = vmul.f32 0.70710677, %v224_v13  ;;  %3210 = vmatpush3.bf16.msra.mxu0 %v3265_v1  ;;  %3229 = vmatprep.subr.bf16.mxu1 %v3267_v7  ;;  %v3577_v9 = vld [vmem:[%s6018_s4] ss:$0 sm:$0xff] }
  0xe6   :  { %v3284_v19 = vpop.eup %3283  ;;  %3191 = vmatprep.mubr.msk.bf16.mxu1 %vm338_vm1, %v311_v15  ;;  %3295 = verf.f32 %v257_v8  ;;  %v295_v30 = vmul.f32 %v279_v16, %v231_v20  ;;  %v297_v32 = vmul.f32 %v281_v24, %v233_v29  ;;  %v242_v60 = vmul.f32 0.5, %v224_v13  ;;  %3211 = vmatprep.subr.bf16.mxu0 %v3266_v62  ;;  %v3268_v8 = vld [vmem:[%s6021_s7] sm:$0xff]  }
  0xe7   :  { %v280_v25 = vadd.f32 1.0, %v3284_v19  ;;  %v256_v27 = vmul.f32 0.70710677, %v216_v18  ;;  %3192 = vmatmul.mubr.msk.bf16.vlgmr.msra.gmra.mxu1 %vm338_vm1, %v312_v11  ;;  %3297 = verf.f32 %v258_v23  ;;  %v298_v31 = vmul.f32 %v282_v17, %v234_v21 }
  0xe8   :  { %v3286_v33 = vpop.eup %3285  ;;  %v240_v61 = vmul.f32 0.5, %v216_v18  ;;  %3230 = vmatpush3.bf16.msra.mxu1 %v3267_v7 }
  0xe9   :  { %v296_v12 = vmul.f32 %v280_v25, %v232_v22  ;;  %3299 = verf.f32 %v256_v27  ;;  %v314_v36 = vpack.c.bf16 %v298_v31, %v297_v32  ;;  %v285_v43 = vadd.f32 1.0, %v3286_v33  ;;  %3212 = vmatpush3.bf16.msra.mxu0 %v3266_v62  ;;  %3231 = vmatprep.subr.bf16.mxu1 %v3268_v8 }
  0xea   :  { %v3288_v28 = vpop.eup %3287 }
  0xeb   :  { %v313_v34 = vpack.c.bf16 %v296_v12, %v295_v30  ;;  %v283_v37 = vadd.f32 1.0, %v3288_v28  ;;  %v301_v53 = vmul.f32 %v285_v43, %v237_v47 }
  0xec   :  { %v3290_v35 = vpop.eup %3289  ;;  %3232 = vmatpush3.bf16.msra.mxu1 %v3268_v8 }
  0xed   :  { %v286_v39 = vadd.f32 1.0, %v3290_v35  ;;  %3195 = vmatprep.mubr.msk.bf16.mxu1 %vm338_vm1, %v313_v34  ;;  %v299_v48 = vmul.f32 %v283_v37, %v235_v41 }
  0xee   :  { %v3292_v40 = vpop.eup %3291 }
  0xef   :  { %v284_v46 = vadd.f32 1.0, %v3292_v40  ;;  %3196 = vmatmul.mubr.msk.bf16.gmra.mxu1 %vm338_vm1, %v314_v36  ;;  %v302_v49 = vmul.f32 %v286_v39, %v238_v26 }
  0xf1   :  { %v300_v50 = vmul.f32 %v284_v46, %v236_v44  ;;  %v316_v57 = vpack.c.bf16 %v302_v49, %v301_v53 }
  0xf2   :  { %v3294_v52 = vpop.eup %3293 }
  0xf3   :  { %v315_v54 = vpack.c.bf16 %v300_v50, %v299_v48  ;;  %v3296_v55 = vpop.eup %3295  ;;  %v287_v42 = vadd.f32 1.0, %v3294_v52 }
  0xf4   :  { %v3298_v56 = vpop.eup %3297  ;;  %v289_v59 = vadd.f32 1.0, %v3296_v55 }
  0xf5   :  { %3199 = vmatprep.mubr.msk.bf16.mxu1 %vm338_vm1, %v315_v54  ;;  %v290_v58 = vadd.f32 1.0, %v3298_v56  ;;  %v303_v0 = vmul.f32 %v287_v42, %v239_v51 }
  0xf6   :  { %v3300_v45 = vpop.eup %3299  ;;  %v305_v4 = vmul.f32 %v289_v59, %v241_v63 }
  0xf7   :  { %v288_v38 = vadd.f32 1.0, %v3300_v45  ;;  %3200 = vmatmul.mubr.msk.bf16.gmra.mxu1 %vm338_vm1, %v316_v57  ;;  %v306_v2 = vmul.f32 %v290_v58, %v242_v60 }
  0xf9   :  { %v304_v3 = vmul.f32 %v288_v38, %v240_v61  ;;  %v318_v6 = vpack.c.bf16 %v306_v2, %v305_v4 }
  0xfb   :  { %v317_v5 = vpack.c.bf16 %v304_v3, %v303_v0 }
  0xfd   :  { %3203 = vmatprep.mubr.msk.bf16.mxu1 %vm338_vm1, %v317_v5 }
  0xff   :  { %3204 = vmatmul.mubr.msk.bf16.gmra.mxu1 %vm338_vm1, %v318_v6 }
 0x1a7   :  { %v3193_v10 = vpop.f32.mrf.mxu1 }
 0x1a8   :  { %v406_v11 = vadd.f32 %v3193_v10, %v3577_v9 }
 0x1a9   :  { %v397_v13 = vpop.f32.mrf.mxu1 }
 0x1aa   :  { %v398_v14 = vadd.f32 %v3577_v9, %v397_v13  ;;  %v478_v15 = vmul.f32 0.70710677, %v406_v11  ;;  %v462_v59 = vmul.f32 0.5, %v406_v11 }
 0x1ab   :  { %v3194_v16 = vpop.f32.mrf.mxu1 }
 0x1ac   :  { %v476_v17 = vmul.f32 0.70710677, %v398_v14  ;;  %v409_v18 = vadd.f32 %v3194_v16, %v3577_v9  ;;  %v460_v47 = vmul.f32 0.5, %v398_v14 }
 0x1ad   :  { %v400_v19 = vpop.f32.mrf.mxu1 }
 0x1ae   :  { %3301 = verf.f32 %v476_v17  ;;  %v479_v20 = vmul.f32 0.70710677, %v409_v18  ;;  %v401_v21 = vadd.f32 %v3577_v9, %v400_v19  ;;  %v463_v56 = vmul.f32 0.5, %v409_v18 }
 0x1af   :  { %3303 = verf.f32 %v478_v15  ;;  %v3197_v22 = vpop.f32.mrf.mxu1 }
 0x1b0   :  { %3305 = verf.f32 %v479_v20  ;;  %v477_v23 = vmul.f32 0.70710677, %v401_v21  ;;  %v3584_v24 = vadd.f32 %v3197_v22, %v3577_v9  ;;  %v461_v45 = vmul.f32 0.5, %v401_v21 }
 0x1b1   :  { %v413_v25 = vpop.f32.mrf.mxu1 }
 0x1b2   :  { %3307 = verf.f32 %v477_v23  ;;  %v3587_v27 = vadd.f32 %v3577_v9, %v413_v25  ;;  %v482_v29 = vmul.f32 0.70710677, %v3584_v24  ;;  %v466_v25 = vmul.f32 0.5, %v3584_v24 }
 0x1b3   :  { %v3198_v30 = vpop.f32.mrf.mxu1 }
 0x1b4   :  { %v480_v31 = vmul.f32 0.70710677, %v3587_v27  ;;  %v425_v12 = vadd.f32 %v3198_v30, %v3577_v9  ;;  %v464_v21 = vmul.f32 0.5, %v3587_v27 }
 0x1b5   :  { %v416_v33 = vpop.f32.mrf.mxu1 }
 0x1b6   :  { %3309 = verf.f32 %v480_v31  ;;  %v483_v28 = vmul.f32 0.70710677, %v425_v12  ;;  %v3593_v32 = vadd.f32 %v3577_v9, %v416_v33  ;;  %v467_v19 = vmul.f32 0.5, %v425_v12 }
 0x1b7   :  { %3311 = verf.f32 %v482_v29  ;;  %v3201_v34 = vpop.f32.mrf.mxu1 }
 0x1b8   :  { %3313 = verf.f32 %v483_v28  ;;  %v481_v35 = vmul.f32 0.70710677, %v3593_v32  ;;  %v3597_v36 = vadd.f32 %v3201_v34, %v3577_v9  ;;  %v465_v22 = vmul.f32 0.5, %v3593_v32 }
 0x1b9   :  { %v429_v37 = vpop.f32.mrf.mxu1 }
 0x1ba   :  { %3315 = verf.f32 %v481_v35  ;;  %v486_v39 = vmul.f32 0.70710677, %v3597_v36  ;;  %v3601_v41 = vadd.f32 %v3577_v9, %v429_v37 }
 0x1bb   :  { %v3302_v40 = vpop.eup %3301  ;;  %v3202_v43 = vpop.f32.mrf.mxu1 }
 0x1bc   :  { %v3304_v26 = vpop.eup %3303  ;;  %v3604_v44 = vadd.f32 %v3202_v43, %v3577_v9  ;;  %v484_v48 = vmul.f32 0.70710677, %v3601_v41  ;;  %v508_v50 = vadd.f32 1.0, %v3302_v40  ;;  %3317 = verf.f32 %v486_v39 }
 0x1bd   :  { %v3306_v46 = vpop.eup %3305  ;;  %v432_v49 = vpop.f32.mrf.mxu1  ;;  %v510_v55 = vadd.f32 1.0, %v3304_v26  ;;  %v468_v43 = vmul.f32 0.5, %v3601_v41 }
 0x1be   :  { %v511_v52 = vadd.f32 1.0, %v3306_v46  ;;  %v487_v53 = vmul.f32 0.70710677, %v3604_v44  ;;  %3319 = verf.f32 %v484_v48  ;;  %v433_v57 = vadd.f32 %v3577_v9, %v432_v49 }
 0x1bf   :  { %v3308_v54 = vpop.eup %3307  ;;  %v3205_v42 = vpop.f32.mrf.mxu1  ;;  %v524_v63 = vmul.f32 %v508_v50, %v460_v47  ;;  %v526_v3 = vmul.f32 %v510_v55, %v462_v59  ;;  %v471_v24 = vmul.f32 0.5, %v3604_v44  ;;  %v470_v47 = vmul.f32 0.5, %v3597_v36 }
 0x1c0   :  { %v509_v51 = vadd.f32 1.0, %v3308_v54  ;;  %3321 = verf.f32 %v487_v53  ;;  %v3610_v58 = vadd.f32 %v3205_v42, %v3577_v9  ;;  %v527_v60 = vmul.f32 %v511_v52, %v463_v56 }
 0x1c1   :  { %v485_v61 = vmul.f32 0.70710677, %v433_v57  ;;  %v445_v38 = vpop.f32.mrf.mxu1  ;;  %v469_v26 = vmul.f32 0.5, %v433_v57 }
 0x1c2   :  { %v525_v0 = vmul.f32 %v509_v51, %v461_v45  ;;  %v490_v4 = vmul.f32 0.70710677, %v3610_v58  ;;  %v3614_v5 = vadd.f32 %v3577_v9, %v445_v38  ;;  %v547_v10 = vpack.c.bf16 %v527_v60, %v526_v3 }
 0x1c3   :  { %v3310_v2 = vpop.eup %3309  ;;  %3323 = verf.f32 %v485_v61  ;;  %v3206_v6 = vpop.f32.mrf.mxu1  ;;  %v474_v61 = vmul.f32 0.5, %v3610_v58 }
 0x1c4   :  { %v3312_v1 = vpop.eup %3311  ;;  %v546_v62 = vpack.c.bf16 %v525_v0, %v524_v63  ;;  %v457_v7 = vadd.f32 %v3206_v6, %v3577_v9  ;;  %v488_v11 = vmul.f32 0.70710677, %v3614_v5  ;;  %v512_v14 = vadd.f32 1.0, %v3310_v2 }
 0x1c5   :  { %v3314_v8 = vpop.eup %3313  ;;  %v448_v13 = vpop.f32.mrf.mxu1  ;;  %3325 = verf.f32 %v490_v4  ;;  %v514_v18 = vadd.f32 1.0, %v3312_v1  ;;  %v472_v36 = vmul.f32 0.5, %v3614_v5  ;;  %v2850_v5 = vld [vmem:[%s6020_s6] ss:$0 sm:$0xff] }
 0x1c6   :  { %v515_v15 = vadd.f32 1.0, %v3314_v8  ;;  %v491_v16 = vmul.f32 0.70710677, %v457_v7  ;;  %3213 = vmatprep.mubr.msk.bf16.mxu0 %vm579_vm2, %v546_v62  ;;  %3327 = verf.f32 %v488_v11  ;;  %v449_v20 = vadd.f32 %v3577_v9, %v448_v13 }
 0x1c7   :  { %v3316_v17 = vpop.eup %3315  ;;  %3214 = vmatmul.mubr.msk.bf16.vlgmr.msra.gmra.mxu0 %vm579_vm2, %v547_v10  ;;  %v528_v31 = vmul.f32 %v512_v14, %v464_v21  ;;  %v530_v34 = vmul.f32 %v514_v18, %v466_v25  ;;  %v475_v41 = vmul.f32 0.5, %v457_v7 }
 0x1c8   :  { %v513_v23 = vadd.f32 1.0, %v3316_v17  ;;  %3329 = verf.f32 %v491_v16  ;;  %v531_v29 = vmul.f32 %v515_v15, %v467_v19  ;;  %v489_v30 = vmul.f32 0.70710677, %v449_v20 }
 0x1c9   :  { %v3318_v28 = vpop.eup %3317  ;;  %v473_v57 = vmul.f32 0.5, %v449_v20 }
 0x1ca   :  { %v529_v33 = vmul.f32 %v513_v23, %v465_v22  ;;  %3331 = verf.f32 %v489_v30  ;;  %v549_v37 = vpack.c.bf16 %v531_v29, %v530_v34  ;;  %v518_v40 = vadd.f32 1.0, %v3318_v28 }
 0x1cb   :  { %v3320_v12 = vpop.eup %3319 }
 0x1cc   :  { %v548_v35 = vpack.c.bf16 %v529_v33, %v528_v31  ;;  %v516_v27 = vadd.f32 1.0, %v3320_v12  ;;  %v534_v54 = vmul.f32 %v518_v40, %v470_v47 }
 0x1cd   :  { %v3322_v9 = vpop.eup %3321 }
 0x1ce   :  { %v519_v39 = vadd.f32 1.0, %v3322_v9  ;;  %3217 = vmatprep.mubr.msk.bf16.mxu0 %vm579_vm2, %v548_v35  ;;  %v532_v50 = vmul.f32 %v516_v27, %v468_v43 }
 0x1cf   :  { %3218 = vmatmul.mubr.msk.bf16.gmra.mxu0 %vm579_vm2, %v549_v37 }
 0x1d0   :  { %v3324_v32 = vpop.eup %3323  ;;  %v535_v48 = vmul.f32 %v519_v39, %v471_v24 }
 0x1d1   :  { %v517_v46 = vadd.f32 1.0, %v3324_v32 }
 0x1d2   :  { %v3326_v49 = vpop.eup %3325  ;;  %v551_v42 = vpack.c.bf16 %v535_v48, %v534_v54 }
 0x1d3   :  { %v533_v52 = vmul.f32 %v517_v46, %v469_v26  ;;  %v3328_v53 = vpop.eup %3327  ;;  %v522_v59 = vadd.f32 1.0, %v3326_v49 }
 0x1d4   :  { %v520_v51 = vadd.f32 1.0, %v3328_v53 }
 0x1d5   :  { %v3330_v55 = vpop.eup %3329  ;;  %v550_v56 = vpack.c.bf16 %v533_v52, %v532_v50  ;;  %v538_v2 = vmul.f32 %v522_v59, %v474_v61  ;;  %v3649_v50 = vld [vmem:[%s6022_s8] ss:$0 sm:$0xff]  ;;  %s3404_s8 = smov [#allocation2]  }
 0x1d6   :  { %v523_v45 = vadd.f32 1.0, %v3330_v55  ;;  %v536_v63 = vmul.f32 %v520_v51, %v472_v36  ;;  %s2810_s19 = sshll.u32 %s3404_s8, 4  ;;  %s2811_s19 = int_to_ptr.vmem [resolvable:$true] %s2810_s19 }
 0x1d7   :  { %3221 = vmatprep.mubr.msk.bf16.mxu0 %vm579_vm2, %v550_v56  ;;  %v3332_v44 = vpop.eup %3331  ;;  %s3381_s20 = scalar_lea.vmem %s2811_s19, 2048  ;;  %p3386_p1 = scmp.lt.s32.totalorder %s2811_s19, %s2811_s19 }
 0x1d8   :  { %3222 = vmatmul.mubr.msk.bf16.gmra.mxu0 %vm579_vm2, %v551_v42  ;;  %v521_v60 = vadd.f32 1.0, %v3332_v44  ;;  %v539_v38 = vmul.f32 %v523_v45, %v475_v41  ;;  %p3382_p0 = scmp.ne.s32.totalorder %s2811_s19, %s3381_s20  ;;  %p3387_p2 = scmp.lt.s32.totalorder %s3381_s20, %s3381_s20 }
 0x1da   :  { %v537_v0 = vmul.f32 %v521_v60, %v473_v57  ;;  %v553_v4 = vpack.c.bf16 %v539_v38, %v538_v2  ;;  %p3388_p3 = por %p3387_p2, %p3386_p1 }
 0x1dc   :  { %v552_v3 = vpack.c.bf16 %v537_v0, %v536_v63  ;;  %p3389_p4 = pnand %p3388_p3, %p3382_p0 }
 0x1de   :  { %3225 = vmatprep.mubr.msk.bf16.mxu0 %vm579_vm2, %v552_v3 }
 0x1e0   :  { %3226 = vmatmul.mubr.msk.bf16.gmra.mxu0 %vm579_vm2, %v553_v4 }
 0x287   :  { %v3215_v6 = vpop.f32.mrf.mxu0 }
 0x288   :  { %v647_v11 = vadd.f32 %v3215_v6, %v2850_v5 }
 0x289   :  { %v638_v1 = vpop.f32.mrf.mxu0 }
 0x28a   :  { %v639_v58 = vadd.f32 %v2850_v5, %v638_v1 }
 0x28b   :  { %v3216_v62 = vpop.f32.mrf.mxu0 }
 0x28c   :  { %v650_v7 = vadd.f32 %v3216_v62, %v2850_v5 }
 0x28d   :  { %v641_v8 = vpop.f32.mrf.mxu0 }
 0x28e   :  { %v642_v10 = vadd.f32 %v2850_v5, %v641_v8  ;;  %v706_v15 = vpack.c.bf16 %v650_v7, %v647_v11 }
 0x28f   :  { %v3219_v13 = vpop.f32.mrf.mxu0 }
 0x290   :  { %v705_v14 = vpack.c.bf16 %v642_v10, %v639_v58  ;;  %v663_v22 = vadd.f32 %v3219_v13, %v2850_v5 }
 0x291   :  { %v654_v16 = vpop.f32.mrf.mxu0 }
 0x292   :  { %3233 = vmatprep.mubr.msk.bf16.mxu1 %vm338_vm1, %v705_v14  ;;  %v655_v20 = vadd.f32 %v2850_v5, %v654_v16 }
 0x293   :  { %v3220_v17 = vpop.f32.mrf.mxu0  ;;  %3234 = vmatmul.mubr.msk.bf16.vlgmr.msra.gmra.mxu1 %vm338_vm1, %v706_v15 }
 0x294   :  { %v666_v18 = vadd.f32 %v3220_v17, %v2850_v5  ;;  %v1069_v17 = vlaneseq }
 0x295   :  { %v657_v19 = vpop.f32.mrf.mxu0 }
 0x296   :  { %v658_v21 = vadd.f32 %v2850_v5, %v657_v19  ;;  %v708_v29 = vpack.c.bf16 %v666_v18, %v663_v22 }
 0x298   :  { %v707_v23 = vpack.c.bf16 %v658_v21, %v655_v20  ;;  %v3223_v25 = vpop.f32.mrf.mxu0 }
 0x299   :  { %v679_v35 = vadd.f32 %v3223_v25, %v2850_v5 }
 0x29a   :  { %v670_v30 = vpop.f32.mrf.mxu0  ;;  %3237 = vmatprep.mubr.msk.bf16.mxu1 %vm338_vm1, %v707_v23 }
 0x29b   :  { %3238 = vmatmul.mubr.msk.bf16.gmra.mxu1 %vm338_vm1, %v708_v29  ;;  %v671_v34 = vadd.f32 %v2850_v5, %v670_v30 }
 0x29c   :  { %v3224_v31 = vpop.f32.mrf.mxu0 }
 0x29d   :  { %v682_v33 = vadd.f32 %v3224_v31, %v2850_v5 }
 0x29e   :  { %v673_v28 = vpop.f32.mrf.mxu0 }
 0x29f   :  { %v674_v12 = vadd.f32 %v2850_v5, %v673_v28  ;;  %v710_v39 = vpack.c.bf16 %v682_v33, %v679_v35 }
 0x2a0   :  { %v3227_v9 = vpop.f32.mrf.mxu0 }
 0x2a1   :  { %v709_v37 = vpack.c.bf16 %v674_v12, %v671_v34  ;;  %v695_v46 = vadd.f32 %v3227_v9, %v2850_v5  ;;  %v3688_v34 = vshrl.u32 %v1069_v17, 7 }
 0x2a2   :  { %v686_v27 = vpop.f32.mrf.mxu0 }
 0x2a3   :  { %3241 = vmatprep.mubr.msk.bf16.mxu1 %vm338_vm1, %v709_v37  ;;  %v687_v43 = vadd.f32 %v2850_v5, %v686_v27 }
 0x2a4   :  { %v3228_v32 = vpop.f32.mrf.mxu0  ;;  %3242 = vmatmul.mubr.msk.bf16.gmra.mxu1 %vm338_vm1, %v710_v39 }
 0x2a5   :  { %v698_v40 = vadd.f32 %v3228_v32, %v2850_v5 }
 0x2a6   :  { %v689_v24 = vpop.f32.mrf.mxu0 }
 0x2a7   :  { %v690_v26 = vadd.f32 %v2850_v5, %v689_v24  ;;  %v712_v48 = vpack.c.bf16 %v698_v40, %v695_v46 }
 0x2a9   :  { %v711_v47 = vpack.c.bf16 %v690_v26, %v687_v43 }
 0x2ab   :  { %3245 = vmatprep.mubr.msk.bf16.mxu1 %vm338_vm1, %v711_v47 }
 0x2ac   :  { %3246 = vmatmul.mubr.msk.bf16.gmra.mxu1 %vm338_vm1, %v712_v48 }
 0x353   :  { %v3235_v49 = vpop.f32.mrf.mxu1 }
 0x354   :  { %v799_v53 = vadd.f32 %v3235_v49, %v3649_v50 }
 0x355   :  { %v790_v52 = vpop.f32.mrf.mxu1 }
 0x356   :  { %v3653_v55 = vadd.f32 %v3649_v50, %v790_v52  ;;  %v862_v45 = vsel %vm6024_vm0, %v799_v53, -inf }
 0x357   :  { %v3236_v54 = vpop.f32.mrf.mxu1 }
 0x358   :  { %v802_v56 = vadd.f32 %v3236_v54, %v3649_v50  ;;  %v853_v36 = vsel %vm6024_vm0, %v3653_v55, -inf }
 0x359   :  { %v793_v42 = vpop.f32.mrf.mxu1 }
 0x35a   :  { %v863_v51 = vsel %vm6024_vm0, %v802_v56, -inf  ;;  %v794_v44 = vadd.f32 %v3649_v50, %v793_v42 }
 0x35b   :  { %v864_v59 = vmax.f32 %v862_v45, %v863_v51  ;;  %v3239_v41 = vpop.f32.mrf.mxu1 }
 0x35c   :  { %v854_v57 = vsel %vm6024_vm0, %v794_v44, -inf  ;;  %v3663_v63 = vadd.f32 %v3239_v41, %v3649_v50 }
 0x35d   :  { %v865_v60 = vrot.slane %v864_v59, 4  ;;  %v855_v61 = vmax.f32 %v853_v36, %v854_v57  ;;  %v806_v38 = vpop.f32.mrf.mxu1 }
 0x35e   :  { %v3666_v4 = vadd.f32 %v3649_v50, %v806_v38  ;;  %v880_v7 = vsel %vm6024_vm0, %v3663_v63, -inf }
 0x35f   :  { %v866_v0 = vmax.f32 %v864_v59, %v865_v60  ;;  %v856_v2 = vrot.slane %v855_v61, 4  ;;  %v3240_v3 = vpop.f32.mrf.mxu1 }
 0x360   :  { %v3669_v6 = vadd.f32 %v3240_v3, %v3649_v50  ;;  %v871_v14 = vsel %vm6024_vm0, %v3666_v4, -inf }
 0x361   :  { %v867_v1 = vrot.slane %v866_v0, 2  ;;  %v857_v62 = vmax.f32 %v855_v61, %v856_v2  ;;  %v809_v5 = vpop.f32.mrf.mxu1 }
 0x362   :  { %v881_v8 = vsel %vm6024_vm0, %v3669_v6, -inf  ;;  %v3676_v58 = vadd.f32 %v3649_v50, %v809_v5 }
 0x363   :  { %v868_v10 = vmax.f32 %v866_v0, %v867_v1  ;;  %v858_v11 = vrot.slane %v857_v62, 2  ;;  %v882_v13 = vmax.f32 %v880_v7, %v881_v8 }
 0x364   :  { %v872_v15 = vsel %vm6024_vm0, %v3676_v58, -inf  ;;  %v3243_v16 = vpop.f32.mrf.mxu1 }
 0x365   :  { %v869_v18 = vrot.slane %v868_v10, 1  ;;  %v859_v19 = vmax.f32 %v857_v62, %v858_v11  ;;  %v883_v20 = vrot.slane %v882_v13, 4  ;;  %v873_v21 = vmax.f32 %v871_v14, %v872_v15 }
 0x366   :  { %v3683_v22 = vadd.f32 %v3243_v16, %v3649_v50  ;;  %v822_v23 = vpop.f32.mrf.mxu1 }
 0x367   :  { %v870_v25 = vmax.f32 %v868_v10, %v869_v18  ;;  %v860_v29 = vrot.slane %v859_v19, 1  ;;  %v884_v30 = vmax.f32 %v882_v13, %v883_v20  ;;  %v874_v31 = vrot.slane %v873_v21, 4 }
 0x368   :  { %v3686_v33 = vadd.f32 %v3649_v50, %v822_v23  ;;  %v3244_v28 = vpop.f32.mrf.mxu1  ;;  %v898_v27 = vsel %vm6024_vm0, %v3683_v22, -inf }
 0x369   :  { %v927_v12 = vsub.f32 %v799_v53, %v870_v25  ;;  %v928_v35 = vsub.f32 %v802_v56, %v870_v25  ;;  %v861_v9 = vmax.f32 %v859_v19, %v860_v29  ;;  %v885_v37 = vrot.slane %v884_v30, 2 }
 0x36a   :  { %v875_v39 = vmax.f32 %v873_v21, %v874_v31  ;;  %v889_v32 = vsel %vm6024_vm0, %v3686_v33, -inf  ;;  %v3695_v40 = vadd.f32 %v3244_v28, %v3649_v50  ;;  %v825_v24 = vpop.f32.mrf.mxu1 }
 0x36b   :  { %v945_v43 = vmul.f32 1.442695, %v927_v12  ;;  %v947_v26 = vmul.f32 1.442695, %v928_v35  ;;  %v925_v46 = vsub.f32 %v3653_v55, %v861_v9  ;;  %v926_v47 = vsub.f32 %v794_v44, %v861_v9 }
 0x36c   :  { %v886_v48 = vmax.f32 %v884_v30, %v885_v37  ;;  %v876_v49 = vrot.slane %v875_v39, 2  ;;  %v899_v52 = vsel %vm6024_vm0, %v3695_v40, -inf  ;;  %v3701_v53 = vadd.f32 %v3649_v50, %v825_v24  ;;  %v3247_v54 = vpop.f32.mrf.mxu1 }
 0x36d   :  { %3333 = vpow2.f32 %v945_v43  ;;  %v941_v56 = vmul.f32 1.442695, %v925_v46  ;;  %v943_v42 = vmul.f32 1.442695, %v926_v47  ;;  %v900_v45 = vmax.f32 %v898_v27, %v899_v52 }
 0x36e   :  { %3335 = vpow2.f32 %v947_v26  ;;  %v887_v51 = vrot.slane %v886_v48, 1  ;;  %v877_v59 = vmax.f32 %v875_v39, %v876_v49  ;;  %v890_v55 = vsel %vm6024_vm0, %v3701_v53, -inf  ;;  %v838_v44 = vpop.f32.mrf.mxu1 }
 0x36f   :  { %3337 = vpow2.f32 %v941_v56  ;;  %v901_v41 = vrot.slane %v900_v45, 4  ;;  %v891_v36 = vmax.f32 %v889_v32, %v890_v55  ;;  %v3706_v57 = vadd.f32 %v3247_v54, %v3649_v50 }
 0x370   :  { %3339 = vpow2.f32 %v943_v42  ;;  %v888_v60 = vmax.f32 %v886_v48, %v887_v51  ;;  %v878_v61 = vrot.slane %v877_v59, 1  ;;  %v3709_v38 = vadd.f32 %v3649_v50, %v838_v44  ;;  %v3248_v0 = vpop.f32.mrf.mxu1 }
 0x371   :  { %v902_v2 = vmax.f32 %v900_v45, %v901_v41  ;;  %v892_v3 = vrot.slane %v891_v36, 4  ;;  %v916_v1 = vsel %vm6024_vm0, %v3706_v57, -inf  ;;  %v3714_v62 = vadd.f32 %v3248_v0, %v3649_v50 }
 0x372   :  { %v931_v5 = vsub.f32 %v3663_v63, %v888_v60  ;;  %v932_v7 = vsub.f32 %v3669_v6, %v888_v60  ;;  %v879_v8 = vmax.f32 %v877_v59, %v878_v61  ;;  %v907_v10 = vsel %vm6024_vm0, %v3709_v38, -inf  ;;  %v841_v11 = vpop.f32.mrf.mxu1 }
 0x373   :  { %v903_v13 = vrot.slane %v902_v2, 2  ;;  %v893_v14 = vmax.f32 %v891_v36, %v892_v3  ;;  %v917_v15 = vsel %vm6024_vm0, %v3714_v62, -inf  ;;  %v3723_v16 = vadd.f32 %v3649_v50, %v841_v11 }
 0x374   :  { %v953_v17 = vmul.f32 1.442695, %v931_v5  ;;  %v955_v18 = vmul.f32 1.442695, %v932_v7  ;;  %v929_v19 = vsub.f32 %v3666_v4, %v879_v8  ;;  %v930_v63 = vsub.f32 %v3676_v58, %v879_v8 }
 0x375   :  { %v904_v6 = vmax.f32 %v902_v2, %v903_v13  ;;  %v894_v20 = vrot.slane %v893_v14, 2  ;;  %v918_v21 = vmax.f32 %v916_v1, %v917_v15  ;;  %v908_v23 = vsel %vm6024_vm0, %v3723_v16, -inf }
 0x376   :  { %3341 = vpow2.f32 %v953_v17  ;;  %v949_v25 = vmul.f32 1.442695, %v929_v19  ;;  %v951_v29 = vmul.f32 1.442695, %v930_v63  ;;  %v909_v30 = vmax.f32 %v907_v10, %v908_v23 }
 0x377   :  { %3343 = vpow2.f32 %v955_v18  ;;  %v905_v31 = vrot.slane %v904_v6, 1  ;;  %v895_v50 = vmax.f32 %v893_v14, %v894_v20  ;;  %v919_v28 = vrot.slane %v918_v21, 4 }
 0x378   :  { %3345 = vpow2.f32 %v949_v25  ;;  %v910_v12 = vrot.slane %v909_v30, 4  ;;  %v3730_v4 = vsub.s32 0, %v3688_v34  ;;  %v3735_v27 = vsub.s32 1, %v3688_v34 }
 0x379   :  { %3347 = vpow2.f32 %v951_v29  ;;  %v906_v58 = vmax.f32 %v904_v6, %v905_v31  ;;  %v896_v35 = vrot.slane %v895_v50, 1  ;;  %v920_v9 = vmax.f32 %v918_v21, %v919_v28 }
 0x37a   :  { %6073 = vst [vmem:[#allocation5_spill] sm:$0xff] %v3730_v4  ;;  %v3732_v37 = vpop.eup %3333  ;;  %v911_v39 = vmax.f32 %v909_v30, %v910_v12  ;;  %6075 = vst [vmem:[#allocation7_spill] sm:$0xff] %v3735_v27  ;;  %v3738_v32 = vsub.s32 2, %v3688_v34  ;;  %v3741_v24 = vsub.s32 3, %v3688_v34  ;;  %v3754_v42 = vsub.s32 4, %v3688_v34 }
 0x37b   :  { %6074 = vst [vmem:[#allocation6_spill] sm:$0xff] %v3732_v37  ;;  %v3743_v43 = vpop.eup %3335  ;;  %v935_v26 = vsub.f32 %v3683_v22, %v906_v58  ;;  %v936_v46 = vsub.f32 %v3695_v40, %v906_v58  ;;  %v897_v47 = vmax.f32 %v895_v50, %v896_v35  ;;  %v921_v48 = vrot.slane %v920_v9, 2 }
 0x37c   :  { %6076 = vst [vmem:[#allocation8_spill] sm:$0xff] %v3738_v32  ;;  %6077 = vst [vmem:[#allocation9_spill] sm:$0xff] %v3741_v24  ;;  %v3747_v49 = vpop.eup %3337  ;;  %v912_v52 = vrot.slane %v911_v39, 2  ;;  %v982_v54 = vsel %vm6024_vm0, %v3732_v37, 0.0  ;;  %v983_v56 = vsel %vm6024_vm0, %v3743_v43, 0.0  ;;  %v3769_v5 = vsub.s32 5, %v3688_v34 }
 0x37d   :  { %6078 = vst [vmem:[#allocation10_spill] sm:$0xff] %v3743_v43  ;;  %6079 = vst [vmem:[#allocation11_spill] sm:$0xff] %v3754_v42  ;;  %v3756_v45 = vpop.eup %3339  ;;  %v961_v51 = vmul.f32 1.442695, %v935_v26  ;;  %v963_v22 = vmul.f32 1.442695, %v936_v46  ;;  %v933_v40 = vsub.f32 %v3686_v33, %v897_v47  ;;  %v934_v59 = vsub.f32 %v3701_v53, %v897_v47 }
 0x37e   :  { %6080 = vst [vmem:[#allocation12_spill] sm:$0xff] %v3756_v45  ;;  %v922_v55 = vmax.f32 %v920_v9, %v921_v48  ;;  %v913_v44 = vmax.f32 %v911_v39, %v912_v52  ;;  %v973_v41 = vsel %vm6024_vm0, %v3747_v49, 0.0  ;;  %v974_v36 = vsel %vm6024_vm0, %v3756_v45, 0.0  ;;  %6081 = vst [vmem:[#allocation13_spill] sm:$0xff] %v3769_v5 }
 0x37f   :  { %3349 = vpow2.f32 %v961_v51  ;;  %v957_v60 = vmul.f32 1.442695, %v933_v40  ;;  %v959_v61 = vmul.f32 1.442695, %v934_v59  ;;  %v975_v0 = vadd.f32 %v974_v36, %v973_v41 }
 0x380   :  { %3351 = vpow2.f32 %v963_v22  ;;  %v923_v2 = vrot.slane %v922_v55, 1  ;;  %v914_v3 = vrot.slane %v913_v44, 1  ;;  %v984_v1 = vadd.f32 %v983_v56, %v982_v54 }
 0x381   :  { %3353 = vpow2.f32 %v957_v60  ;;  %v976_v33 = vrot.slane %v975_v0, 4  ;;  %v3766_v53 = vrot.slane %v3747_v49, %v3730_v4  ;;  %v3775_v14 = vrot.slane %v3732_v37, %v3730_v4 }
 0x382   :  { %3355 = vpow2.f32 %v959_v61  ;;  %v924_v7 = vmax.f32 %v922_v55, %v923_v2  ;;  %v915_v8 = vmax.f32 %v913_v44, %v914_v3  ;;  %v985_v10 = vrot.slane %v984_v1, 4 }
 0x383   :  { %v3771_v11 = vpop.eup %3341  ;;  %v977_v13 = vadd.f32 %v976_v33, %v975_v0  ;;  %v3778_v15 = vsub.s32 6, %v3688_v34  ;;  %v3781_v17 = vsub.s32 7, %v3688_v34  ;;  %vm1101_vm3 = vcmp.gt.f32.partialorder %v3766_v53, %v3747_v49 }
 0x384   :  { %6082 = vst [vmem:[#allocation14_spill] sm:$0xff] %v3771_v11  ;;  %v3783_v18 = vpop.eup %3343  ;;  %v939_v19 = vsub.f32 %v3706_v57, %v924_v7  ;;  %v940_v63 = vsub.f32 %v3714_v62, %v924_v7  ;;  %v937_v6 = vsub.f32 %v3709_v38, %v915_v8  ;;  %v938_v20 = vsub.f32 %v3723_v16, %v915_v8 }
 0x385   :  { %6083 = vst [vmem:[#allocation15_spill] sm:$0xff] %v3778_v15  ;;  %6084 = vst [vmem:[#allocation16_spill] sm:$0xff] %v3781_v17  ;;  %v3789_v21 = vpop.eup %3345  ;;  %v978_v23 = vrot.slane %v977_v13, 2  ;;  %v986_v25 = vadd.f32 %v985_v10, %v984_v1  ;;  %v1000_v29 = vsel %vm6024_vm0, %v3771_v11, 0.0  ;;  %v1001_v34 = vsel %vm6024_vm0, %v3783_v18, 0.0 }
 0x386   :  { %6085 = vst [vmem:[#allocation17_spill] sm:$0xff] %v3783_v18  ;;  %6086 = vst [vmem:[#allocation18_spill] sm:$0xff] %v3789_v21  ;;  %v3797_v57 = vpop.eup %3347  ;;  %v969_v62 = vmul.f32 1.442695, %v939_v19  ;;  %v971_v30 = vmul.f32 1.442695, %v940_v63  ;;  %v1002_v31 = vadd.f32 %v1001_v34, %v1000_v29  ;;  %vm1102_vm4 = vcmp.gt.f32.partialorder %v3766_v53, %v3756_v45 }
 0x387   :  { %6087 = vst [vmem:[#allocation19_spill] sm:$0xff] %v3797_v57  ;;  %v965_v38 = vmul.f32 1.442695, %v937_v6  ;;  %v967_v16 = vmul.f32 1.442695, %v938_v20  ;;  %v979_v50 = vadd.f32 %v978_v23, %v977_v13  ;;  %v987_v28 = vrot.slane %v986_v25, 2 }
 0x388   :  { %v991_v12 = vsel %vm6024_vm0, %v3789_v21, 0.0  ;;  %3357 = vpow2.f32 %v969_v62  ;;  %v992_v58 = vsel %vm6024_vm0, %v3797_v57, 0.0  ;;  %v1003_v35 = vrot.slane %v1002_v31, 4 }
 0x389   :  { %v1080_v9 = vrot.slane %v3789_v21, %v3730_v4  ;;  %vm1103_vm5 = vcmp.gt.f32.partialorder %v3775_v14, %v3732_v37  ;;  %3359 = vpow2.f32 %v971_v30  ;;  %v980_v39 = vrot.slane %v979_v50, 1 }
 0x38a   :  { %v988_v26 = vadd.f32 %v987_v28, %v986_v25  ;;  %v993_v46 = vadd.f32 %v992_v58, %v991_v12  ;;  %3361 = vpow2.f32 %v965_v38  ;;  %v1004_v47 = vadd.f32 %v1003_v35, %v1002_v31 }
 0x38b   :  { %v1084_v48 = vrot.slane %v3771_v11, %v3730_v4  ;;  %vm1104_vm6 = vcmp.gt.f32.partialorder %v3775_v14, %v3743_v43  ;;  %3363 = vpow2.f32 %v967_v16  ;;  %v981_v52 = vadd.f32 %v980_v39, %v979_v50 }
 0x38c   :  { %v989_v54 = vrot.slane %v988_v26, 1  ;;  %v994_v56 = vrot.slane %v993_v46, 4  ;;  %v3813_v51 = vpop.eup %3349  ;;  %v1005_v22 = vrot.slane %v1004_v47, 2  ;;  %vm1105_vm7 = vcmp.gt.f32.partialorder %v1080_v9, %v3789_v21 }
 0x38d   :  { %6088 = vst [vmem:[#allocation20_spill] sm:$0xff] %v3813_v51  ;;  %vm1106_vm8 = vcmp.gt.f32.partialorder %v1080_v9, %v3797_v57  ;;  %vm1107_vm9 = vcmp.gt.f32.partialorder %v1084_v48, %v3771_v11  ;;  %v3818_v40 = vpop.eup %3351  ;;  %v1018_v44 = vsel %vm6024_vm0, %v3813_v51, 0.0  ;;  %3365 = vrcp.f32 %v981_v52 }
 0x38e   :  { %6089 = vst [vmem:[#allocation21_spill] sm:$0xff] %v3818_v40  ;;  %v990_v59 = vadd.f32 %v989_v54, %v988_v26  ;;  %v995_v55 = vadd.f32 %v994_v56, %v993_v46  ;;  %v3822_v41 = vpop.eup %3353  ;;  %v1006_v36 = vadd.f32 %v1005_v22, %v1004_v47  ;;  %v1019_v60 = vsel %vm6024_vm0, %v3818_v40, 0.0 }
 0x38f   :  { %6090 = vst [vmem:[#allocation22_spill] sm:$0xff] %v3822_v41  ;;  %v3828_v61 = vrot.slane %v3813_v51, %v3730_v4  ;;  %vm1108_vm10 = vcmp.gt.f32.partialorder %v1084_v48, %v3783_v18  ;;  %v3831_v0 = vpop.eup %3355  ;;  %v1009_v3 = vsel %vm6024_vm0, %v3822_v41, 0.0  ;;  %v1020_v1 = vadd.f32 %v1019_v60, %v1018_v44 }
 0x390   :  { %6091 = vst [vmem:[#allocation23_spill] sm:$0xff] %v3831_v0  ;;  %v996_v2 = vrot.slane %v995_v55, 2  ;;  %3367 = vrcp.f32 %v990_v59  ;;  %v1007_v33 = vrot.slane %v1006_v36, 1  ;;  %v1010_v7 = vsel %vm6024_vm0, %v3831_v0, 0.0 }
 0x391   :  { %v1088_v8 = vrot.slane %v3822_v41, %v3730_v4  ;;  %v6025_v10 = vmov 0.0   ;;  %v1011_v63 = vadd.f32 %v1010_v7, %v1009_v3  ;;  %v1021_v6 = vrot.slane %v1020_v1, 4 }
 0x392   :  { %v3843_v13 = vsel %vm1101_vm3, 1.0, %v6025_v10  ;;  %v997_v19 = vadd.f32 %v996_v2, %v995_v55  ;;  %vm1111_vm11 = vcmp.gt.f32.partialorder %v3828_v61, %v3813_v51  ;;  %v1008_v20 = vadd.f32 %v1007_v33, %v1006_v36 }
 0x393   :  { %vm1109_vm12 = vcmp.gt.f32.partialorder %v1088_v8, %v3822_v41  ;;  %vm1110_vm13 = vcmp.gt.f32.partialorder %v1088_v8, %v3831_v0  ;;  %v3853_v23 = vsel %vm1102_vm4, 1.0, %v6025_v10  ;;  %v1012_v29 = vrot.slane %v1011_v63, 4 }
 0x394   :  { %v998_v25 = vrot.slane %v997_v19, 1  ;;  %v1022_v34 = vadd.f32 %v1021_v6, %v1020_v1  ;;  %vm1112_vm14 = vcmp.gt.f32.partialorder %v3828_v61, %v3818_v40  ;;  %v3861_v62 = vsel %vm1103_vm5, 1.0, %v6025_v10 }
 0x395   :  { %3369 = vrcp.f32 %v1008_v20  ;;  %v3867_v53 = vsel %vm1104_vm6, 1.0, %v6025_v10  ;;  %v3872_v30 = vsel %vm1105_vm7, 1.0, %v6025_v10  ;;  %v3877_v38 = vsel %vm1106_vm8, 1.0, %v6025_v10  ;;  %v3879_v31 = vpop.eup %3357 }
 0x396   :  { %6092 = vst [vmem:[#allocation24_spill] sm:$0xff] %v3879_v31  ;;  %v999_v16 = vadd.f32 %v998_v25, %v997_v19  ;;  %v1013_v50 = vadd.f32 %v1012_v29, %v1011_v63  ;;  %v1023_v28 = vrot.slane %v1022_v34, 2  ;;  %v3884_v14 = vsel %vm1107_vm9, 1.0, %v6025_v10  ;;  %v3886_v12 = vpop.eup %3359 }
 0x397   :  { %6093 = vst [vmem:[#allocation25_spill] sm:$0xff] %v3886_v12  ;;  %v1036_v58 = vsel %vm6024_vm0, %v3879_v31, 0.0  ;;  %v1100_v35 = vrot.slane %v3879_v31, %v3730_v4  ;;  %v3895_v9 = vsel %vm1108_vm10, 1.0, %v6025_v10  ;;  %v3900_v39 = vsel %vm1109_vm12, 1.0, %v6025_v10  ;;  %v3902_v26 = vpop.eup %3361 }
 0x398   :  { %6094 = vst [vmem:[#allocation26_spill] sm:$0xff] %v3902_v26  ;;  %v1014_v46 = vrot.slane %v1013_v50, 2  ;;  %v1024_v47 = vadd.f32 %v1023_v28, %v1022_v34  ;;  %v1037_v52 = vsel %vm6024_vm0, %v3886_v12, 0.0  ;;  %3371 = vrcp.f32 %v999_v16  ;;  %v3906_v54 = vpop.eup %3363 }
 0x399   :  { %6095 = vst [vmem:[#allocation27_spill] sm:$0xff] %v3906_v54  ;;  %v1027_v48 = vsel %vm6024_vm0, %v3902_v26, 0.0  ;;  %v1038_v56 = vadd.f32 %v1037_v52, %v1036_v58  ;;  %v1096_v22 = vrot.slane %v3902_v26, %v3730_v4  ;;  %vm1115_vm15 = vcmp.gt.f32.partialorder %v1100_v35, %v3879_v31 }
 0x39a   :  { %v1015_v59 = vadd.f32 %v1014_v46, %v1013_v50  ;;  %v1025_v55 = vrot.slane %v1024_v47, 1  ;;  %v1028_v44 = vsel %vm6024_vm0, %v3906_v54, 0.0  ;;  %vm1116_vm1 = vcmp.gt.f32.partialorder %v1100_v35, %v3886_v12  ;;  %v3366_v36 = vpop.eup %3365 }
 0x39b   :  { %v1029_v60 = vadd.f32 %v1028_v44, %v1027_v48  ;;  %v1039_v2 = vrot.slane %v1038_v56, 4  ;;  %vm1113_vm2 = vcmp.gt.f32.partialorder %v1096_v22, %v3902_v26  ;;  %vm1114_vm3 = vcmp.gt.f32.partialorder %v1096_v22, %v3906_v54 }
 0x39c   :  { %v1016_v3 = vrot.slane %v1015_v59, 1  ;;  %v1026_v1 = vadd.f32 %v1025_v55, %v1024_v47  ;;  %v3919_v33 = vmul.f32 %v3366_v36, %v3747_v49  ;;  %v3922_v7 = vmul.f32 %v3366_v36, %v3756_v45 }
 0x39d   :  { %v3368_v19 = vpop.eup %3367  ;;  %v1030_v63 = vrot.slane %v1029_v60, 4  ;;  %v1040_v6 = vadd.f32 %v1039_v2, %v1038_v56  ;;  %v3927_v20 = vsel %vm1110_vm13, 1.0, %v6025_v10  ;;  %v3933_v25 = vsel %vm1111_vm11, 1.0, %v6025_v10 }
 0x39e   :  { %6096 = vst [vmem:[#allocation28_spill] sm:$0xff] %v3919_v33  ;;  %6097 = vst [vmem:[#allocation29_spill] sm:$0xff] %v3922_v7  ;;  %v1017_v29 = vadd.f32 %v1016_v3, %v1015_v59  ;;  %3373 = vrcp.f32 %v1026_v1  ;;  %v3936_v34 = vmul.f32 %v3368_v19, %v3732_v37  ;;  %v3939_v16 = vmul.f32 %v3368_v19, %v3743_v43 }
 0x39f   :  { %v1031_v50 = vadd.f32 %v1030_v63, %v1029_v60  ;;  %v1041_v28 = vrot.slane %v1040_v6, 2  ;;  %v3945_v8 = vsel %vm1112_vm14, 1.0, %v6025_v10  ;;  %v3950_v58 = vsel %vm1113_vm2, 1.0, %v6025_v10 }
 0x3a0   :  { %6098 = vst [vmem:[#allocation30_spill] sm:$0xff] %v3936_v34  ;;  %6099 = vst [vmem:[#allocation31_spill] sm:$0xff] %v3939_v16  ;;  %3375 = vrcp.f32 %v1017_v29  ;;  %v3955_v46 = vsel %vm1114_vm3, 1.0, %v6025_v10  ;;  %v3960_v47 = vsel %vm1115_vm15, 1.0, %v6025_v10  ;;  %v3965_v61 = vsel %vm1116_vm1, 1.0, %v6025_v10 }
 0x3a1   :  { %v1032_v52 = vrot.slane %v1031_v50, 2  ;;  %v1042_v48 = vadd.f32 %v1041_v28, %v1040_v6  ;;  %v1168_v56 = vrot.slane %v3747_v49, %v3735_v27  ;;  %v1172_v22 = vrot.slane %v3732_v37, %v3735_v27 }
 0x3a2   :  { %v3370_v59 = vpop.eup %3369  ;;  %v1176_v55 = vrot.slane %v3789_v21, %v3735_v27  ;;  %v1180_v44 = vrot.slane %v3771_v11, %v3735_v27  ;;  %v1184_v35 = vrot.slane %v3822_v41, %v3735_v27  ;;  %v1188_v36 = vrot.slane %v3813_v51, %v3735_v27 }
 0x3a3   :  { %v1033_v60 = vadd.f32 %v1032_v52, %v1031_v50  ;;  %v1043_v2 = vrot.slane %v1042_v48, 1  ;;  %v3980_v3 = vmul.f32 %v3370_v59, %v3771_v11  ;;  %v3983_v1 = vmul.f32 %v3370_v59, %v3783_v18 }
 0x3a4   :  { %v1192_v19 = vrot.slane %v3902_v26, %v3735_v27  ;;  %v1196_v63 = vrot.slane %v3879_v31, %v3735_v27  ;;  %vm1197_vm4 = vcmp.gt.f32.partialorder %v1168_v56, %v3747_v49  ;;  %vm1198_vm5 = vcmp.gt.f32.partialorder %v1168_v56, %v3756_v45 }
 0x3a5   :  { %6100 = vst [vmem:[#allocation32_spill] sm:$0xff] %v3980_v3  ;;  %6101 = vst [vmem:[#allocation33_spill] sm:$0xff] %v3983_v1  ;;  %v3372_v6 = vpop.eup %3371  ;;  %v1034_v29 = vrot.slane %v1033_v60, 1  ;;  %v1044_v50 = vadd.f32 %v1043_v2, %v1042_v48  ;;  %vm1199_vm6 = vcmp.gt.f32.partialorder %v1172_v22, %v3732_v37  ;;  %vm1200_vm7 = vcmp.gt.f32.partialorder %v1172_v22, %v3743_v43 }
 0x3a6   :  { %v3994_v28 = vmul.f32 %v3372_v6, %v3789_v21  ;;  %v3997_v52 = vmul.f32 %v3372_v6, %v3797_v57  ;;  %vm1201_vm8 = vcmp.gt.f32.partialorder %v1176_v55, %v3789_v21  ;;  %vm1202_vm9 = vcmp.gt.f32.partialorder %v1176_v55, %v3797_v57 }
 0x3a7   :  { %v1035_v59 = vadd.f32 %v1034_v29, %v1033_v60  ;;  %3377 = vrcp.f32 %v1044_v50  ;;  %vm1203_vm10 = vcmp.gt.f32.partialorder %v1180_v44, %v3771_v11  ;;  %vm1204_vm11 = vcmp.gt.f32.partialorder %v1180_v44, %v3783_v18 }
 0x3a8   :  { %6102 = vst [vmem:[#allocation34_spill] sm:$0xff] %v3994_v28  ;;  %6103 = vst [vmem:[#allocation35_spill] sm:$0xff] %v3997_v52  ;;  %vm1205_vm12 = vcmp.gt.f32.partialorder %v1184_v35, %v3822_v41  ;;  %vm1206_vm13 = vcmp.gt.f32.partialorder %v1184_v35, %v3831_v0  ;;  %vm1207_vm14 = vcmp.gt.f32.partialorder %v1188_v36, %v3813_v51  ;;  %v4014_v48 = vsel %vm1197_vm4, 1.0, %v6025_v10 }
 0x3a9   :  { %vm1208_vm15 = vcmp.gt.f32.partialorder %v1188_v36, %v3818_v40  ;;  %3379 = vrcp.f32 %v1035_v59  ;;  %vm1209_vm1 = vcmp.gt.f32.partialorder %v1192_v19, %v3902_v26  ;;  %vm1210_vm2 = vcmp.gt.f32.partialorder %v1192_v19, %v3906_v54 }
 0x3aa   :  { %vm1211_vm3 = vcmp.gt.f32.partialorder %v1196_v63, %v3879_v31  ;;  %vm1212_vm0 = vcmp.gt.f32.partialorder %v1196_v63, %v3886_v12  ;;  %v4019_v60 = vsel %vm1198_vm5, 1.0, %v6025_v10  ;;  %v4024_v2 = vsel %vm1199_vm6, 1.0, %v6025_v10 }
 0x3ab   :  { %v3374_v6 = vpop.eup %3373  ;;  %v4029_v29 = vsel %vm1200_vm7, 1.0, %v6025_v10  ;;  %v4034_v50 = vsel %vm1201_vm8, 1.0, %v6025_v10  ;;  %v4039_v56 = vsel %vm1202_vm9, 1.0, %v6025_v10  ;;  %v4044_v59 = vsel %vm1203_vm10, 1.0, %v6025_v10 }
 0x3ac   :  { %v4047_v1 = vmul.f32 %v3374_v6, %v3813_v51  ;;  %v4050_v22 = vmul.f32 %v3374_v6, %v3818_v40  ;;  %v4055_v3 = vsel %vm1204_vm11, 1.0, %v6025_v10  ;;  %v4060_v55 = vsel %vm1205_vm12, 1.0, %v6025_v10 }
 0x3ad   :  { %6106 = vst [vmem:[#allocation38_spill] sm:$0xff] %v4055_v3  ;;  %6107 = vst [vmem:[#allocation39_spill] sm:$0xff] %v4060_v55  ;;  %v3376_v52 = vpop.eup %3375  ;;  %v4065_v28 = vsel %vm1206_vm13, 1.0, %v6025_v10  ;;  %v4070_v6 = vsel %vm1207_vm14, 1.0, %v6025_v10  ;;  %v4075_v44 = vsel %vm1208_vm15, 1.0, %v6025_v10  ;;  %v4091_v16 = vsel %vm1210_vm2, 1.0, %v6025_v10 }
 0x3ae   :  { %6104 = vst [vmem:[#allocation36_spill] sm:$0xff] %v4047_v1  ;;  %6105 = vst [vmem:[#allocation37_spill] sm:$0xff] %v4050_v22  ;;  %v4080_v22 = vsel %vm1209_vm1, 1.0, %v6025_v10  ;;  %v4083_v1 = vmul.f32 %v3376_v52, %v3822_v41  ;;  %v4086_v35 = vmul.f32 %v3376_v52, %v3831_v0  ;;  %v4096_v36 = vsel %vm1211_vm3, 1.0, %v6025_v10 }
 0x3af   :  { %6108 = vst [vmem:[#allocation40_spill] sm:$0xff] %v4065_v28  ;;  %6109 = vst [vmem:[#allocation41_spill] sm:$0xff] %v4070_v6  ;;  %v4101_v34 = vsel %vm1212_vm0, 1.0, %v6025_v10  ;;  %v1268_v52 = vrot.slane %v3732_v37, %v3738_v32  ;;  %v1272_v19 = vrot.slane %v3789_v21, %v3738_v32  ;;  %v1280_v7 = vrot.slane %v3822_v41, %v3738_v32 }
 0x3b0   :  { %6110 = vst [vmem:[#allocation42_spill] sm:$0xff] %v4075_v44  ;;  %6111 = vst [vmem:[#allocation43_spill] sm:$0xff] %v4080_v22  ;;  %v1284_v63 = vrot.slane %v3813_v51, %v3738_v32  ;;  %v1288_v10 = vrot.slane %v3902_v26, %v3738_v32  ;;  %v1292_v33 = vrot.slane %v3879_v31, %v3738_v32  ;;  %v6119_v17 = vmov 0.0  }
 0x3b1   :  { %6112 = vst [vmem:[#allocation44_spill] sm:$0xff] %v4083_v1  ;;  %6113 = vst [vmem:[#allocation45_spill] sm:$0xff] %v4086_v35  ;;  %v1264_v1 = vrot.slane %v3747_v49, %v3738_v32  ;;  %v1276_v35 = vrot.slane %v3771_v11, %v3738_v32  ;;  %vm1295_vm5 = vcmp.gt.f32.partialorder %v1268_v52, %v3732_v37 }
 0x3b2   :  { %6114 = vst [vmem:[#allocation46_spill] sm:$0xff] %v4091_v16  ;;  %6115 = vst [vmem:[#allocation47_spill] sm:$0xff] %v4096_v36  ;;  %vm1296_vm6 = vcmp.gt.f32.partialorder %v1268_v52, %v3743_v43  ;;  %vm1297_vm7 = vcmp.gt.f32.partialorder %v1272_v19, %v3789_v21  ;;  %vm1298_vm8 = vcmp.gt.f32.partialorder %v1272_v19, %v3797_v57 }
 0x3b3   :  { %6116 = vst [vmem:[#allocation48_spill] sm:$0xff] %v4101_v34  ;;  %vm1293_vm0 = vcmp.gt.f32.partialorder %v1264_v1, %v3747_v49  ;;  %vm1294_vm4 = vcmp.gt.f32.partialorder %v1264_v1, %v3756_v45  ;;  %vm1299_vm9 = vcmp.gt.f32.partialorder %v1276_v35, %v3771_v11  ;;  %vm1300_vm10 = vcmp.gt.f32.partialorder %v1276_v35, %v3783_v18 }
 0x3b4   :  { %vm1301_vm11 = vcmp.gt.f32.partialorder %v1280_v7, %v3822_v41  ;;  %vm1302_vm12 = vcmp.gt.f32.partialorder %v1280_v7, %v3831_v0  ;;  %vm1303_vm13 = vcmp.gt.f32.partialorder %v1284_v63, %v3813_v51  ;;  %v3378_v32 = vpop.eup %3377  ;;  %vm1304_vm14 = vcmp.gt.f32.partialorder %v1284_v63, %v3818_v40 }
 0x3b5   :  { %vm1305_vm15 = vcmp.gt.f32.partialorder %v1288_v10, %v3902_v26  ;;  %vm1306_vm1 = vcmp.gt.f32.partialorder %v1288_v10, %v3906_v54  ;;  %vm1307_vm2 = vcmp.gt.f32.partialorder %v1292_v33, %v3879_v31  ;;  %v4135_v27 = vmul.f32 %v3378_v32, %v3879_v31 }
 0x3b6   :  { %v4138_v4 = vmul.f32 %v3378_v32, %v3886_v12  ;;  %vm1308_vm3 = vcmp.gt.f32.partialorder %v1292_v33, %v3886_v12  ;;  %v4144_v15 = vsel %vm1293_vm0, 1.0, %v6119_v17  ;;  %v3380_v34 = vpop.eup %3379  ;;  %v4149_v36 = vsel %vm1294_vm4, 1.0, %v6119_v17 }
 0x3b7   :  { %6117 = vst [vmem:[#allocation49_spill] sm:$0xff] %v4135_v27  ;;  %6120 = vst [vmem:[#allocation51_spill] sm:$0xff] %v4144_v15  ;;  %v4154_v27 = vsel %vm1295_vm5, 1.0, %v6119_v17  ;;  %v4159_v32 = vsel %vm1296_vm6, 1.0, %v6119_v17  ;;  %v4167_v15 = vmul.f32 %v3380_v34, %v3902_v26  ;;  %v4170_v1 = vmul.f32 %v3380_v34, %v3906_v54 }
 0x3b8   :  { %6118 = vst [vmem:[#allocation50_spill] sm:$0xff] %v4138_v4  ;;  %6121 = vst [vmem:[#allocation52_spill] sm:$0xff] %v4149_v36  ;;  %v4164_v4 = vsel %vm1297_vm7, 1.0, %v6119_v17  ;;  %v4180_v52 = vsel %vm1299_vm9, 1.0, %v6119_v17  ;;  %v4190_v34 = vsel %vm1301_vm11, 1.0, %v6119_v17  ;;  %v4195_v19 = vsel %vm1302_vm12, 1.0, %v6119_v17 }
 0x3b9   :  { %6122 = vst [vmem:[#allocation53_spill] sm:$0xff] %v4154_v27  ;;  %6123 = vst [vmem:[#allocation54_spill] sm:$0xff] %v4159_v32  ;;  %v4175_v27 = vsel %vm1298_vm8, 1.0, %v6119_v17  ;;  %v4205_v35 = vsel %vm1304_vm14, 1.0, %v6119_v17  ;;  %v4215_v7 = vsel %vm1306_vm1, 1.0, %v6119_v17  ;;  %v4225_v63 = vsel %vm1308_vm3, 1.0, %v6119_v17 }
 0x3ba   :  { %6124 = vst [vmem:[#allocation55_spill] sm:$0xff] %v4164_v4  ;;  %6125 = vst [vmem:[#allocation56_spill] sm:$0xff] %v4167_v15  ;;  %v4185_v4 = vsel %vm1300_vm10, 1.0, %v6119_v17  ;;  %v4210_v15 = vsel %vm1305_vm15, 1.0, %v6119_v17  ;;  %v1368_v10 = vrot.slane %v3789_v21, %v3741_v24  ;;  %v1380_v33 = vrot.slane %v3813_v51, %v3741_v24 }
 0x3bb   :  { %6126 = vst [vmem:[#allocation57_spill] sm:$0xff] %v4170_v1  ;;  %6127 = vst [vmem:[#allocation58_spill] sm:$0xff] %v4175_v27  ;;  %v4200_v1 = vsel %vm1303_vm13, 1.0, %v6119_v17 }
 0x3bc   :  { %6128 = vst [vmem:[#allocation59_spill] sm:$0xff] %v4180_v52  ;;  %6129 = vst [vmem:[#allocation60_spill] sm:$0xff] %v4185_v4  ;;  %vm1393_vm7 = vcmp.gt.f32.partialorder %v1368_v10, %v3789_v21  ;;  %vm1394_vm8 = vcmp.gt.f32.partialorder %v1368_v10, %v3797_v57  ;;  %vm1399_vm13 = vcmp.gt.f32.partialorder %v1380_v33, %v3813_v51 }
 0x3bd   :  { %6130 = vst [vmem:[#allocation61_spill] sm:$0xff] %v4190_v34  ;;  %6131 = vst [vmem:[#allocation62_spill] sm:$0xff] %v4195_v19  ;;  %v4220_v19 = vsel %vm1307_vm2, 1.0, %v6119_v17  ;;  %vm1400_vm14 = vcmp.gt.f32.partialorder %v1380_v33, %v3818_v40  ;;  %v4282_v27 = vsel %vm1393_vm7, 1.0, %v6119_v17 }
 0x3be   :  { %6132 = vst [vmem:[#allocation63_spill] sm:$0xff] %v4200_v1  ;;  %6133 = vst [vmem:[#allocation64_spill] sm:$0xff] %v4205_v35  ;;  %v1360_v35 = vrot.slane %v3747_v49, %v3741_v24  ;;  %v1388_v1 = vrot.slane %v3879_v31, %v3741_v24 }
 0x3bf   :  { %6134 = vst [vmem:[#allocation65_spill] sm:$0xff] %v4210_v15  ;;  %6135 = vst [vmem:[#allocation66_spill] sm:$0xff] %v4215_v7  ;;  %v1364_v15 = vrot.slane %v3732_v37, %v3741_v24  ;;  %v1372_v7 = vrot.slane %v3771_v11, %v3741_v24 }
 0x3c0   :  { %6136 = vst [vmem:[#allocation67_spill] sm:$0xff] %v4220_v19  ;;  %6137 = vst [vmem:[#allocation68_spill] sm:$0xff] %v4225_v63  ;;  %v1376_v19 = vrot.slane %v3822_v41, %v3741_v24  ;;  %v1384_v63 = vrot.slane %v3902_v26, %v3741_v24  ;;  %vm1389_vm0 = vcmp.gt.f32.partialorder %v1360_v35, %v3747_v49 }
 0x3c1   :  { %vm1390_vm4 = vcmp.gt.f32.partialorder %v1360_v35, %v3756_v45  ;;  %vm1391_vm5 = vcmp.gt.f32.partialorder %v1364_v15, %v3732_v37  ;;  %vm1392_vm6 = vcmp.gt.f32.partialorder %v1364_v15, %v3743_v43  ;;  %vm1395_vm9 = vcmp.gt.f32.partialorder %v1372_v7, %v3771_v11  ;;  %6142 = vst [vmem:[#allocation73_spill] sm:$0xff] %v4282_v27 }
 0x3c2   :  { %vm1396_vm10 = vcmp.gt.f32.partialorder %v1372_v7, %v3783_v18  ;;  %vm1397_vm11 = vcmp.gt.f32.partialorder %v1376_v19, %v3822_v41  ;;  %vm1398_vm12 = vcmp.gt.f32.partialorder %v1376_v19, %v3831_v0  ;;  %vm1401_vm15 = vcmp.gt.f32.partialorder %v1384_v63, %v3902_v26 }
 0x3c3   :  { %vm1402_vm1 = vcmp.gt.f32.partialorder %v1384_v63, %v3906_v54  ;;  %vm1403_vm2 = vcmp.gt.f32.partialorder %v1388_v1, %v3879_v31  ;;  %vm1404_vm3 = vcmp.gt.f32.partialorder %v1388_v1, %v3886_v12  ;;  %v4262_v24 = vsel %vm1389_vm0, 1.0, %v6119_v17 }
 0x3c4   :  { %6138 = vst [vmem:[#allocation69_spill] sm:$0xff] %v4262_v24  ;;  %v4267_v34 = vsel %vm1390_vm4, 1.0, %v6119_v17  ;;  %v4272_v4 = vsel %vm1391_vm5, 1.0, %v6119_v17  ;;  %v4277_v52 = vsel %vm1392_vm6, 1.0, %v6119_v17  ;;  %v4287_v35 = vsel %vm1394_vm8, 1.0, %v6119_v17 }
 0x3c5   :  { %6139 = vst [vmem:[#allocation70_spill] sm:$0xff] %v4267_v34  ;;  %6140 = vst [vmem:[#allocation71_spill] sm:$0xff] %v4272_v4  ;;  %v4292_v34 = vsel %vm1395_vm9, 1.0, %v6119_v17  ;;  %v4297_v15 = vsel %vm1396_vm10, 1.0, %v6119_v17  ;;  %v4307_v10 = vsel %vm1398_vm12, 1.0, %v6119_v17  ;;  %v4317_v7 = vsel %vm1400_vm14, 1.0, %v6119_v17 }
 0x3c6   :  { %6141 = vst [vmem:[#allocation72_spill] sm:$0xff] %v4277_v52  ;;  %6143 = vst [vmem:[#allocation74_spill] sm:$0xff] %v4287_v35  ;;  %v4302_v52 = vsel %vm1397_vm11, 1.0, %v6119_v17  ;;  %v4312_v35 = vsel %vm1399_vm13, 1.0, %v6119_v17  ;;  %v4327_v19 = vsel %vm1402_vm1, 1.0, %v6119_v17  ;;  %v4337_v33 = vsel %vm1404_vm3, 1.0, %v6119_v17 }
 0x3c7   :  { %6144 = vst [vmem:[#allocation75_spill] sm:$0xff] %v4292_v34  ;;  %6145 = vst [vmem:[#allocation76_spill] sm:$0xff] %v4297_v15  ;;  %v4322_v15 = vsel %vm1401_vm15, 1.0, %v6119_v17  ;;  %v1464_v63 = vrot.slane %v3789_v21, %v3754_v42  ;;  %v1476_v1 = vrot.slane %v3813_v51, %v3754_v42 }
 0x3c8   :  { %6146 = vst [vmem:[#allocation77_spill] sm:$0xff] %v4302_v52  ;;  %6147 = vst [vmem:[#allocation78_spill] sm:$0xff] %v4307_v10  ;;  %v4332_v10 = vsel %vm1403_vm2, 1.0, %v6119_v17 }
 0x3c9   :  { %6148 = vst [vmem:[#allocation79_spill] sm:$0xff] %v4312_v35  ;;  %6149 = vst [vmem:[#allocation80_spill] sm:$0xff] %v4317_v7  ;;  %v1456_v7 = vrot.slane %v3747_v49, %v3754_v42  ;;  %v1484_v35 = vrot.slane %v3879_v31, %v3754_v42  ;;  %vm1489_vm7 = vcmp.gt.f32.partialorder %v1464_v63, %v3789_v21 }
 0x3ca   :  { %6150 = vst [vmem:[#allocation81_spill] sm:$0xff] %v4322_v15  ;;  %6151 = vst [vmem:[#allocation82_spill] sm:$0xff] %v4327_v19  ;;  %v1460_v15 = vrot.slane %v3732_v37, %v3754_v42  ;;  %v1468_v19 = vrot.slane %v3771_v11, %v3754_v42  ;;  %vm1490_vm8 = vcmp.gt.f32.partialorder %v1464_v63, %v3797_v57  ;;  %v2941_v4 = vsel %vm1489_vm7, 1.0, %v6119_v17 }
 0x3cb   :  { %6152 = vst [vmem:[#allocation83_spill] sm:$0xff] %v4332_v10  ;;  %6153 = vst [vmem:[#allocation84_spill] sm:$0xff] %v4337_v33  ;;  %v1472_v10 = vrot.slane %v3822_v41, %v3754_v42  ;;  %v1480_v33 = vrot.slane %v3902_v26, %v3754_v42  ;;  %vm1485_vm0 = vcmp.gt.f32.partialorder %v1456_v7, %v3747_v49  ;;  %v2942_v24 = vsel %vm1490_vm8, 1.0, %v6119_v17 }
 0x3cc   :  { %vm1486_vm4 = vcmp.gt.f32.partialorder %v1456_v7, %v3756_v45  ;;  %vm1487_vm5 = vcmp.gt.f32.partialorder %v1460_v15, %v3732_v37  ;;  %vm1488_vm6 = vcmp.gt.f32.partialorder %v1460_v15, %v3743_v43  ;;  %vm1491_vm9 = vcmp.gt.f32.partialorder %v1468_v19, %v3771_v11 }
 0x3cd   :  { %vm1492_vm10 = vcmp.gt.f32.partialorder %v1468_v19, %v3783_v18  ;;  %vm1493_vm11 = vcmp.gt.f32.partialorder %v1472_v10, %v3822_v41  ;;  %vm1494_vm12 = vcmp.gt.f32.partialorder %v1472_v10, %v3831_v0  ;;  %vm1495_vm13 = vcmp.gt.f32.partialorder %v1476_v1, %v3813_v51 }
 0x3ce   :  { %vm1496_vm14 = vcmp.gt.f32.partialorder %v1476_v1, %v3818_v40  ;;  %vm1497_vm15 = vcmp.gt.f32.partialorder %v1480_v33, %v3902_v26  ;;  %vm1498_vm1 = vcmp.gt.f32.partialorder %v1480_v33, %v3906_v54  ;;  %vm1499_vm2 = vcmp.gt.f32.partialorder %v1484_v35, %v3879_v31 }
 0x3cf   :  { %vm1500_vm3 = vcmp.gt.f32.partialorder %v1484_v35, %v3886_v12  ;;  %v2937_v42 = vsel %vm1485_vm0, 1.0, %v6119_v17  ;;  %v2938_v52 = vsel %vm1486_vm4, 1.0, %v6119_v17  ;;  %v2939_v34 = vsel %vm1487_vm5, 1.0, %v6119_v17 }
 0x3d0   :  { %v2940_v27 = vsel %vm1488_vm6, 1.0, %v6119_v17  ;;  %v2943_v7 = vsel %vm1491_vm9, 1.0, %v6119_v17  ;;  %v2944_v32 = vsel %vm1492_vm10, 1.0, %v6119_v17  ;;  %v2945_v15 = vsel %vm1493_vm11, 1.0, %v6119_v17 }
 0x3d1   :  { %v2946_v36 = vsel %vm1494_vm12, 1.0, %v6119_v17  ;;  %v2947_v63 = vsel %vm1495_vm13, 1.0, %v6119_v17  ;;  %v2948_v16 = vsel %vm1496_vm14, 1.0, %v6119_v17  ;;  %v2949_v19 = vsel %vm1497_vm15, 1.0, %v6119_v17 }
 0x3d2   :  { %v2950_v22 = vsel %vm1498_vm1, 1.0, %v6119_v17  ;;  %v2951_v10 = vsel %vm1499_vm2, 1.0, %v6119_v17  ;;  %v2952_v44 = vsel %vm1500_vm3, 1.0, %v6119_v17  ;;  %v4420_v6 = vadd.f32 %v2937_v42, %v3843_v13 }
 0x3d3   :  { %v4423_v1 = vadd.f32 %v2938_v52, %v3853_v23  ;;  %v4426_v28 = vadd.f32 %v2939_v34, %v3861_v62  ;;  %v4429_v33 = vadd.f32 %v2940_v27, %v3867_v53  ;;  %v4432_v55 = vadd.f32 %v2941_v4, %v3872_v30 }
 0x3d4   :  { %v4435_v3 = vadd.f32 %v2942_v24, %v3877_v38  ;;  %v4438_v35 = vadd.f32 %v2943_v7, %v3884_v14  ;;  %v4441_v42 = vadd.f32 %v2944_v32, %v3895_v9  ;;  %v4444_v13 = vadd.f32 %v2945_v15, %v3900_v39 }
 0x3d5   :  { %v4447_v23 = vadd.f32 %v2946_v36, %v3927_v20  ;;  %v4450_v27 = vadd.f32 %v2947_v63, %v3933_v25  ;;  %v4453_v4 = vadd.f32 %v2948_v16, %v3945_v8  ;;  %v4456_v24 = vadd.f32 %v2949_v19, %v3950_v58 }
 0x3d6   :  { %v4459_v62 = vadd.f32 %v2950_v22, %v3955_v46  ;;  %v4462_v53 = vadd.f32 %v2951_v10, %v3960_v47  ;;  %v4465_v30 = vadd.f32 %v2952_v44, %v3965_v61  ;;  %v1552_v38 = vrot.slane %v3747_v49, %v3769_v5 }
 0x3d7   :  { %v1556_v14 = vrot.slane %v3732_v37, %v3769_v5  ;;  %v1560_v9 = vrot.slane %v3789_v21, %v3769_v5  ;;  %v1564_v39 = vrot.slane %v3771_v11, %v3769_v5  ;;  %v1568_v20 = vrot.slane %v3822_v41, %v3769_v5 }
 0x3d8   :  { %v1572_v25 = vrot.slane %v3813_v51, %v3769_v5  ;;  %v1576_v16 = vrot.slane %v3902_v26, %v3769_v5  ;;  %v1580_v8 = vrot.slane %v3879_v31, %v3769_v5  ;;  %vm1581_vm0 = vcmp.gt.f32.partialorder %v1552_v38, %v3747_v49 }
 0x3d9   :  { %vm1582_vm4 = vcmp.gt.f32.partialorder %v1552_v38, %v3756_v45  ;;  %vm1583_vm5 = vcmp.gt.f32.partialorder %v1556_v14, %v3732_v37  ;;  %vm1584_vm6 = vcmp.gt.f32.partialorder %v1556_v14, %v3743_v43  ;;  %vm1585_vm7 = vcmp.gt.f32.partialorder %v1560_v9, %v3789_v21 }
 0x3da   :  { %vm1586_vm8 = vcmp.gt.f32.partialorder %v1560_v9, %v3797_v57  ;;  %vm1587_vm9 = vcmp.gt.f32.partialorder %v1564_v39, %v3771_v11  ;;  %vm1588_vm10 = vcmp.gt.f32.partialorder %v1564_v39, %v3783_v18  ;;  %vm1589_vm11 = vcmp.gt.f32.partialorder %v1568_v20, %v3822_v41 }
 0x3db   :  { %vm1590_vm12 = vcmp.gt.f32.partialorder %v1568_v20, %v3831_v0  ;;  %vm1591_vm13 = vcmp.gt.f32.partialorder %v1572_v25, %v3813_v51  ;;  %vm1592_vm14 = vcmp.gt.f32.partialorder %v1572_v25, %v3818_v40  ;;  %vm1593_vm15 = vcmp.gt.f32.partialorder %v1576_v16, %v3902_v26 }
 0x3dc   :  { %vm1594_vm1 = vcmp.gt.f32.partialorder %v1576_v16, %v3906_v54  ;;  %vm1595_vm2 = vcmp.gt.f32.partialorder %v1580_v8, %v3879_v31  ;;  %vm1596_vm3 = vcmp.gt.f32.partialorder %v1580_v8, %v3886_v12  ;;  %v2953_v58 = vsel %vm1581_vm0, 1.0, %v6119_v17 }
 0x3dd   :  { %v2954_v46 = vsel %vm1582_vm4, 1.0, %v6119_v17  ;;  %v2955_v47 = vsel %vm1583_vm5, 1.0, %v6119_v17  ;;  %v2956_v61 = vsel %vm1584_vm6, 1.0, %v6119_v17  ;;  %v2957_v22 = vsel %vm1585_vm7, 1.0, %v6119_v17 }
 0x3de   :  { %v2958_v44 = vsel %vm1586_vm8, 1.0, %v6119_v17  ;;  %v2959_v36 = vsel %vm1587_vm9, 1.0, %v6119_v17  ;;  %v2960_v32 = vsel %vm1588_vm10, 1.0, %v6119_v17  ;;  %v2961_v52 = vsel %vm1589_vm11, 1.0, %v6119_v17 }
 0x3df   :  { %v2962_v34 = vsel %vm1590_vm12, 1.0, %v6119_v17  ;;  %v2963_v7 = vsel %vm1591_vm13, 1.0, %v6119_v17  ;;  %v2964_v15 = vsel %vm1592_vm14, 1.0, %v6119_v17  ;;  %v2965_v63 = vsel %vm1593_vm15, 1.0, %v6119_v17 }
 0x3e0   :  { %v2966_v19 = vsel %vm1594_vm1, 1.0, %v6119_v17  ;;  %v2967_v10 = vsel %vm1595_vm2, 1.0, %v6119_v17  ;;  %v2968_v38 = vsel %vm1596_vm3, 1.0, %v6119_v17  ;;  %v4548_v14 = vadd.f32 %v2953_v58, %v4014_v48  ;;  %v6160_v48 = vld [vmem:[#allocation38_spill] sm:$0xff] }
 0x3e1   :  { %v4551_v9 = vadd.f32 %v2954_v46, %v4019_v60  ;;  %v4554_v39 = vadd.f32 %v2955_v47, %v4024_v2  ;;  %v4557_v20 = vadd.f32 %v2956_v61, %v4029_v29  ;;  %v4560_v25 = vadd.f32 %v2957_v22, %v4034_v50  ;;  %v6162_v60 = vld [vmem:[#allocation39_spill] sm:$0xff]  ;;  %v6164_v2 = vld [vmem:[#allocation40_spill] sm:$0xff]  ;;  %v6166_v29 = vld [vmem:[#allocation41_spill] sm:$0xff] }
 0x3e2   :  { %v4563_v16 = vadd.f32 %v2958_v44, %v4039_v56  ;;  %v4566_v8 = vadd.f32 %v2959_v36, %v4044_v59  ;;  %v4569_v58 = vadd.f32 %v2960_v32, %v6160_v48  ;;  %v4572_v46 = vadd.f32 %v2961_v52, %v6162_v60  ;;  %v6168_v50 = vld [vmem:[#allocation42_spill] sm:$0xff]  ;;  %v6170_v56 = vld [vmem:[#allocation43_spill] sm:$0xff]  ;;  %v6176_v52 = vld [vmem:[#allocation48_spill] sm:$0xff] }
 0x3e3   :  { %6154 = vst [vmem:[#allocation85_spill] sm:$0xff] %v4551_v9  ;;  %6155 = vst [vmem:[#allocation86_spill] sm:$0xff] %v4554_v39  ;;  %v4575_v47 = vadd.f32 %v2962_v34, %v6164_v2  ;;  %v4578_v61 = vadd.f32 %v2963_v7, %v6166_v29  ;;  %v4581_v22 = vadd.f32 %v2964_v15, %v6168_v50  ;;  %v6172_v59 = vld [vmem:[#allocation46_spill] sm:$0xff]  ;;  %v6174_v32 = vld [vmem:[#allocation47_spill] sm:$0xff] }
 0x3e4   :  { %6156 = vst [vmem:[#allocation87_spill] sm:$0xff] %v4557_v20  ;;  %6157 = vst [vmem:[#allocation88_spill] sm:$0xff] %v4560_v25  ;;  %v4584_v44 = vadd.f32 %v2965_v63, %v6170_v56  ;;  %v4587_v36 = vadd.f32 %v2966_v19, %v6172_v59  ;;  %v4590_v48 = vadd.f32 %v2967_v10, %v6174_v32  ;;  %v6178_v34 = vld [vmem:[#allocation15_spill] sm:$0xff]  ;;  %v6189_v20 = vld [vmem:[#allocation58_spill] sm:$0xff] }
 0x3e5   :  { %6158 = vst [vmem:[#allocation89_spill] sm:$0xff] %v4563_v16  ;;  %6159 = vst [vmem:[#allocation90_spill] sm:$0xff] %v4566_v8  ;;  %v4593_v60 = vadd.f32 %v2968_v38, %v6176_v52  ;;  %v1648_v2 = vrot.slane %v3747_v49, %v6178_v34  ;;  %v1652_v7 = vrot.slane %v3732_v37, %v6178_v34  ;;  %v6185_v8 = vld [vmem:[#allocation54_spill] sm:$0xff]  ;;  %v6187_v16 = vld [vmem:[#allocation55_spill] sm:$0xff] }
 0x3e6   :  { %6161 = vst [vmem:[#allocation38_spill] sm:$0xff] %v4569_v58  ;;  %6163 = vst [vmem:[#allocation39_spill] sm:$0xff] %v4572_v46  ;;  %v1656_v15 = vrot.slane %v3789_v21, %v6178_v34  ;;  %v1660_v63 = vrot.slane %v3771_v11, %v6178_v34  ;;  %v1664_v19 = vrot.slane %v3822_v41, %v6178_v34  ;;  %v6183_v46 = vld [vmem:[#allocation53_spill] sm:$0xff] }
 0x3e7   :  { %6165 = vst [vmem:[#allocation40_spill] sm:$0xff] %v4575_v47  ;;  %6167 = vst [vmem:[#allocation41_spill] sm:$0xff] %v4578_v61  ;;  %v1668_v10 = vrot.slane %v3813_v51, %v6178_v34  ;;  %v1672_v38 = vrot.slane %v3902_v26, %v6178_v34  ;;  %v1676_v29 = vrot.slane %v3879_v31, %v6178_v34 }
 0x3e8   :  { %6169 = vst [vmem:[#allocation42_spill] sm:$0xff] %v4581_v22  ;;  %6171 = vst [vmem:[#allocation43_spill] sm:$0xff] %v4584_v44  ;;  %vm1677_vm0 = vcmp.gt.f32.partialorder %v1648_v2, %v3747_v49  ;;  %vm1678_vm4 = vcmp.gt.f32.partialorder %v1648_v2, %v3756_v45  ;;  %vm1679_vm5 = vcmp.gt.f32.partialorder %v1652_v7, %v3732_v37  ;;  %v6179_v22 = vld [vmem:[#allocation51_spill] sm:$0xff] }
 0x3e9   :  { %6173 = vst [vmem:[#allocation46_spill] sm:$0xff] %v4587_v36  ;;  %6175 = vst [vmem:[#allocation47_spill] sm:$0xff] %v4590_v48  ;;  %vm1680_vm6 = vcmp.gt.f32.partialorder %v1652_v7, %v3743_v43  ;;  %vm1681_vm7 = vcmp.gt.f32.partialorder %v1656_v15, %v3789_v21  ;;  %vm1682_vm8 = vcmp.gt.f32.partialorder %v1656_v15, %v3797_v57  ;;  %v2969_v50 = vsel %vm1677_vm0, 1.0, %v6119_v17 }
 0x3ea   :  { %6177 = vst [vmem:[#allocation48_spill] sm:$0xff] %v4593_v60  ;;  %vm1683_vm9 = vcmp.gt.f32.partialorder %v1660_v63, %v3771_v11  ;;  %vm1684_vm10 = vcmp.gt.f32.partialorder %v1660_v63, %v3783_v18  ;;  %vm1685_vm11 = vcmp.gt.f32.partialorder %v1664_v19, %v3822_v41  ;;  %vm1686_vm12 = vcmp.gt.f32.partialorder %v1664_v19, %v3831_v0 }
 0x3eb   :  { %vm1687_vm13 = vcmp.gt.f32.partialorder %v1668_v10, %v3813_v51  ;;  %vm1688_vm14 = vcmp.gt.f32.partialorder %v1668_v10, %v3818_v40  ;;  %vm1689_vm15 = vcmp.gt.f32.partialorder %v1672_v38, %v3902_v26  ;;  %vm1690_vm1 = vcmp.gt.f32.partialorder %v1672_v38, %v3906_v54  ;;  %v6181_v10 = vld [vmem:[#allocation52_spill] sm:$0xff] }
 0x3ec   :  { %vm1691_vm2 = vcmp.gt.f32.partialorder %v1676_v29, %v3879_v31  ;;  %vm1692_vm3 = vcmp.gt.f32.partialorder %v1676_v29, %v3886_v12  ;;  %v2970_v56 = vsel %vm1678_vm4, 1.0, %v6119_v17  ;;  %v2971_v59 = vsel %vm1679_vm5, 1.0, %v6119_v17  ;;  %v6191_v29 = vld [vmem:[#allocation59_spill] sm:$0xff] }
 0x3ed   :  { %v2972_v32 = vsel %vm1680_vm6, 1.0, %v6119_v17  ;;  %v2973_v52 = vsel %vm1681_vm7, 1.0, %v6119_v17  ;;  %v2974_v34 = vsel %vm1682_vm8, 1.0, %v6119_v17  ;;  %v2975_v2 = vsel %vm1683_vm9, 1.0, %v6119_v17 }
 0x3ee   :  { %v2976_v5 = vsel %vm1684_vm10, 1.0, %v6119_v17  ;;  %v2977_v7 = vsel %vm1685_vm11, 1.0, %v6119_v17  ;;  %v2978_v60 = vsel %vm1686_vm12, 1.0, %v6119_v17  ;;  %v2979_v15 = vsel %vm1687_vm13, 1.0, %v6119_v17 }
 0x3ef   :  { %v2980_v48 = vsel %vm1688_vm14, 1.0, %v6119_v17  ;;  %v2981_v63 = vsel %vm1689_vm15, 1.0, %v6119_v17  ;;  %v2982_v36 = vsel %vm1690_vm1, 1.0, %v6119_v17  ;;  %v2983_v19 = vsel %vm1691_vm2, 1.0, %v6119_v17 }
 0x3f0   :  { %v2984_v44 = vsel %vm1692_vm3, 1.0, %v6119_v17  ;;  %v4676_v61 = vadd.f32 %v2969_v50, %v6179_v22  ;;  %v4679_v47 = vadd.f32 %v2970_v56, %v6181_v10  ;;  %v4682_v58 = vadd.f32 %v2971_v59, %v6183_v46  ;;  %v6193_v22 = vld [vmem:[#allocation60_spill] sm:$0xff]  ;;  %v6195_v56 = vld [vmem:[#allocation61_spill] sm:$0xff]  ;;  %v6197_v46 = vld [vmem:[#allocation62_spill] sm:$0xff] }
 0x3f1   :  { %v4685_v38 = vadd.f32 %v2972_v32, %v6185_v8  ;;  %v4688_v25 = vadd.f32 %v2973_v52, %v6187_v16  ;;  %v4691_v39 = vadd.f32 %v2974_v34, %v6189_v20  ;;  %v4694_v9 = vadd.f32 %v2975_v2, %v6191_v29  ;;  %v6199_v8 = vld [vmem:[#allocation63_spill] sm:$0xff]  ;;  %v6201_v16 = vld [vmem:[#allocation64_spill] sm:$0xff]  ;;  %v6203_v20 = vld [vmem:[#allocation65_spill] sm:$0xff] }
 0x3f2   :  { %6180 = vst [vmem:[#allocation51_spill] sm:$0xff] %v4676_v61  ;;  %6182 = vst [vmem:[#allocation52_spill] sm:$0xff] %v4679_v47  ;;  %v4697_v50 = vadd.f32 %v2976_v5, %v6193_v22  ;;  %v4700_v10 = vadd.f32 %v2977_v7, %v6195_v56  ;;  %v4703_v59 = vadd.f32 %v2978_v60, %v6197_v46  ;;  %v6205_v2 = vld [vmem:[#allocation66_spill] sm:$0xff]  ;;  %v6207_v5 = vld [vmem:[#allocation67_spill] sm:$0xff] }
 0x3f3   :  { %6184 = vst [vmem:[#allocation53_spill] sm:$0xff] %v4682_v58  ;;  %6186 = vst [vmem:[#allocation54_spill] sm:$0xff] %v4685_v38  ;;  %v4706_v32 = vadd.f32 %v2979_v15, %v6199_v8  ;;  %v4709_v52 = vadd.f32 %v2980_v48, %v6201_v16  ;;  %v4712_v34 = vadd.f32 %v2981_v63, %v6203_v20  ;;  %v6209_v7 = vld [vmem:[#allocation68_spill] sm:$0xff]  ;;  %v6217_v58 = vld [vmem:[#allocation74_spill] sm:$0xff] }
 0x3f4   :  { %6188 = vst [vmem:[#allocation55_spill] sm:$0xff] %v4688_v25  ;;  %6190 = vst [vmem:[#allocation58_spill] sm:$0xff] %v4691_v39  ;;  %v4715_v29 = vadd.f32 %v2982_v36, %v6205_v2  ;;  %v4718_v22 = vadd.f32 %v2983_v19, %v6207_v5  ;;  %v4721_v56 = vadd.f32 %v2984_v44, %v6209_v7  ;;  %v6211_v60 = vld [vmem:[#allocation16_spill] sm:$0xff]  ;;  %v6216_v25 = vld [vmem:[#allocation73_spill] sm:$0xff] }
 0x3f5   :  { %6192 = vst [vmem:[#allocation59_spill] sm:$0xff] %v4694_v9  ;;  %6194 = vst [vmem:[#allocation60_spill] sm:$0xff] %v4697_v50  ;;  %v1744_v46 = vrot.slane %v3747_v49, %v6211_v60  ;;  %v1748_v15 = vrot.slane %v3732_v37, %v6211_v60  ;;  %v1752_v48 = vrot.slane %v3789_v21, %v6211_v60  ;;  %v6214_v50 = vld [vmem:[#allocation71_spill] sm:$0xff]  ;;  %v6215_v39 = vld [vmem:[#allocation72_spill] sm:$0xff] }
 0x3f6   :  { %6196 = vst [vmem:[#allocation61_spill] sm:$0xff] %v4700_v10  ;;  %6198 = vst [vmem:[#allocation62_spill] sm:$0xff] %v4703_v59  ;;  %v1756_v63 = vrot.slane %v3771_v11, %v6211_v60  ;;  %v1760_v36 = vrot.slane %v3822_v41, %v6211_v60  ;;  %v1764_v19 = vrot.slane %v3813_v51, %v6211_v60 }
 0x3f7   :  { %6200 = vst [vmem:[#allocation63_spill] sm:$0xff] %v4706_v32  ;;  %6202 = vst [vmem:[#allocation64_spill] sm:$0xff] %v4709_v52  ;;  %v1768_v44 = vrot.slane %v3902_v26, %v6211_v60  ;;  %v1772_v8 = vrot.slane %v3879_v31, %v6211_v60  ;;  %vm1773_vm0 = vcmp.gt.f32.partialorder %v1744_v46, %v3747_v49  ;;  %v6212_v32 = vld [vmem:[#allocation69_spill] sm:$0xff] }
 0x3f8   :  { %6204 = vst [vmem:[#allocation65_spill] sm:$0xff] %v4712_v34  ;;  %6206 = vst [vmem:[#allocation66_spill] sm:$0xff] %v4715_v29  ;;  %vm1774_vm4 = vcmp.gt.f32.partialorder %v1744_v46, %v3756_v45  ;;  %vm1775_vm5 = vcmp.gt.f32.partialorder %v1748_v15, %v3732_v37  ;;  %vm1776_vm6 = vcmp.gt.f32.partialorder %v1748_v15, %v3743_v43  ;;  %v2985_v16 = vsel %vm1773_vm0, 1.0, %v6119_v17 }
 0x3f9   :  { %6208 = vst [vmem:[#allocation67_spill] sm:$0xff] %v4718_v22  ;;  %6210 = vst [vmem:[#allocation68_spill] sm:$0xff] %v4721_v56  ;;  %vm1777_vm7 = vcmp.gt.f32.partialorder %v1752_v48, %v3789_v21  ;;  %vm1778_vm8 = vcmp.gt.f32.partialorder %v1752_v48, %v3797_v57  ;;  %vm1779_vm9 = vcmp.gt.f32.partialorder %v1756_v63, %v3771_v11  ;;  %v2986_v20 = vsel %vm1774_vm4, 1.0, %v6119_v17 }
 0x3fa   :  { %vm1780_vm10 = vcmp.gt.f32.partialorder %v1756_v63, %v3783_v18  ;;  %vm1781_vm11 = vcmp.gt.f32.partialorder %v1760_v36, %v3822_v41  ;;  %vm1782_vm12 = vcmp.gt.f32.partialorder %v1760_v36, %v3831_v0  ;;  %vm1783_vm13 = vcmp.gt.f32.partialorder %v1764_v19, %v3813_v51 }
 0x3fb   :  { %vm1784_vm14 = vcmp.gt.f32.partialorder %v1764_v19, %v3818_v40  ;;  %vm1785_vm15 = vcmp.gt.f32.partialorder %v1768_v44, %v3902_v26  ;;  %vm1786_vm1 = vcmp.gt.f32.partialorder %v1768_v44, %v3906_v54  ;;  %vm1787_vm2 = vcmp.gt.f32.partialorder %v1772_v8, %v3879_v31  ;;  %v6213_v19 = vld [vmem:[#allocation70_spill] sm:$0xff] }
 0x3fc   :  { %vm1788_vm3 = vcmp.gt.f32.partialorder %v1772_v8, %v3886_v12  ;;  %v2987_v2 = vsel %vm1775_vm5, 1.0, %v6119_v17  ;;  %v2988_v5 = vsel %vm1776_vm6, 1.0, %v6119_v17  ;;  %v2989_v7 = vsel %vm1777_vm7, 1.0, %v6119_v17  ;;  %v6218_v8 = vld [vmem:[#allocation75_spill] sm:$0xff] }
 0x3fd   :  { %v2990_v60 = vsel %vm1778_vm8, 1.0, %v6119_v17  ;;  %v2991_v46 = vsel %vm1779_vm9, 1.0, %v6119_v17  ;;  %v2992_v56 = vsel %vm1780_vm10, 1.0, %v6119_v17  ;;  %v2993_v15 = vsel %vm1781_vm11, 1.0, %v6119_v17 }
 0x3fe   :  { %v2994_v22 = vsel %vm1782_vm12, 1.0, %v6119_v17  ;;  %v2995_v48 = vsel %vm1783_vm13, 1.0, %v6119_v17  ;;  %v2996_v29 = vsel %vm1784_vm14, 1.0, %v6119_v17  ;;  %v2997_v63 = vsel %vm1785_vm15, 1.0, %v6119_v17 }
 0x3ff   :  { %v2998_v34 = vsel %vm1786_vm1, 1.0, %v6119_v17  ;;  %v2999_v36 = vsel %vm1787_vm2, 1.0, %v6119_v17  ;;  %v3000_v52 = vsel %vm1788_vm3, 1.0, %v6119_v17  ;;  %v4804_v59 = vadd.f32 %v2985_v16, %v6212_v32  ;;  %v6219_v32 = vld [vmem:[#allocation76_spill] sm:$0xff] }
 0x400   :  { %v4807_v10 = vadd.f32 %v2986_v20, %v6213_v19  ;;  %v4810_v9 = vadd.f32 %v2987_v2, %v6214_v50  ;;  %v4813_v44 = vadd.f32 %v2988_v5, %v6215_v39  ;;  %v4816_v38 = vadd.f32 %v2989_v7, %v6216_v25  ;;  %v6221_v20 = vld [vmem:[#allocation77_spill] sm:$0xff]  ;;  %v6223_v50 = vld [vmem:[#allocation78_spill] sm:$0xff]  ;;  %v6225_v39 = vld [vmem:[#allocation79_spill] sm:$0xff] }
 0x401   :  { %v4819_v47 = vadd.f32 %v2990_v60, %v6217_v58  ;;  %v4822_v61 = vadd.f32 %v2991_v46, %v6218_v8  ;;  %v4825_v16 = vadd.f32 %v2992_v56, %v6219_v32  ;;  %v4828_v19 = vadd.f32 %v2993_v15, %v6221_v20  ;;  %v6227_v25 = vld [vmem:[#allocation80_spill] sm:$0xff]  ;;  %v6229_v58 = vld [vmem:[#allocation81_spill] sm:$0xff]  ;;  %v6231_v46 = vld [vmem:[#allocation82_spill] sm:$0xff] }
 0x402   :  { %v4831_v2 = vadd.f32 %v2994_v22, %v6223_v50  ;;  %v4834_v5 = vadd.f32 %v2995_v48, %v6225_v39  ;;  %v4837_v7 = vadd.f32 %v2996_v29, %v6227_v25  ;;  %v4840_v60 = vadd.f32 %v2997_v63, %v6229_v58  ;;  %v6233_v56 = vld [vmem:[#allocation83_spill] sm:$0xff]  ;;  %v6235_v15 = vld [vmem:[#allocation84_spill] sm:$0xff]  ;;  %v6237_v22 = vld [vmem:[#allocation5_spill] sm:$0xff] }
 0x403   :  { %6220 = vst [vmem:[#allocation69_spill] sm:$0xff] %v4825_v16  ;;  %6222 = vst [vmem:[#allocation70_spill] sm:$0xff] %v4828_v19  ;;  %v4843_v8 = vadd.f32 %v2998_v34, %v6231_v46  ;;  %v4846_v32 = vadd.f32 %v2999_v36, %v6233_v56  ;;  %v4849_v20 = vadd.f32 %v3000_v52, %v6235_v15 }
 0x404   :  { %6224 = vst [vmem:[#allocation71_spill] sm:$0xff] %v4831_v2  ;;  %6226 = vst [vmem:[#allocation72_spill] sm:$0xff] %v4834_v5  ;;  %v1840_v50 = vrot.slane %v3756_v45, %v6237_v22  ;;  %v1844_v48 = vrot.slane %v3743_v43, %v6237_v22  ;;  %v1848_v29 = vrot.slane %v3797_v57, %v6237_v22 }
 0x405   :  { %6228 = vst [vmem:[#allocation73_spill] sm:$0xff] %v4837_v7  ;;  %6230 = vst [vmem:[#allocation74_spill] sm:$0xff] %v4840_v60  ;;  %v1852_v63 = vrot.slane %v3783_v18, %v6237_v22  ;;  %v1856_v34 = vrot.slane %v3831_v0, %v6237_v22  ;;  %v1860_v36 = vrot.slane %v3818_v40, %v6237_v22 }
 0x406   :  { %6232 = vst [vmem:[#allocation75_spill] sm:$0xff] %v4843_v8  ;;  %6234 = vst [vmem:[#allocation76_spill] sm:$0xff] %v4846_v32  ;;  %v1864_v52 = vrot.slane %v3906_v54, %v6237_v22  ;;  %v1868_v39 = vrot.slane %v3886_v12, %v6237_v22  ;;  %vm1869_vm0 = vcmp.gt.f32.partialorder %v1840_v50, %v3747_v49 }
 0x407   :  { %6236 = vst [vmem:[#allocation77_spill] sm:$0xff] %v4849_v20  ;;  %vm1870_vm4 = vcmp.gt.f32.partialorder %v1840_v50, %v3756_v45  ;;  %vm1871_vm5 = vcmp.gt.f32.partialorder %v1844_v48, %v3732_v37  ;;  %vm1872_vm6 = vcmp.gt.f32.partialorder %v1844_v48, %v3743_v43  ;;  %vm1873_vm7 = vcmp.gt.f32.partialorder %v1848_v29, %v3789_v21 }
 0x408   :  { %vm1874_vm8 = vcmp.gt.f32.partialorder %v1848_v29, %v3797_v57  ;;  %vm1875_vm9 = vcmp.gt.f32.partialorder %v1852_v63, %v3771_v11  ;;  %vm1876_vm10 = vcmp.gt.f32.partialorder %v1852_v63, %v3783_v18  ;;  %vm1877_vm11 = vcmp.gt.f32.partialorder %v1856_v34, %v3822_v41 }
 0x409   :  { %vm1878_vm12 = vcmp.gt.f32.partialorder %v1856_v34, %v3831_v0  ;;  %vm1879_vm13 = vcmp.gt.f32.partialorder %v1860_v36, %v3813_v51  ;;  %vm1880_vm14 = vcmp.gt.f32.partialorder %v1860_v36, %v3818_v40  ;;  %vm1881_vm15 = vcmp.gt.f32.partialorder %v1864_v52, %v3902_v26 }
 0x40a   :  { %vm1882_vm1 = vcmp.gt.f32.partialorder %v1864_v52, %v3906_v54  ;;  %vm1883_vm2 = vcmp.gt.f32.partialorder %v1868_v39, %v3879_v31  ;;  %vm1884_vm3 = vcmp.gt.f32.partialorder %v1868_v39, %v3886_v12  ;;  %v3001_v25 = vsel %vm1869_vm0, 1.0, %v6119_v17 }
 0x40b   :  { %v3002_v58 = vsel %vm1870_vm4, 1.0, %v6119_v17  ;;  %v3003_v46 = vsel %vm1871_vm5, 1.0, %v6119_v17  ;;  %v3004_v56 = vsel %vm1872_vm6, 1.0, %v6119_v17  ;;  %v3005_v15 = vsel %vm1873_vm7, 1.0, %v6119_v17 }
 0x40c   :  { %v3006_v22 = vsel %vm1874_vm8, 1.0, %v6119_v17  ;;  %v3007_v50 = vsel %vm1875_vm9, 1.0, %v6119_v17  ;;  %v3008_v20 = vsel %vm1876_vm10, 1.0, %v6119_v17  ;;  %v3009_v48 = vsel %vm1877_vm11, 1.0, %v6119_v17 }
 0x40d   :  { %v3010_v32 = vsel %vm1878_vm12, 1.0, %v6119_v17  ;;  %v3011_v29 = vsel %vm1879_vm13, 1.0, %v6119_v17  ;;  %v3012_v8 = vsel %vm1880_vm14, 1.0, %v6119_v17  ;;  %v3013_v63 = vsel %vm1881_vm15, 1.0, %v6119_v17 }
 0x40e   :  { %v3014_v60 = vsel %vm1882_vm1, 1.0, %v6119_v17  ;;  %v3015_v34 = vsel %vm1883_vm2, 1.0, %v6119_v17  ;;  %v3016_v7 = vsel %vm1884_vm3, 1.0, %v6119_v17  ;;  %v4932_v5 = vadd.f32 %v3001_v25, %v4420_v6 }
 0x40f   :  { %v4935_v36 = vadd.f32 %v3002_v58, %v4423_v1  ;;  %v4938_v2 = vadd.f32 %v3003_v46, %v4426_v28  ;;  %v4941_v52 = vadd.f32 %v3004_v56, %v4429_v33  ;;  %v4944_v19 = vadd.f32 %v3005_v15, %v4432_v55 }
 0x410   :  { %v4947_v16 = vadd.f32 %v3006_v22, %v4435_v3  ;;  %v4950_v39 = vadd.f32 %v3007_v50, %v4438_v35  ;;  %v4953_v6 = vadd.f32 %v3008_v20, %v4441_v42  ;;  %v4956_v1 = vadd.f32 %v3009_v48, %v4444_v13 }
 0x411   :  { %v4959_v28 = vadd.f32 %v3010_v32, %v4447_v23  ;;  %v4962_v33 = vadd.f32 %v3011_v29, %v4450_v27  ;;  %v4965_v55 = vadd.f32 %v3012_v8, %v4453_v4  ;;  %v4968_v3 = vadd.f32 %v3013_v63, %v4456_v24  ;;  %v6244_v23 = vld [vmem:[#allocation7_spill] sm:$0xff] }
 0x412   :  { %v4971_v35 = vadd.f32 %v3014_v60, %v4459_v62  ;;  %v4974_v42 = vadd.f32 %v3015_v34, %v4462_v53  ;;  %v4977_v13 = vadd.f32 %v3016_v7, %v4465_v30  ;;  %v1936_v32 = vrot.slane %v3756_v45, %v6244_v23 }
 0x413   :  { %6238 = vst [vmem:[#allocation78_spill] sm:$0xff] %v4962_v33  ;;  %6239 = vst [vmem:[#allocation79_spill] sm:$0xff] %v4965_v55  ;;  %v1940_v27 = vrot.slane %v3743_v43, %v6244_v23  ;;  %v1944_v4 = vrot.slane %v3797_v57, %v6244_v23  ;;  %v1948_v24 = vrot.slane %v3783_v18, %v6244_v23 }
 0x414   :  { %6240 = vst [vmem:[#allocation80_spill] sm:$0xff] %v4968_v3  ;;  %6241 = vst [vmem:[#allocation81_spill] sm:$0xff] %v4971_v35  ;;  %v1952_v62 = vrot.slane %v3831_v0, %v6244_v23  ;;  %v1956_v53 = vrot.slane %v3818_v40, %v6244_v23  ;;  %v1960_v30 = vrot.slane %v3906_v54, %v6244_v23  ;;  %v6254_v3 = vld [vmem:[#allocation89_spill] sm:$0xff] }
 0x415   :  { %6242 = vst [vmem:[#allocation82_spill] sm:$0xff] %v4974_v42  ;;  %6243 = vst [vmem:[#allocation83_spill] sm:$0xff] %v4977_v13  ;;  %v1964_v7 = vrot.slane %v3886_v12, %v6244_v23  ;;  %vm1965_vm0 = vcmp.gt.f32.partialorder %v1936_v32, %v3747_v49  ;;  %vm1966_vm4 = vcmp.gt.f32.partialorder %v1936_v32, %v3756_v45  ;;  %v6250_v13 = vld [vmem:[#allocation87_spill] sm:$0xff]  ;;  %v6252_v42 = vld [vmem:[#allocation88_spill] sm:$0xff] }
 0x416   :  { %vm1967_vm5 = vcmp.gt.f32.partialorder %v1940_v27, %v3732_v37  ;;  %vm1968_vm6 = vcmp.gt.f32.partialorder %v1940_v27, %v3743_v43  ;;  %vm1969_vm7 = vcmp.gt.f32.partialorder %v1944_v4, %v3789_v21  ;;  %vm1970_vm8 = vcmp.gt.f32.partialorder %v1944_v4, %v3797_v57  ;;  %v6246_v4 = vld [vmem:[#allocation85_spill] sm:$0xff] }
 0x417   :  { %vm1971_vm9 = vcmp.gt.f32.partialorder %v1948_v24, %v3771_v11  ;;  %vm1972_vm10 = vcmp.gt.f32.partialorder %v1948_v24, %v3783_v18  ;;  %vm1973_vm11 = vcmp.gt.f32.partialorder %v1952_v62, %v3822_v41  ;;  %vm1974_vm12 = vcmp.gt.f32.partialorder %v1952_v62, %v3831_v0  ;;  %v6248_v62 = vld [vmem:[#allocation86_spill] sm:$0xff] }
 0x418   :  { %vm1975_vm13 = vcmp.gt.f32.partialorder %v1956_v53, %v3813_v51  ;;  %vm1976_vm14 = vcmp.gt.f32.partialorder %v1956_v53, %v3818_v40  ;;  %vm1977_vm15 = vcmp.gt.f32.partialorder %v1960_v30, %v3902_v26  ;;  %vm1978_vm1 = vcmp.gt.f32.partialorder %v1960_v30, %v3906_v54 }
 0x419   :  { %vm1979_vm2 = vcmp.gt.f32.partialorder %v1964_v7, %v3879_v31  ;;  %vm1980_vm3 = vcmp.gt.f32.partialorder %v1964_v7, %v3886_v12  ;;  %v3017_v60 = vsel %vm1965_vm0, 1.0, %v6119_v17  ;;  %v3018_v8 = vsel %vm1966_vm4, 1.0, %v6119_v17  ;;  %v6256_v7 = vld [vmem:[#allocation90_spill] sm:$0xff] }
 0x41a   :  { %v3019_v20 = vsel %vm1967_vm5, 1.0, %v6119_v17  ;;  %v3020_v25 = vsel %vm1968_vm6, 1.0, %v6119_v17  ;;  %v3021_v58 = vsel %vm1969_vm7, 1.0, %v6119_v17  ;;  %v3022_v46 = vsel %vm1970_vm8, 1.0, %v6119_v17 }
 0x41b   :  { %v3023_v56 = vsel %vm1971_vm9, 1.0, %v6119_v17  ;;  %v3024_v15 = vsel %vm1972_vm10, 1.0, %v6119_v17  ;;  %v3025_v22 = vsel %vm1973_vm11, 1.0, %v6119_v17  ;;  %v3026_v50 = vsel %vm1974_vm12, 1.0, %v6119_v17 }
 0x41c   :  { %v3027_v48 = vsel %vm1975_vm13, 1.0, %v6119_v17  ;;  %v3028_v29 = vsel %vm1976_vm14, 1.0, %v6119_v17  ;;  %v3029_v63 = vsel %vm1977_vm15, 1.0, %v6119_v17  ;;  %v3030_v34 = vsel %vm1978_vm1, 1.0, %v6119_v17 }
 0x41d   :  { %v3031_v23 = vsel %vm1979_vm2, 1.0, %v6119_v17  ;;  %v3032_v32 = vsel %vm1980_vm3, 1.0, %v6119_v17  ;;  %v5060_v27 = vadd.f32 %v3017_v60, %v4548_v14  ;;  %v5063_v24 = vadd.f32 %v3018_v8, %v6246_v4  ;;  %v6258_v14 = vld [vmem:[#allocation38_spill] sm:$0xff]  ;;  %v6260_v8 = vld [vmem:[#allocation39_spill] sm:$0xff] }
 0x41e   :  { %v5066_v53 = vadd.f32 %v3019_v20, %v6248_v62  ;;  %v5069_v30 = vadd.f32 %v3020_v25, %v6250_v13  ;;  %v5072_v35 = vadd.f32 %v3021_v58, %v6252_v42  ;;  %v5075_v55 = vadd.f32 %v3022_v46, %v6254_v3  ;;  %v6262_v20 = vld [vmem:[#allocation40_spill] sm:$0xff]  ;;  %v6264_v13 = vld [vmem:[#allocation41_spill] sm:$0xff]  ;;  %v6266_v42 = vld [vmem:[#allocation42_spill] sm:$0xff] }
 0x41f   :  { %6245 = vst [vmem:[#allocation84_spill] sm:$0xff] %v5060_v27  ;;  %6247 = vst [vmem:[#allocation5_spill] sm:$0xff] %v5063_v24  ;;  %v5078_v33 = vadd.f32 %v3023_v56, %v6256_v7  ;;  %v5081_v60 = vadd.f32 %v3024_v15, %v6258_v14  ;;  %v5084_v4 = vadd.f32 %v3025_v22, %v6260_v8  ;;  %v6268_v3 = vld [vmem:[#allocation43_spill] sm:$0xff]  ;;  %v6270_v56 = vld [vmem:[#allocation46_spill] sm:$0xff] }
 0x420   :  { %6249 = vst [vmem:[#allocation7_spill] sm:$0xff] %v5066_v53  ;;  %6251 = vst [vmem:[#allocation85_spill] sm:$0xff] %v5069_v30  ;;  %v5087_v62 = vadd.f32 %v3026_v50, %v6262_v20  ;;  %v5090_v25 = vadd.f32 %v3027_v48, %v6264_v13  ;;  %v5093_v58 = vadd.f32 %v3028_v29, %v6266_v42  ;;  %v6272_v15 = vld [vmem:[#allocation47_spill] sm:$0xff]  ;;  %v6274_v22 = vld [vmem:[#allocation48_spill] sm:$0xff] }
 0x421   :  { %6253 = vst [vmem:[#allocation86_spill] sm:$0xff] %v5072_v35  ;;  %6255 = vst [vmem:[#allocation87_spill] sm:$0xff] %v5075_v55  ;;  %v5096_v46 = vadd.f32 %v3029_v63, %v6268_v3  ;;  %v5099_v7 = vadd.f32 %v3030_v34, %v6270_v56  ;;  %v5102_v14 = vadd.f32 %v3031_v23, %v6272_v15  ;;  %v6276_v50 = vld [vmem:[#allocation8_spill] sm:$0xff]  ;;  %v6280_v55 = vld [vmem:[#allocation54_spill] sm:$0xff] }
 0x422   :  { %6257 = vst [vmem:[#allocation88_spill] sm:$0xff] %v5078_v33  ;;  %6259 = vst [vmem:[#allocation89_spill] sm:$0xff] %v5081_v60  ;;  %v5105_v8 = vadd.f32 %v3032_v32, %v6274_v22  ;;  %v2032_v20 = vrot.slane %v3756_v45, %v6276_v50  ;;  %v2036_v48 = vrot.slane %v3743_v43, %v6276_v50  ;;  %v6279_v60 = vld [vmem:[#allocation53_spill] sm:$0xff]  ;;  %v6281_v35 = vld [vmem:[#allocation55_spill] sm:$0xff] }
 0x423   :  { %6261 = vst [vmem:[#allocation90_spill] sm:$0xff] %v5084_v4  ;;  %6263 = vst [vmem:[#allocation38_spill] sm:$0xff] %v5087_v62  ;;  %v2040_v29 = vrot.slane %v3797_v57, %v6276_v50  ;;  %v2044_v63 = vrot.slane %v3783_v18, %v6276_v50  ;;  %v2048_v34 = vrot.slane %v3831_v0, %v6276_v50  ;;  %v6282_v53 = vld [vmem:[#allocation58_spill] sm:$0xff] }
 0x424   :  { %6265 = vst [vmem:[#allocation39_spill] sm:$0xff] %v5090_v25  ;;  %6267 = vst [vmem:[#allocation40_spill] sm:$0xff] %v5093_v58  ;;  %v2052_v23 = vrot.slane %v3818_v40, %v6276_v50  ;;  %v2056_v32 = vrot.slane %v3906_v54, %v6276_v50  ;;  %v2060_v13 = vrot.slane %v3886_v12, %v6276_v50  ;;  %v6277_v25 = vld [vmem:[#allocation51_spill] sm:$0xff] }
 0x425   :  { %6269 = vst [vmem:[#allocation41_spill] sm:$0xff] %v5096_v46  ;;  %6271 = vst [vmem:[#allocation42_spill] sm:$0xff] %v5099_v7  ;;  %vm2061_vm0 = vcmp.gt.f32.partialorder %v2032_v20, %v3747_v49  ;;  %vm2062_vm4 = vcmp.gt.f32.partialorder %v2032_v20, %v3756_v45  ;;  %vm2063_vm5 = vcmp.gt.f32.partialorder %v2036_v48, %v3732_v37 }
 0x426   :  { %6273 = vst [vmem:[#allocation43_spill] sm:$0xff] %v5102_v14  ;;  %6275 = vst [vmem:[#allocation46_spill] sm:$0xff] %v5105_v8  ;;  %vm2064_vm6 = vcmp.gt.f32.partialorder %v2036_v48, %v3743_v43  ;;  %vm2065_vm7 = vcmp.gt.f32.partialorder %v2040_v29, %v3789_v21  ;;  %vm2066_vm8 = vcmp.gt.f32.partialorder %v2040_v29, %v3797_v57  ;;  %v3033_v42 = vsel %vm2061_vm0, 1.0, %v6119_v17 }
 0x427   :  { %vm2067_vm9 = vcmp.gt.f32.partialorder %v2044_v63, %v3771_v11  ;;  %vm2068_vm10 = vcmp.gt.f32.partialorder %v2044_v63, %v3783_v18  ;;  %vm2069_vm11 = vcmp.gt.f32.partialorder %v2048_v34, %v3822_v41  ;;  %vm2070_vm12 = vcmp.gt.f32.partialorder %v2048_v34, %v3831_v0 }
 0x428   :  { %vm2071_vm13 = vcmp.gt.f32.partialorder %v2052_v23, %v3813_v51  ;;  %vm2072_vm14 = vcmp.gt.f32.partialorder %v2052_v23, %v3818_v40  ;;  %vm2073_vm15 = vcmp.gt.f32.partialorder %v2056_v32, %v3902_v26  ;;  %vm2074_vm1 = vcmp.gt.f32.partialorder %v2056_v32, %v3906_v54  ;;  %v6278_v23 = vld [vmem:[#allocation52_spill] sm:$0xff] }
 0x429   :  { %vm2075_vm2 = vcmp.gt.f32.partialorder %v2060_v13, %v3879_v31  ;;  %vm2076_vm3 = vcmp.gt.f32.partialorder %v2060_v13, %v3886_v12  ;;  %v3034_v3 = vsel %vm2062_vm4, 1.0, %v6119_v17  ;;  %v3035_v56 = vsel %vm2063_vm5, 1.0, %v6119_v17  ;;  %v6283_v13 = vld [vmem:[#allocation59_spill] sm:$0xff] }
 0x42a   :  { %v3036_v15 = vsel %vm2064_vm6, 1.0, %v6119_v17  ;;  %v3037_v22 = vsel %vm2065_vm7, 1.0, %v6119_v17  ;;  %v3038_v50 = vsel %vm2066_vm8, 1.0, %v6119_v17  ;;  %v3039_v20 = vsel %vm2067_vm9, 1.0, %v6119_v17 }
 0x42b   :  { %v3040_v8 = vsel %vm2068_vm10, 1.0, %v6119_v17  ;;  %v3041_v48 = vsel %vm2069_vm11, 1.0, %v6119_v17  ;;  %v3042_v14 = vsel %vm2070_vm12, 1.0, %v6119_v17  ;;  %v3043_v29 = vsel %vm2071_vm13, 1.0, %v6119_v17 }
 0x42c   :  { %v3044_v7 = vsel %vm2072_vm14, 1.0, %v6119_v17  ;;  %v3045_v63 = vsel %vm2073_vm15, 1.0, %v6119_v17  ;;  %v3046_v46 = vsel %vm2074_vm1, 1.0, %v6119_v17  ;;  %v3047_v34 = vsel %vm2075_vm2, 1.0, %v6119_v17 }
 0x42d   :  { %v3048_v58 = vsel %vm2076_vm3, 1.0, %v6119_v17  ;;  %v5188_v62 = vadd.f32 %v3033_v42, %v6277_v25  ;;  %v5191_v4 = vadd.f32 %v3034_v3, %v6278_v23  ;;  %v5194_v33 = vadd.f32 %v3035_v56, %v6279_v60  ;;  %v6284_v25 = vld [vmem:[#allocation60_spill] sm:$0xff]  ;;  %v6286_v3 = vld [vmem:[#allocation61_spill] sm:$0xff]  ;;  %v6288_v60 = vld [vmem:[#allocation62_spill] sm:$0xff] }
 0x42e   :  { %v5197_v32 = vadd.f32 %v3036_v15, %v6280_v55  ;;  %v5200_v30 = vadd.f32 %v3037_v22, %v6281_v35  ;;  %v5203_v24 = vadd.f32 %v3038_v50, %v6282_v53  ;;  %v5206_v27 = vadd.f32 %v3039_v20, %v6283_v13  ;;  %v6290_v55 = vld [vmem:[#allocation63_spill] sm:$0xff]  ;;  %v6292_v35 = vld [vmem:[#allocation64_spill] sm:$0xff]  ;;  %v6294_v53 = vld [vmem:[#allocation65_spill] sm:$0xff] }
 0x42f   :  { %v5209_v42 = vadd.f32 %v3040_v8, %v6284_v25  ;;  %v5212_v23 = vadd.f32 %v3041_v48, %v6286_v3  ;;  %v5215_v56 = vadd.f32 %v3042_v14, %v6288_v60  ;;  %v5218_v15 = vadd.f32 %v3043_v29, %v6290_v55  ;;  %v6296_v20 = vld [vmem:[#allocation66_spill] sm:$0xff]  ;;  %v6298_v8 = vld [vmem:[#allocation67_spill] sm:$0xff]  ;;  %v6300_v48 = vld [vmem:[#allocation68_spill] sm:$0xff] }
 0x430   :  { %v5221_v22 = vadd.f32 %v3044_v7, %v6292_v35  ;;  %v5224_v50 = vadd.f32 %v3045_v63, %v6294_v53  ;;  %v5227_v13 = vadd.f32 %v3046_v46, %v6296_v20  ;;  %v5230_v25 = vadd.f32 %v3047_v34, %v6298_v8  ;;  %v6302_v14 = vld [vmem:[#allocation9_spill] sm:$0xff] }
 0x431   :  { %6285 = vst [vmem:[#allocation47_spill] sm:$0xff] %v5209_v42  ;;  %6287 = vst [vmem:[#allocation48_spill] sm:$0xff] %v5212_v23  ;;  %v5233_v3 = vadd.f32 %v3048_v58, %v6300_v48  ;;  %v2128_v60 = vrot.slane %v3756_v45, %v6302_v14  ;;  %v2132_v29 = vrot.slane %v3743_v43, %v6302_v14 }
 0x432   :  { %6289 = vst [vmem:[#allocation8_spill] sm:$0xff] %v5215_v56  ;;  %6291 = vst [vmem:[#allocation51_spill] sm:$0xff] %v5218_v15  ;;  %v2136_v7 = vrot.slane %v3797_v57, %v6302_v14  ;;  %v2140_v63 = vrot.slane %v3783_v18, %v6302_v14  ;;  %v2144_v46 = vrot.slane %v3831_v0, %v6302_v14 }
 0x433   :  { %6293 = vst [vmem:[#allocation52_spill] sm:$0xff] %v5221_v22  ;;  %6295 = vst [vmem:[#allocation53_spill] sm:$0xff] %v5224_v50  ;;  %v2148_v34 = vrot.slane %v3818_v40, %v6302_v14  ;;  %v2152_v58 = vrot.slane %v3906_v54, %v6302_v14  ;;  %v2156_v55 = vrot.slane %v3886_v12, %v6302_v14 }
 0x434   :  { %6297 = vst [vmem:[#allocation54_spill] sm:$0xff] %v5227_v13  ;;  %6299 = vst [vmem:[#allocation55_spill] sm:$0xff] %v5230_v25  ;;  %vm2157_vm0 = vcmp.gt.f32.partialorder %v2128_v60, %v3747_v49  ;;  %vm2158_vm4 = vcmp.gt.f32.partialorder %v2128_v60, %v3756_v45  ;;  %vm2159_vm5 = vcmp.gt.f32.partialorder %v2132_v29, %v3732_v37 }
 0x435   :  { %6301 = vst [vmem:[#allocation58_spill] sm:$0xff] %v5233_v3  ;;  %vm2160_vm6 = vcmp.gt.f32.partialorder %v2132_v29, %v3743_v43  ;;  %vm2161_vm7 = vcmp.gt.f32.partialorder %v2136_v7, %v3789_v21  ;;  %vm2162_vm8 = vcmp.gt.f32.partialorder %v2136_v7, %v3797_v57  ;;  %vm2163_vm9 = vcmp.gt.f32.partialorder %v2140_v63, %v3771_v11 }
 0x436   :  { %vm2164_vm10 = vcmp.gt.f32.partialorder %v2140_v63, %v3783_v18  ;;  %vm2165_vm11 = vcmp.gt.f32.partialorder %v2144_v46, %v3822_v41  ;;  %vm2166_vm12 = vcmp.gt.f32.partialorder %v2144_v46, %v3831_v0  ;;  %vm2167_vm13 = vcmp.gt.f32.partialorder %v2148_v34, %v3813_v51 }
 0x437   :  { %vm2168_vm14 = vcmp.gt.f32.partialorder %v2148_v34, %v3818_v40  ;;  %vm2169_vm15 = vcmp.gt.f32.partialorder %v2152_v58, %v3902_v26  ;;  %vm2170_vm1 = vcmp.gt.f32.partialorder %v2152_v58, %v3906_v54  ;;  %vm2171_vm2 = vcmp.gt.f32.partialorder %v2156_v55, %v3879_v31 }
 0x438   :  { %vm2172_vm3 = vcmp.gt.f32.partialorder %v2156_v55, %v3886_v12  ;;  %v3049_v35 = vsel %vm2157_vm0, 1.0, %v6119_v17  ;;  %v3050_v53 = vsel %vm2158_vm4, 1.0, %v6119_v17  ;;  %v3051_v20 = vsel %vm2159_vm5, 1.0, %v6119_v17 }
 0x439   :  { %v3052_v8 = vsel %vm2160_vm6, 1.0, %v6119_v17  ;;  %v3053_v48 = vsel %vm2161_vm7, 1.0, %v6119_v17  ;;  %v3054_v14 = vsel %vm2162_vm8, 1.0, %v6119_v17  ;;  %v3055_v60 = vsel %vm2163_vm9, 1.0, %v6119_v17 }
 0x43a   :  { %v3056_v3 = vsel %vm2164_vm10, 1.0, %v6119_v17  ;;  %v3057_v29 = vsel %vm2165_vm11, 1.0, %v6119_v17  ;;  %v3058_v25 = vsel %vm2166_vm12, 1.0, %v6119_v17  ;;  %v3059_v7 = vsel %vm2167_vm13, 1.0, %v6119_v17 }
 0x43b   :  { %v3060_v13 = vsel %vm2168_vm14, 1.0, %v6119_v17  ;;  %v3061_v63 = vsel %vm2169_vm15, 1.0, %v6119_v17  ;;  %v3062_v50 = vsel %vm2170_vm1, 1.0, %v6119_v17  ;;  %v3063_v46 = vsel %vm2171_vm2, 1.0, %v6119_v17 }
 0x43c   :  { %v3064_v22 = vsel %vm2172_vm3, 1.0, %v6119_v17  ;;  %v5316_v15 = vadd.f32 %v3049_v35, %v4804_v59  ;;  %v5319_v34 = vadd.f32 %v3050_v53, %v4807_v10  ;;  %v5322_v56 = vadd.f32 %v3051_v20, %v4810_v9  ;;  %v6303_v59 = vld [vmem:[#allocation69_spill] sm:$0xff]  ;;  %v6305_v10 = vld [vmem:[#allocation70_spill] sm:$0xff]  ;;  %v6307_v9 = vld [vmem:[#allocation71_spill] sm:$0xff] }
 0x43d   :  { %v5325_v58 = vadd.f32 %v3052_v8, %v4813_v44  ;;  %v5328_v23 = vadd.f32 %v3053_v48, %v4816_v38  ;;  %v5331_v42 = vadd.f32 %v3054_v14, %v4819_v47  ;;  %v5334_v55 = vadd.f32 %v3055_v60, %v4822_v61  ;;  %v6309_v44 = vld [vmem:[#allocation72_spill] sm:$0xff]  ;;  %v6311_v38 = vld [vmem:[#allocation73_spill] sm:$0xff]  ;;  %v6313_v47 = vld [vmem:[#allocation74_spill] sm:$0xff] }
 0x43e   :  { %v5337_v35 = vadd.f32 %v3056_v3, %v6303_v59  ;;  %v5340_v53 = vadd.f32 %v3057_v29, %v6305_v10  ;;  %v5343_v20 = vadd.f32 %v3058_v25, %v6307_v9  ;;  %v5346_v8 = vadd.f32 %v3059_v7, %v6309_v44  ;;  %v6315_v61 = vld [vmem:[#allocation75_spill] sm:$0xff]  ;;  %v6317_v3 = vld [vmem:[#allocation76_spill] sm:$0xff]  ;;  %v6319_v29 = vld [vmem:[#allocation77_spill] sm:$0xff] }
 0x43f   :  { %v5349_v48 = vadd.f32 %v3060_v13, %v6311_v38  ;;  %v5352_v14 = vadd.f32 %v3061_v63, %v6313_v47  ;;  %v5355_v60 = vadd.f32 %v3062_v50, %v6315_v61  ;;  %v5358_v59 = vadd.f32 %v3063_v46, %v6317_v3  ;;  %v6321_v25 = vld [vmem:[#allocation11_spill] sm:$0xff] }
 0x440   :  { %6304 = vst [vmem:[#allocation59_spill] sm:$0xff] %v5337_v35  ;;  %6306 = vst [vmem:[#allocation60_spill] sm:$0xff] %v5340_v53  ;;  %v5361_v10 = vadd.f32 %v3064_v22, %v6319_v29  ;;  %v2224_v9 = vrot.slane %v3756_v45, %v6321_v25  ;;  %v2228_v7 = vrot.slane %v3743_v43, %v6321_v25 }
 0x441   :  { %6308 = vst [vmem:[#allocation61_spill] sm:$0xff] %v5343_v20  ;;  %6310 = vst [vmem:[#allocation62_spill] sm:$0xff] %v5346_v8  ;;  %v2232_v13 = vrot.slane %v3797_v57, %v6321_v25  ;;  %v2236_v63 = vrot.slane %v3783_v18, %v6321_v25  ;;  %v2240_v50 = vrot.slane %v3831_v0, %v6321_v25 }
 0x442   :  { %6312 = vst [vmem:[#allocation63_spill] sm:$0xff] %v5349_v48  ;;  %6314 = vst [vmem:[#allocation64_spill] sm:$0xff] %v5352_v14  ;;  %v2244_v46 = vrot.slane %v3818_v40, %v6321_v25  ;;  %v2248_v22 = vrot.slane %v3906_v54, %v6321_v25  ;;  %v2252_v44 = vrot.slane %v3886_v12, %v6321_v25 }
 0x443   :  { %6316 = vst [vmem:[#allocation65_spill] sm:$0xff] %v5355_v60  ;;  %6318 = vst [vmem:[#allocation66_spill] sm:$0xff] %v5358_v59  ;;  %vm2253_vm0 = vcmp.gt.f32.partialorder %v2224_v9, %v3747_v49  ;;  %vm2254_vm4 = vcmp.gt.f32.partialorder %v2224_v9, %v3756_v45  ;;  %vm2255_vm5 = vcmp.gt.f32.partialorder %v2228_v7, %v3732_v37 }
 0x444   :  { %6320 = vst [vmem:[#allocation67_spill] sm:$0xff] %v5361_v10  ;;  %vm2256_vm6 = vcmp.gt.f32.partialorder %v2228_v7, %v3743_v43  ;;  %vm2257_vm7 = vcmp.gt.f32.partialorder %v2232_v13, %v3789_v21  ;;  %vm2258_vm8 = vcmp.gt.f32.partialorder %v2232_v13, %v3797_v57  ;;  %vm2259_vm9 = vcmp.gt.f32.partialorder %v2236_v63, %v3771_v11 }
 0x445   :  { %vm2260_vm10 = vcmp.gt.f32.partialorder %v2236_v63, %v3783_v18  ;;  %vm2261_vm11 = vcmp.gt.f32.partialorder %v2240_v50, %v3822_v41  ;;  %vm2262_vm12 = vcmp.gt.f32.partialorder %v2240_v50, %v3831_v0  ;;  %vm2263_vm13 = vcmp.gt.f32.partialorder %v2244_v46, %v3813_v51 }
 0x446   :  { %vm2264_vm14 = vcmp.gt.f32.partialorder %v2244_v46, %v3818_v40  ;;  %vm2265_vm15 = vcmp.gt.f32.partialorder %v2248_v22, %v3902_v26  ;;  %vm2266_vm1 = vcmp.gt.f32.partialorder %v2248_v22, %v3906_v54  ;;  %vm2267_vm2 = vcmp.gt.f32.partialorder %v2252_v44, %v3879_v31 }
 0x447   :  { %vm2268_vm3 = vcmp.gt.f32.partialorder %v2252_v44, %v3886_v12  ;;  %v3065_v38 = vsel %vm2253_vm0, 1.0, %v6119_v17  ;;  %v3066_v47 = vsel %vm2254_vm4, 1.0, %v6119_v17  ;;  %v3067_v61 = vsel %vm2255_vm5, 1.0, %v6119_v17 }
 0x448   :  { %v3068_v3 = vsel %vm2256_vm6, 1.0, %v6119_v17  ;;  %v3069_v29 = vsel %vm2257_vm7, 1.0, %v6119_v17  ;;  %v3070_v25 = vsel %vm2258_vm8, 1.0, %v6119_v17  ;;  %v3071_v9 = vsel %vm2259_vm9, 1.0, %v6119_v17 }
 0x449   :  { %v3072_v10 = vsel %vm2260_vm10, 1.0, %v6119_v17  ;;  %v3073_v7 = vsel %vm2261_vm11, 1.0, %v6119_v17  ;;  %v3074_v59 = vsel %vm2262_vm12, 1.0, %v6119_v17  ;;  %v3075_v13 = vsel %vm2263_vm13, 1.0, %v6119_v17 }
 0x44a   :  { %v3076_v60 = vsel %vm2264_vm14, 1.0, %v6119_v17  ;;  %v3077_v63 = vsel %vm2265_vm15, 1.0, %v6119_v17  ;;  %v3078_v14 = vsel %vm2266_vm1, 1.0, %v6119_v17  ;;  %v3079_v50 = vsel %vm2267_vm2, 1.0, %v6119_v17 }
 0x44b   :  { %v3080_v48 = vsel %vm2268_vm3, 1.0, %v6119_v17  ;;  %v5444_v8 = vadd.f32 %v3065_v38, %v4932_v5  ;;  %v5447_v46 = vadd.f32 %v3066_v47, %v4935_v36  ;;  %v5450_v20 = vadd.f32 %v3067_v61, %v4938_v2 }
 0x44c   :  { %v5453_v22 = vadd.f32 %v3068_v3, %v4941_v52  ;;  %v5456_v53 = vadd.f32 %v3069_v29, %v4944_v19  ;;  %v5459_v35 = vadd.f32 %v3070_v25, %v4947_v16  ;;  %v5462_v44 = vadd.f32 %v3071_v9, %v4950_v39  ;;  %v6329_v52 = vld [vmem:[#allocation78_spill] sm:$0xff]  ;;  %v6331_v19 = vld [vmem:[#allocation79_spill] sm:$0xff]  ;;  %v6333_v16 = vld [vmem:[#allocation80_spill] sm:$0xff] }
 0x44d   :  { %v5465_v5 = vadd.f32 %v3072_v10, %v4953_v6  ;;  %v5468_v36 = vadd.f32 %v3073_v7, %v4956_v1  ;;  %v5471_v2 = vadd.f32 %v3074_v59, %v4959_v28  ;;  %v5474_v38 = vadd.f32 %v3075_v13, %v6329_v52  ;;  %v6335_v39 = vld [vmem:[#allocation81_spill] sm:$0xff]  ;;  %v6337_v6 = vld [vmem:[#allocation82_spill] sm:$0xff]  ;;  %v6339_v1 = vld [vmem:[#allocation83_spill] sm:$0xff] }
 0x44e   :  { %6322 = vst [vmem:[#allocation68_spill] sm:$0xff] %v5453_v22  ;;  %6323 = vst [vmem:[#allocation9_spill] sm:$0xff] %v5456_v53  ;;  %v5477_v47 = vadd.f32 %v3076_v60, %v6331_v19  ;;  %v5480_v61 = vadd.f32 %v3077_v63, %v6333_v16  ;;  %v5483_v3 = vadd.f32 %v3078_v14, %v6335_v39  ;;  %v6341_v28 = vld [vmem:[#allocation13_spill] sm:$0xff] }
 0x44f   :  { %6324 = vst [vmem:[#allocation69_spill] sm:$0xff] %v5459_v35  ;;  %6325 = vst [vmem:[#allocation70_spill] sm:$0xff] %v5462_v44  ;;  %v5486_v10 = vadd.f32 %v3079_v50, %v6337_v6  ;;  %v5489_v29 = vadd.f32 %v3080_v48, %v6339_v1  ;;  %v2320_v59 = vrot.slane %v3756_v45, %v6341_v28  ;;  %v6347_v35 = vld [vmem:[#allocation87_spill] sm:$0xff] }
 0x450   :  { %6326 = vst [vmem:[#allocation71_spill] sm:$0xff] %v5465_v5  ;;  %6327 = vst [vmem:[#allocation72_spill] sm:$0xff] %v5468_v36  ;;  %v2324_v25 = vrot.slane %v3743_v43, %v6341_v28  ;;  %v2328_v60 = vrot.slane %v3797_v57, %v6341_v28  ;;  %v2332_v9 = vrot.slane %v3783_v18, %v6341_v28  ;;  %v6345_v36 = vld [vmem:[#allocation85_spill] sm:$0xff]  ;;  %v6346_v5 = vld [vmem:[#allocation86_spill] sm:$0xff] }
 0x451   :  { %6328 = vst [vmem:[#allocation73_spill] sm:$0xff] %v5471_v2  ;;  %6330 = vst [vmem:[#allocation74_spill] sm:$0xff] %v5474_v38  ;;  %v2336_v14 = vrot.slane %v3831_v0, %v6341_v28  ;;  %v2340_v7 = vrot.slane %v3818_v40, %v6341_v28  ;;  %v2344_v48 = vrot.slane %v3906_v54, %v6341_v28  ;;  %v6344_v38 = vld [vmem:[#allocation7_spill] sm:$0xff] }
 0x452   :  { %6332 = vst [vmem:[#allocation75_spill] sm:$0xff] %v5477_v47  ;;  %6334 = vst [vmem:[#allocation76_spill] sm:$0xff] %v5480_v61  ;;  %v2348_v13 = vrot.slane %v3886_v12, %v6341_v28  ;;  %vm2349_vm0 = vcmp.gt.f32.partialorder %v2320_v59, %v3747_v49  ;;  %vm2350_vm4 = vcmp.gt.f32.partialorder %v2320_v59, %v3756_v45 }
 0x453   :  { %6336 = vst [vmem:[#allocation77_spill] sm:$0xff] %v5483_v3  ;;  %6338 = vst [vmem:[#allocation11_spill] sm:$0xff] %v5486_v10  ;;  %vm2351_vm5 = vcmp.gt.f32.partialorder %v2324_v25, %v3732_v37  ;;  %vm2352_vm6 = vcmp.gt.f32.partialorder %v2324_v25, %v3743_v43  ;;  %vm2353_vm7 = vcmp.gt.f32.partialorder %v2328_v60, %v3789_v21  ;;  %v3081_v63 = vsel %vm2349_vm0, 1.0, %v6119_v17  ;;  %v6342_v3 = vld [vmem:[#allocation84_spill] sm:$0xff] }
 0x454   :  { %6340 = vst [vmem:[#allocation78_spill] sm:$0xff] %v5489_v29  ;;  %vm2354_vm8 = vcmp.gt.f32.partialorder %v2328_v60, %v3797_v57  ;;  %vm2355_vm9 = vcmp.gt.f32.partialorder %v2332_v9, %v3771_v11  ;;  %vm2356_vm10 = vcmp.gt.f32.partialorder %v2332_v9, %v3783_v18  ;;  %vm2357_vm11 = vcmp.gt.f32.partialorder %v2336_v14, %v3822_v41 }
 0x455   :  { %vm2358_vm12 = vcmp.gt.f32.partialorder %v2336_v14, %v3831_v0  ;;  %vm2359_vm13 = vcmp.gt.f32.partialorder %v2340_v7, %v3813_v51  ;;  %vm2360_vm14 = vcmp.gt.f32.partialorder %v2340_v7, %v3818_v40  ;;  %vm2361_vm15 = vcmp.gt.f32.partialorder %v2344_v48, %v3902_v26  ;;  %v6343_v7 = vld [vmem:[#allocation5_spill] sm:$0xff] }
 0x456   :  { %vm2362_vm1 = vcmp.gt.f32.partialorder %v2344_v48, %v3906_v54  ;;  %vm2363_vm2 = vcmp.gt.f32.partialorder %v2348_v13, %v3879_v31  ;;  %vm2364_vm3 = vcmp.gt.f32.partialorder %v2348_v13, %v3886_v12  ;;  %v3082_v50 = vsel %vm2350_vm4, 1.0, %v6119_v17  ;;  %v6348_v13 = vld [vmem:[#allocation88_spill] sm:$0xff] }
 0x457   :  { %v3083_v52 = vsel %vm2351_vm5, 1.0, %v6119_v17  ;;  %v3084_v19 = vsel %vm2352_vm6, 1.0, %v6119_v17  ;;  %v3085_v16 = vsel %vm2353_vm7, 1.0, %v6119_v17  ;;  %v3086_v39 = vsel %vm2354_vm8, 1.0, %v6119_v17 }
 0x458   :  { %v3087_v6 = vsel %vm2355_vm9, 1.0, %v6119_v17  ;;  %v3088_v1 = vsel %vm2356_vm10, 1.0, %v6119_v17  ;;  %v3089_v28 = vsel %vm2357_vm11, 1.0, %v6119_v17  ;;  %v3090_v59 = vsel %vm2358_vm12, 1.0, %v6119_v17 }
 0x459   :  { %v3091_v25 = vsel %vm2359_vm13, 1.0, %v6119_v17  ;;  %v3092_v60 = vsel %vm2360_vm14, 1.0, %v6119_v17  ;;  %v3093_v9 = vsel %vm2361_vm15, 1.0, %v6119_v17  ;;  %v3094_v29 = vsel %vm2362_vm1, 1.0, %v6119_v17 }
 0x45a   :  { %v3095_v14 = vsel %vm2363_vm2, 1.0, %v6119_v17  ;;  %v3096_v10 = vsel %vm2364_vm3, 1.0, %v6119_v17  ;;  %v5572_v61 = vadd.f32 %v3081_v63, %v6342_v3  ;;  %v5575_v47 = vadd.f32 %v3082_v50, %v6343_v7  ;;  %v6349_v3 = vld [vmem:[#allocation89_spill] sm:$0xff]  ;;  %v6351_v50 = vld [vmem:[#allocation90_spill] sm:$0xff] }
 0x45b   :  { %v5578_v2 = vadd.f32 %v3083_v52, %v6344_v38  ;;  %v5581_v48 = vadd.f32 %v3084_v19, %v6345_v36  ;;  %v5584_v44 = vadd.f32 %v3085_v16, %v6346_v5  ;;  %v5587_v53 = vadd.f32 %v3086_v39, %v6347_v35  ;;  %v6353_v38 = vld [vmem:[#allocation38_spill] sm:$0xff]  ;;  %v6355_v36 = vld [vmem:[#allocation39_spill] sm:$0xff]  ;;  %v6357_v5 = vld [vmem:[#allocation40_spill] sm:$0xff] }
 0x45c   :  { %v5590_v22 = vadd.f32 %v3087_v6, %v6348_v13  ;;  %v5593_v63 = vadd.f32 %v3088_v1, %v6349_v3  ;;  %v5596_v7 = vadd.f32 %v3089_v28, %v6351_v50  ;;  %v5599_v52 = vadd.f32 %v3090_v59, %v6353_v38  ;;  %v6359_v35 = vld [vmem:[#allocation41_spill] sm:$0xff]  ;;  %v6361_v6 = vld [vmem:[#allocation42_spill] sm:$0xff]  ;;  %v6363_v1 = vld [vmem:[#allocation43_spill] sm:$0xff] }
 0x45d   :  { %v5602_v19 = vadd.f32 %v3091_v25, %v6355_v36  ;;  %v5605_v16 = vadd.f32 %v3092_v60, %v6357_v5  ;;  %v5608_v39 = vadd.f32 %v3093_v9, %v6359_v35  ;;  %v5611_v13 = vadd.f32 %v3094_v29, %v6361_v6  ;;  %v6365_v28 = vld [vmem:[#allocation46_spill] sm:$0xff]  ;;  %v6367_v59 = vld [vmem:[#allocation15_spill] sm:$0xff] }
 0x45e   :  { %6350 = vst [vmem:[#allocation79_spill] sm:$0xff] %v5593_v63  ;;  %6352 = vst [vmem:[#allocation80_spill] sm:$0xff] %v5596_v7  ;;  %v5614_v3 = vadd.f32 %v3095_v14, %v6363_v1  ;;  %v5617_v50 = vadd.f32 %v3096_v10, %v6365_v28  ;;  %v2416_v38 = vrot.slane %v3756_v45, %v6367_v59 }
 0x45f   :  { %6354 = vst [vmem:[#allocation81_spill] sm:$0xff] %v5599_v52  ;;  %6356 = vst [vmem:[#allocation82_spill] sm:$0xff] %v5602_v19  ;;  %v2420_v25 = vrot.slane %v3743_v43, %v6367_v59  ;;  %v2424_v60 = vrot.slane %v3797_v57, %v6367_v59  ;;  %v2428_v9 = vrot.slane %v3783_v18, %v6367_v59 }
 0x460   :  { %6358 = vst [vmem:[#allocation83_spill] sm:$0xff] %v5605_v16  ;;  %6360 = vst [vmem:[#allocation13_spill] sm:$0xff] %v5608_v39  ;;  %v2432_v29 = vrot.slane %v3831_v0, %v6367_v59  ;;  %v2436_v14 = vrot.slane %v3818_v40, %v6367_v59  ;;  %v2440_v10 = vrot.slane %v3906_v54, %v6367_v59 }
 0x461   :  { %6362 = vst [vmem:[#allocation84_spill] sm:$0xff] %v5611_v13  ;;  %6364 = vst [vmem:[#allocation5_spill] sm:$0xff] %v5614_v3  ;;  %v2444_v36 = vrot.slane %v3886_v12, %v6367_v59  ;;  %vm2445_vm0 = vcmp.gt.f32.partialorder %v2416_v38, %v3747_v49  ;;  %vm2446_vm4 = vcmp.gt.f32.partialorder %v2416_v38, %v3756_v45 }
 0x462   :  { %6366 = vst [vmem:[#allocation7_spill] sm:$0xff] %v5617_v50  ;;  %vm2447_vm5 = vcmp.gt.f32.partialorder %v2420_v25, %v3732_v37  ;;  %vm2448_vm6 = vcmp.gt.f32.partialorder %v2420_v25, %v3743_v43  ;;  %vm2449_vm7 = vcmp.gt.f32.partialorder %v2424_v60, %v3789_v21  ;;  %vm2450_vm8 = vcmp.gt.f32.partialorder %v2424_v60, %v3797_v57 }
 0x463   :  { %vm2451_vm9 = vcmp.gt.f32.partialorder %v2428_v9, %v3771_v11  ;;  %vm2452_vm10 = vcmp.gt.f32.partialorder %v2428_v9, %v3783_v18  ;;  %vm2453_vm11 = vcmp.gt.f32.partialorder %v2432_v29, %v3822_v41  ;;  %vm2454_vm12 = vcmp.gt.f32.partialorder %v2432_v29, %v3831_v0 }
 0x464   :  { %vm2455_vm13 = vcmp.gt.f32.partialorder %v2436_v14, %v3813_v51  ;;  %vm2456_vm14 = vcmp.gt.f32.partialorder %v2436_v14, %v3818_v40  ;;  %vm2457_vm15 = vcmp.gt.f32.partialorder %v2440_v10, %v3902_v26  ;;  %vm2458_vm1 = vcmp.gt.f32.partialorder %v2440_v10, %v3906_v54 }
 0x465   :  { %vm2459_vm2 = vcmp.gt.f32.partialorder %v2444_v36, %v3879_v31  ;;  %vm2460_vm3 = vcmp.gt.f32.partialorder %v2444_v36, %v3886_v12  ;;  %v3097_v5 = vsel %vm2445_vm0, 1.0, %v6119_v17  ;;  %v3098_v35 = vsel %vm2446_vm4, 1.0, %v6119_v17 }
 0x466   :  { %v3099_v6 = vsel %vm2447_vm5, 1.0, %v6119_v17  ;;  %v3100_v1 = vsel %vm2448_vm6, 1.0, %v6119_v17  ;;  %v3101_v28 = vsel %vm2449_vm7, 1.0, %v6119_v17  ;;  %v3102_v59 = vsel %vm2450_vm8, 1.0, %v6119_v17 }
 0x467   :  { %v3103_v38 = vsel %vm2451_vm9, 1.0, %v6119_v17  ;;  %v3104_v50 = vsel %vm2452_vm10, 1.0, %v6119_v17  ;;  %v3105_v25 = vsel %vm2453_vm11, 1.0, %v6119_v17  ;;  %v3106_v3 = vsel %vm2454_vm12, 1.0, %v6119_v17 }
 0x468   :  { %v3107_v60 = vsel %vm2455_vm13, 1.0, %v6119_v17  ;;  %v3108_v13 = vsel %vm2456_vm14, 1.0, %v6119_v17  ;;  %v3109_v9 = vsel %vm2457_vm15, 1.0, %v6119_v17  ;;  %v3110_v39 = vsel %vm2458_vm1, 1.0, %v6119_v17 }
 0x469   :  { %v3111_v29 = vsel %vm2459_vm2, 1.0, %v6119_v17  ;;  %v3112_v16 = vsel %vm2460_vm3, 1.0, %v6119_v17  ;;  %v5700_v19 = vadd.f32 %v3097_v5, %v5188_v62  ;;  %v5703_v14 = vadd.f32 %v3098_v35, %v5191_v4  ;;  %v6368_v62 = vld [vmem:[#allocation47_spill] sm:$0xff]  ;;  %v6369_v4 = vld [vmem:[#allocation48_spill] sm:$0xff] }
 0x46a   :  { %v5706_v52 = vadd.f32 %v3099_v6, %v5194_v33  ;;  %v5709_v10 = vadd.f32 %v3100_v1, %v5197_v32  ;;  %v5712_v7 = vadd.f32 %v3101_v28, %v5200_v30  ;;  %v5715_v63 = vadd.f32 %v3102_v59, %v5203_v24  ;;  %v6370_v33 = vld [vmem:[#allocation8_spill] sm:$0xff]  ;;  %v6371_v32 = vld [vmem:[#allocation51_spill] sm:$0xff]  ;;  %v6373_v24 = vld [vmem:[#allocation53_spill] sm:$0xff] }
 0x46b   :  { %v5718_v36 = vadd.f32 %v3103_v38, %v5206_v27  ;;  %v5721_v5 = vadd.f32 %v3104_v50, %v6368_v62  ;;  %v5724_v35 = vadd.f32 %v3105_v25, %v6369_v4  ;;  %v5727_v6 = vadd.f32 %v3106_v3, %v6370_v33  ;;  %v6372_v30 = vld [vmem:[#allocation52_spill] sm:$0xff]  ;;  %v6374_v27 = vld [vmem:[#allocation54_spill] sm:$0xff]  ;;  %v6375_v50 = vld [vmem:[#allocation55_spill] sm:$0xff] }
 0x46c   :  { %v5730_v1 = vadd.f32 %v3107_v60, %v6371_v32  ;;  %v5733_v28 = vadd.f32 %v3108_v13, %v6372_v30  ;;  %v5736_v59 = vadd.f32 %v3109_v9, %v6373_v24  ;;  %v5739_v38 = vadd.f32 %v3110_v39, %v6374_v27  ;;  %v6376_v25 = vld [vmem:[#allocation58_spill] sm:$0xff]  ;;  %v6377_v3 = vld [vmem:[#allocation16_spill] sm:$0xff] }
 0x46d   :  { %v5742_v62 = vadd.f32 %v3111_v29, %v6375_v50  ;;  %v5745_v4 = vadd.f32 %v3112_v16, %v6376_v25  ;;  %v2512_v33 = vrot.slane %v3756_v45, %v6377_v3  ;;  %v2516_v60 = vrot.slane %v3743_v43, %v6377_v3 }
 0x46e   :  { %v2520_v13 = vrot.slane %v3797_v57, %v6377_v3  ;;  %v2524_v9 = vrot.slane %v3783_v18, %v6377_v3  ;;  %v2528_v39 = vrot.slane %v3831_v0, %v6377_v3  ;;  %v2532_v29 = vrot.slane %v3818_v40, %v6377_v3 }
 0x46f   :  { %v2536_v16 = vrot.slane %v3906_v54, %v6377_v3  ;;  %v2540_v32 = vrot.slane %v3886_v12, %v6377_v3  ;;  %vm2541_vm0 = vcmp.gt.f32.partialorder %v2512_v33, %v3747_v49  ;;  %vm2542_vm4 = vcmp.gt.f32.partialorder %v2512_v33, %v3756_v45 }
 0x470   :  { %vm2543_vm5 = vcmp.gt.f32.partialorder %v2516_v60, %v3732_v37  ;;  %vm2544_vm6 = vcmp.gt.f32.partialorder %v2516_v60, %v3743_v43  ;;  %vm2545_vm7 = vcmp.gt.f32.partialorder %v2520_v13, %v3789_v21  ;;  %vm2546_vm8 = vcmp.gt.f32.partialorder %v2520_v13, %v3797_v57  ;;  %v6379_v43 = vld [vmem:[#allocation60_spill] sm:$0xff] }
 0x471   :  { %vm2547_vm9 = vcmp.gt.f32.partialorder %v2524_v9, %v3771_v11  ;;  %vm2548_vm10 = vcmp.gt.f32.partialorder %v2524_v9, %v3783_v18  ;;  %vm2549_vm11 = vcmp.gt.f32.partialorder %v2528_v39, %v3822_v41  ;;  %vm2550_vm12 = vcmp.gt.f32.partialorder %v2528_v39, %v3831_v0 }
 0x472   :  { %vm2551_vm13 = vcmp.gt.f32.partialorder %v2532_v29, %v3813_v51  ;;  %vm2552_vm14 = vcmp.gt.f32.partialorder %v2532_v29, %v3818_v40  ;;  %vm2553_vm15 = vcmp.gt.f32.partialorder %v2536_v16, %v3902_v26  ;;  %vm2554_vm1 = vcmp.gt.f32.partialorder %v2536_v16, %v3906_v54 }
 0x473   :  { %vm2555_vm2 = vcmp.gt.f32.partialorder %v2540_v32, %v3879_v31  ;;  %vm2556_vm3 = vcmp.gt.f32.partialorder %v2540_v32, %v3886_v12  ;;  %v3113_v30 = vsel %vm2541_vm0, 1.0, %v6119_v17  ;;  %v3114_v24 = vsel %vm2542_vm4, 1.0, %v6119_v17  ;;  %v6378_v31 = vld [vmem:[#allocation59_spill] sm:$0xff]  ;;  %v6380_v32 = vld [vmem:[#allocation61_spill] sm:$0xff]  ;;  %v6381_v12 = vld [vmem:[#allocation62_spill] sm:$0xff] }
 0x474   :  { %v3115_v27 = vsel %vm2543_vm5, 1.0, %v6119_v17  ;;  %v3116_v50 = vsel %vm2544_vm6, 1.0, %v6119_v17  ;;  %v3117_v25 = vsel %vm2545_vm7, 1.0, %v6119_v17  ;;  %v3118_v3 = vsel %vm2546_vm8, 1.0, %v6119_v17 }
 0x475   :  { %v3119_v33 = vsel %vm2547_vm9, 1.0, %v6119_v17  ;;  %v3120_v37 = vsel %vm2548_vm10, 1.0, %v6119_v17  ;;  %v3121_v60 = vsel %vm2549_vm11, 1.0, %v6119_v17  ;;  %v3122_v21 = vsel %vm2550_vm12, 1.0, %v6119_v17 }
 0x476   :  { %v3123_v13 = vsel %vm2551_vm13, 1.0, %v6119_v17  ;;  %v3124_v11 = vsel %vm2552_vm14, 1.0, %v6119_v17  ;;  %v3125_v9 = vsel %vm2553_vm15, 1.0, %v6119_v17  ;;  %v3126_v41 = vsel %vm2554_vm1, 1.0, %v6119_v17 }
 0x477   :  { %v3127_v39 = vsel %vm2555_vm2, 1.0, %v6119_v17  ;;  %v3128_v51 = vsel %vm2556_vm3, 1.0, %v6119_v17  ;;  %v2589_v0 = vadd.f32 %v3113_v30, %v5316_v15  ;;  %v2590_v29 = vadd.f32 %v3114_v24, %v5319_v34  ;;  %v6382_v30 = vld [vmem:[#allocation63_spill] sm:$0xff]  ;;  %v6383_v24 = vld [vmem:[#allocation64_spill] sm:$0xff] }
 0x478   :  { %v2591_v40 = vadd.f32 %v3115_v27, %v5322_v56  ;;  %v2592_v26 = vadd.f32 %v3116_v50, %v5325_v58  ;;  %v2593_v18 = vadd.f32 %v3117_v25, %v5328_v23  ;;  %v2594_v16 = vadd.f32 %v3118_v3, %v5331_v42  ;;  %v6384_v27 = vld [vmem:[#allocation65_spill] sm:$0xff]  ;;  %v6385_v50 = vld [vmem:[#allocation66_spill] sm:$0xff]  ;;  %v6386_v25 = vld [vmem:[#allocation67_spill] sm:$0xff] }
 0x479   :  { %v2595_v54 = vadd.f32 %v3119_v33, %v5334_v55  ;;  %v2596_v57 = vadd.f32 %v3120_v37, %v6378_v31  ;;  %v2597_v45 = vadd.f32 %v3121_v60, %v6379_v43  ;;  %v2598_v17 = vadd.f32 %v3122_v21, %v6380_v32  ;;  %v6387_v21 = vld [vmem:[#allocation68_spill] sm:$0xff]  ;;  %v6388_v31 = vld [vmem:[#allocation9_spill] sm:$0xff]  ;;  %v6390_v33 = vld [vmem:[#allocation70_spill] sm:$0xff] }
 0x47a   :  { %v2599_v15 = vadd.f32 %v3123_v13, %v6381_v12  ;;  %v2600_v34 = vadd.f32 %v3124_v11, %v6382_v30  ;;  %v2601_v56 = vadd.f32 %v3125_v9, %v6383_v24  ;;  %v2602_v58 = vadd.f32 %v3126_v41, %v6384_v27  ;;  %v6389_v41 = vld [vmem:[#allocation69_spill] sm:$0xff]  ;;  %v6391_v60 = vld [vmem:[#allocation71_spill] sm:$0xff]  ;;  %v6393_v13 = vld [vmem:[#allocation72_spill] sm:$0xff] }
 0x47b   :  { %v2603_v23 = vadd.f32 %v3127_v39, %v6385_v50  ;;  %v2604_v42 = vadd.f32 %v3128_v51, %v6386_v25  ;;  %v2605_v55 = vadd.f32 %v5572_v61, %v5444_v8  ;;  %v2606_v37 = vadd.f32 %v5575_v47, %v5447_v46  ;;  %v6392_v8 = vld [vmem:[#allocation79_spill] sm:$0xff]  ;;  %v6394_v46 = vld [vmem:[#allocation80_spill] sm:$0xff]  ;;  %v6395_v9 = vld [vmem:[#allocation73_spill] sm:$0xff] }
 0x47c   :  { %v2607_v43 = vadd.f32 %v5578_v2, %v5450_v20  ;;  %v2608_v11 = vadd.f32 %v5581_v48, %v6387_v21  ;;  %v2609_v12 = vadd.f32 %v5584_v44, %v6388_v31  ;;  %v2610_v3 = vadd.f32 %v5587_v53, %v6389_v41  ;;  %v6396_v20 = vld [vmem:[#allocation81_spill] sm:$0xff]  ;;  %v6397_v39 = vld [vmem:[#allocation74_spill] sm:$0xff]  ;;  %v6399_v30 = vld [vmem:[#allocation75_spill] sm:$0xff] }
 0x47d   :  { %v2611_v51 = vadd.f32 %v5590_v22, %v6390_v33  ;;  %v2612_v61 = vadd.f32 %v6392_v8, %v6391_v60  ;;  %v2613_v47 = vadd.f32 %v6394_v46, %v6393_v13  ;;  %v2614_v2 = vadd.f32 %v6396_v20, %v6395_v9  ;;  %v6398_v48 = vld [vmem:[#allocation82_spill] sm:$0xff]  ;;  %v6400_v44 = vld [vmem:[#allocation83_spill] sm:$0xff]  ;;  %v6401_v27 = vld [vmem:[#allocation76_spill] sm:$0xff] }
 0x47e   :  { %v2615_v32 = vadd.f32 %v6398_v48, %v6397_v39  ;;  %v2616_v24 = vadd.f32 %v6400_v44, %v6399_v30  ;;  %v6402_v53 = vld [vmem:[#allocation13_spill] sm:$0xff]  ;;  %v6404_v22 = vld [vmem:[#allocation84_spill] sm:$0xff]  ;;  %v6405_v31 = vld [vmem:[#allocation11_spill] sm:$0xff]  ;;  %v2621_v46 = vadd.f32 %v2589_v0, %v5700_v19  ;;  %v2622_v9 = vadd.f32 %v2590_v29, %v5703_v14 }
 0x47f   :  { %v2617_v50 = vadd.f32 %v6402_v53, %v6401_v27  ;;  %v6403_v25 = vld [vmem:[#allocation77_spill] sm:$0xff]  ;;  %v6407_v60 = vld [vmem:[#allocation78_spill] sm:$0xff]  ;;  %v6408_v8 = vld [vmem:[#allocation7_spill] sm:$0xff]  ;;  %v2623_v20 = vadd.f32 %v2591_v40, %v5706_v52  ;;  %v2624_v39 = vadd.f32 %v2592_v26, %v5709_v10  ;;  %v2625_v48 = vadd.f32 %v2593_v18, %v5712_v7 }
 0x480   :  { %v2618_v21 = vadd.f32 %v6404_v22, %v6403_v25  ;;  %v6406_v41 = vld [vmem:[#allocation5_spill] sm:$0xff]  ;;  %v2620_v13 = vadd.f32 %v6408_v8, %v6407_v60  ;;  %v2626_v30 = vadd.f32 %v2594_v16, %v5715_v63  ;;  %v2627_v44 = vadd.f32 %v2595_v54, %v5718_v36  ;;  %v6420_v22 = vld [vmem:[#allocation26_spill] sm:$0xff] }
 0x481   :  { %v2619_v33 = vadd.f32 %v6406_v41, %v6405_v31  ;;  %v2628_v27 = vadd.f32 %v2596_v57, %v5721_v5  ;;  %v2629_v53 = vadd.f32 %v2597_v45, %v5724_v35  ;;  %v2630_v25 = vadd.f32 %v2598_v17, %v5727_v6  ;;  %v6410_v17 = vld [vmem:[#allocation6_spill] sm:$0xff]  ;;  %v6421_v31 = vld [vmem:[#allocation27_spill] sm:$0xff]  ;;  %v6423_v8 = vld [vmem:[#allocation25_spill] sm:$0xff] }
 0x482   :  { %v2631_v0 = vadd.f32 %v2599_v15, %v5730_v1  ;;  %v2632_v19 = vadd.f32 %v2600_v34, %v5733_v28  ;;  %v2633_v40 = vadd.f32 %v2601_v56, %v5736_v59  ;;  %v2634_v26 = vadd.f32 %v2602_v58, %v5739_v38  ;;  %v6411_v34 = vld [vmem:[#allocation10_spill] sm:$0xff] }
 0x483   :  { %v2635_v18 = vadd.f32 %v2603_v23, %v5742_v62  ;;  %v2636_v63 = vadd.f32 %v2604_v42, %v5745_v4  ;;  %v2637_v7 = vadd.f32 %v2621_v46, %v2605_v55  ;;  %v2638_v54 = vadd.f32 %v2622_v9, %v2606_v37  ;;  %v6409_v4 = vld [vmem:[#allocation12_spill] sm:$0xff]  ;;  %v6412_v58 = vld [vmem:[#allocation18_spill] sm:$0xff]  ;;  %v6413_v42 = vld [vmem:[#allocation19_spill] sm:$0xff] }
 0x484   :  { %v2639_v52 = vadd.f32 %v2623_v20, %v2607_v43  ;;  %v2640_v57 = vadd.f32 %v2624_v39, %v2608_v11  ;;  %v2641_v14 = vadd.f32 %v2625_v48, %v2609_v12  ;;  %v2642_v45 = vadd.f32 %v2626_v30, %v2610_v3  ;;  %v6414_v37 = vld [vmem:[#allocation14_spill] sm:$0xff]  ;;  %v6415_v11 = vld [vmem:[#allocation17_spill] sm:$0xff] }
 0x485   :  { %v2643_v10 = vadd.f32 %v2627_v44, %v2611_v51  ;;  %v2644_v36 = vadd.f32 %v2628_v27, %v2612_v61  ;;  %v2645_v5 = vadd.f32 %v2629_v53, %v2613_v47  ;;  %v2646_v35 = vadd.f32 %v2630_v25, %v2614_v2  ;;  %v6416_v3 = vld [vmem:[#allocation22_spill] sm:$0xff]  ;;  %v6417_v61 = vld [vmem:[#allocation23_spill] sm:$0xff]  ;;  %v6418_v2 = vld [vmem:[#allocation20_spill] sm:$0xff] }
 0x486   :  { %v2647_v6 = vadd.f32 %v2631_v0, %v2615_v32  ;;  %v2648_v1 = vadd.f32 %v2632_v19, %v2616_v24  ;;  %v2649_v28 = vadd.f32 %v2633_v40, %v2617_v50  ;;  %v2650_v59 = vadd.f32 %v2634_v26, %v2618_v21  ;;  %v6419_v24 = vld [vmem:[#allocation21_spill] sm:$0xff] }
 0x487   :  { %v2651_v29 = vadd.f32 %v2635_v18, %v2619_v33  ;;  %v2652_v38 = vadd.f32 %v2636_v63, %v2620_v13  ;;  %vm2653_vm0 = vcmp.lt.f32.partialorder %v2637_v7, 4.0  ;;  %vm2654_vm4 = vcmp.lt.f32.partialorder %v2638_v54, 4.0  ;;  %v6422_v33 = vld [vmem:[#allocation24_spill] sm:$0xff] }
 0x488   :  { %vm2655_vm5 = vcmp.lt.f32.partialorder %v2639_v52, 4.0  ;;  %vm2656_vm6 = vcmp.lt.f32.partialorder %v2640_v57, 4.0  ;;  %vm2657_vm7 = vcmp.lt.f32.partialorder %v2641_v14, 4.0  ;;  %vm2658_vm8 = vcmp.lt.f32.partialorder %v2642_v45, 4.0 }
 0x489   :  { %vm2659_vm9 = vcmp.lt.f32.partialorder %v2643_v10, 4.0  ;;  %vm2660_vm10 = vcmp.lt.f32.partialorder %v2644_v36, 4.0  ;;  %vm2661_vm11 = vcmp.lt.f32.partialorder %v2645_v5, 4.0  ;;  %vm2662_vm12 = vcmp.lt.f32.partialorder %v2646_v35, 4.0 }
 0x48a   :  { %vm2663_vm13 = vcmp.lt.f32.partialorder %v2647_v6, 4.0  ;;  %vm2664_vm14 = vcmp.lt.f32.partialorder %v2648_v1, 4.0  ;;  %vm2665_vm15 = vcmp.lt.f32.partialorder %v2649_v28, 4.0  ;;  %vm2666_vm1 = vcmp.lt.f32.partialorder %v2650_v59, 4.0 }
 0x48b   :  { %vm2667_vm2 = vcmp.lt.f32.partialorder %v2651_v29, 4.0  ;;  %vm2668_vm3 = vcmp.lt.f32.partialorder %v2652_v38, 4.0  ;;  %v2669_v62 = vsel %vm2653_vm0, %v3747_v49, inf  ;;  %v2670_v16 = vsel %vm2654_vm4, %v6409_v4, inf }
 0x48c   :  { %v2671_v15 = vsel %vm2655_vm5, %v6410_v17, inf  ;;  %v2672_v56 = vsel %vm2656_vm6, %v6411_v34, inf  ;;  %v2673_v23 = vsel %vm2657_vm7, %v6412_v58, inf  ;;  %v2674_v55 = vsel %vm2658_vm8, %v6413_v42, inf }
 0x48d   :  { %v2675_v43 = vsel %vm2659_vm9, %v6414_v37, inf  ;;  %v2676_v12 = vsel %vm2660_vm10, %v6415_v11, inf  ;;  %v2677_v51 = vsel %vm2661_vm11, %v6416_v3, inf  ;;  %v2678_v47 = vsel %vm2662_vm12, %v6417_v61, inf }
 0x48e   :  { %v2679_v32 = vsel %vm2663_vm13, %v6418_v2, inf  ;;  %v2680_v50 = vsel %vm2664_vm14, %v6419_v24, inf  ;;  %v2681_v21 = vsel %vm2665_vm15, %v6420_v22, inf  ;;  %v2682_v41 = vsel %vm2666_vm1, %v6421_v31, inf }
 0x48f   :  { %v2683_v60 = vsel %vm2667_vm2, %v6422_v33, inf  ;;  %v2684_v13 = vsel %vm2668_vm3, %v6423_v8, inf  ;;  %vm6424_vm0 = vcmask 130048  }
 0x490   :  { %v2685_v46 = vsel %vm6424_vm0, %v2669_v62, inf  ;;  %vm6425_vm4 = vmmov %vm6424_vm0 }
 0x491   :  { %v2686_v9 = vsel %vm6425_vm4, %v2670_v16, inf  ;;  %vm6426_vm5 = vmmov %vm6424_vm0 }
 0x492   :  { %v2694_v20 = vsel %vm6426_vm5, %v2671_v15, inf  ;;  %v2687_v39 = vmin.f32 %v2685_v46, %v2686_v9  ;;  %vm6427_vm6 = vmmov %vm6424_vm0 }
 0x493   :  { %v2695_v48 = vsel %vm6427_vm6, %v2672_v56, inf  ;;  %vm6428_vm7 = vmmov %vm6424_vm0 }
 0x494   :  { %v2703_v30 = vsel %vm6428_vm7, %v2673_v23, inf  ;;  %vm6429_vm8 = vmmov %vm6424_vm0  ;;  %v2696_v27 = vmin.f32 %v2694_v20, %v2695_v48  ;;  %v2688_v19 = vrot.slane %v2687_v39, 4 }
 0x495   :  { %v2704_v44 = vsel %vm6429_vm8, %v2674_v55, inf  ;;  %vm6430_vm9 = vmmov %vm6424_vm0 }
 0x496   :  { %v2705_v53 = vmin.f32 %v2703_v30, %v2704_v44  ;;  %v2712_v25 = vsel %vm6430_vm9, %v2675_v43, inf  ;;  %vm6431_vm10 = vmmov %vm6424_vm0  ;;  %v2697_v63 = vrot.slane %v2696_v27, 4  ;;  %v2689_v57 = vmin.f32 %v2687_v39, %v2688_v19 }
 0x497   :  { %v2713_v0 = vsel %vm6431_vm10, %v2676_v12, inf  ;;  %vm6432_vm11 = vmmov %vm6424_vm0 }
 0x498   :  { %v2714_v40 = vmin.f32 %v2712_v25, %v2713_v0  ;;  %v2721_v26 = vsel %vm6432_vm11, %v2677_v51, inf  ;;  %vm6433_vm12 = vmmov %vm6424_vm0  ;;  %v2706_v7 = vrot.slane %v2705_v53, 4  ;;  %v2698_v36 = vmin.f32 %v2696_v27, %v2697_v63 }
 0x499   :  { %v2722_v18 = vsel %vm6433_vm12, %v2678_v47, inf  ;;  %vm6434_vm13 = vmmov %vm6424_vm0  ;;  %v2690_v1 = vrot.slane %v2689_v57, 2 }
 0x49a   :  { %v2723_v54 = vmin.f32 %v2721_v26, %v2722_v18  ;;  %v2730_v52 = vsel %vm6434_vm13, %v2679_v32, inf  ;;  %v2715_v14 = vrot.slane %v2714_v40, 4  ;;  %vm6435_vm14 = vmmov %vm6424_vm0  ;;  %v2707_v5 = vmin.f32 %v2705_v53, %v2706_v7 }
 0x49b   :  { %v2731_v45 = vsel %vm6435_vm14, %v2680_v50, inf  ;;  %vm6436_vm15 = vmmov %vm6424_vm0  ;;  %v2699_v38 = vrot.slane %v2698_v36, 2  ;;  %v2691_v56 = vmin.f32 %v2689_v57, %v2690_v1  ;;  %v6442_v1 = vld [vmem:[#allocation30_spill] sm:$0xff] }
 0x49c   :  { %v2739_v10 = vsel %vm6436_vm15, %v2681_v21, inf  ;;  %v2724_v35 = vrot.slane %v2723_v54, 4  ;;  %v2732_v6 = vmin.f32 %v2730_v52, %v2731_v45  ;;  %v2716_v28 = vmin.f32 %v2714_v40, %v2715_v14  ;;  %vm6437_vm1 = vmmov %vm6424_vm0  ;;  %v6440_v45 = vld [vmem:[#allocation28_spill] sm:$0xff] }
 0x49d   :  { %v2740_v59 = vsel %vm6437_vm1, %v2682_v41, inf  ;;  %vm6438_vm2 = vmmov %vm6424_vm0  ;;  %v2708_v62 = vrot.slane %v2707_v5, 2  ;;  %v2700_v12 = vmin.f32 %v2698_v36, %v2699_v38  ;;  %v2692_v50 = vrot.slane %v2691_v56, 1  ;;  %v6441_v36 = vld [vmem:[#allocation29_spill] sm:$0xff] }
 0x49e   :  { %v2748_v29 = vsel %vm6438_vm2, %v2683_v60, inf  ;;  %v2725_v16 = vmin.f32 %v2723_v54, %v2724_v35  ;;  %v2733_v15 = vrot.slane %v2732_v6, 4  ;;  %v2717_v23 = vrot.slane %v2716_v28, 2  ;;  %vm6439_vm3 = vmmov %vm6424_vm0 }
 0x49f   :  { %v2741_v55 = vmin.f32 %v2739_v10, %v2740_v59  ;;  %v2749_v43 = vsel %vm6439_vm3, %v2684_v13, inf  ;;  %v2709_v51 = vmin.f32 %v2707_v5, %v2708_v62  ;;  %v2701_v41 = vrot.slane %v2700_v12, 1  ;;  %v6443_v59 = vld [vmem:[#allocation31_spill] sm:$0xff]  ;;  %vm6444_vm15 = vmmov %vm6437_vm1 }
 0x4a0   :  { %v2726_v47 = vrot.slane %v2725_v16, 2  ;;  %v2734_v32 = vmin.f32 %v2732_v6, %v2733_v15  ;;  %v2718_v21 = vmin.f32 %v2716_v28, %v2717_v23  ;;  %v2750_v9 = vmin.f32 %v2748_v29, %v2749_v43  ;;  %v6448_v15 = vld [vmem:[#allocation33_spill] sm:$0xff]  ;;  %vm6449_vm2 = vmmov %vm6437_vm1  ;;  %v6457_v23 = vld [vmem:[#allocation36_spill] sm:$0xff] }
 0x4a1   :  { %v2742_v46 = vrot.slane %v2741_v55, 4  ;;  %v2710_v20 = vrot.slane %v2709_v51, 1  ;;  %v2693_v48 = vmin.f32 %v2691_v56, %v2692_v50  ;;  %v2702_v53 = vmin.f32 %v2700_v12, %v2701_v41  ;;  %vm6450_vm3 = vmmov %vm6437_vm1  ;;  %v6461_v12 = vld [vmem:[#allocation57_spill] sm:$0xff] }
 0x4a2   :  { %v2727_v60 = vmin.f32 %v2725_v16, %v2726_v47  ;;  %v2735_v39 = vrot.slane %v2734_v32, 2  ;;  %v2719_v30 = vrot.slane %v2718_v21, 1  ;;  %v2751_v27 = vrot.slane %v2750_v9, 4  ;;  %v6447_v16 = vld [vmem:[#allocation32_spill] sm:$0xff] }
 0x4a3   :  { %v2743_v44 = vmin.f32 %v2741_v55, %v2742_v46  ;;  %v2711_v25 = vmin.f32 %v2709_v51, %v2710_v20  ;;  %vm2757_vm0 = vcmp.lt.f32.partialorder %v3747_v49, %v2693_v48  ;;  %vm2758_vm4 = vcmp.lt.f32.partialorder %v6409_v4, %v2693_v48  ;;  %v6445_v49 = vld [vmem:[#allocation34_spill] sm:$0xff]  ;;  %v6446_v4 = vld [vmem:[#allocation35_spill] sm:$0xff]  ;;  %v6459_v55 = vld [vmem:[#allocation56_spill] sm:$0xff] }
 0x4a4   :  { %v2728_v0 = vrot.slane %v2727_v60, 1  ;;  %v2736_v13 = vmin.f32 %v2734_v32, %v2735_v39  ;;  %v2720_v19 = vmin.f32 %v2718_v21, %v2719_v30  ;;  %v2752_v26 = vmin.f32 %v2750_v9, %v2751_v27 }
 0x4a5   :  { %v2744_v40 = vrot.slane %v2743_v44, 2  ;;  %vm2759_vm5 = vcmp.lt.f32.partialorder %v6410_v17, %v2702_v53  ;;  %vm2760_vm6 = vcmp.lt.f32.partialorder %v6411_v34, %v2702_v53  ;;  %vm2761_vm7 = vcmp.lt.f32.partialorder %v6412_v58, %v2711_v25 }
 0x4a6   :  { %v2729_v18 = vmin.f32 %v2727_v60, %v2728_v0  ;;  %v2737_v63 = vrot.slane %v2736_v13, 1  ;;  %v2753_v54 = vrot.slane %v2752_v26, 2  ;;  %vm2762_vm8 = vcmp.lt.f32.partialorder %v6413_v42, %v2711_v25  ;;  %v6451_v42 = vld [vmem:[#allocation44_spill] sm:$0xff] }
 0x4a7   :  { %v2745_v7 = vmin.f32 %v2743_v44, %v2744_v40  ;;  %vm2763_vm9 = vcmp.lt.f32.partialorder %v6414_v37, %v2720_v19  ;;  %vm2764_vm10 = vcmp.lt.f32.partialorder %v6415_v11, %v2720_v19  ;;  %v2773_v10 = vsel %vm2757_vm0, 0.0, %v6440_v45  ;;  %v6456_v11 = vld [vmem:[#allocation45_spill] sm:$0xff] }
 0x4a8   :  { %v2738_v52 = vmin.f32 %v2736_v13, %v2737_v63  ;;  %v2754_v14 = vmin.f32 %v2752_v26, %v2753_v54  ;;  %vm2765_vm11 = vcmp.lt.f32.partialorder %v6416_v3, %v2729_v18  ;;  %vm2766_vm12 = vcmp.lt.f32.partialorder %v6417_v61, %v2729_v18  ;;  %2789 = vst.msk [vmem:[#allocation2] sm:$0xff] %vm6444_vm15, %v2773_v10  ;;  %vm6462_vm15 = vmmov %vm6437_vm1  ;;  %v6465_v61 = vld [vmem:[#allocation49_spill] sm:$0xff] }
 0x4a9   :  { %v2746_v57 = vrot.slane %v2745_v7, 1  ;;  %v2774_v5 = vsel %vm2758_vm4, 0.0, %v6441_v36  ;;  %v2775_v28 = vsel %vm2759_vm5, 0.0, %v6442_v1  ;;  %v2776_v29 = vsel %vm2760_vm6, 0.0, %v6443_v59  ;;  %vm6452_vm5 = vmmov %vm6437_vm1 }
 0x4aa   :  { %vm2767_vm13 = vcmp.lt.f32.partialorder %v6418_v2, %v2738_v52  ;;  %vm2768_vm14 = vcmp.lt.f32.partialorder %v6419_v24, %v2738_v52  ;;  %v2755_v6 = vrot.slane %v2754_v14, 1  ;;  %2790 = vst.msk [vmem:[#allocation2 + $0x8] sm:$0xff] %vm6437_vm1, %v2774_v5  ;;  %v2777_v38 = vsel %vm2761_vm7, 0.0, %v6445_v49  ;;  %vm6453_vm6 = vmmov %vm6437_vm1  ;;  %v6466_v24 = vld [vmem:[#allocation50_spill] sm:$0xff] }
 0x4ab   :  { %v2747_v35 = vmin.f32 %v2745_v7, %v2746_v57  ;;  %v2778_v62 = vsel %vm2762_vm8, 0.0, %v6446_v4  ;;  %v2779_v17 = vsel %vm2763_vm9, 0.0, %v6447_v16  ;;  %v2780_v34 = vsel %vm2764_vm10, 0.0, %v6448_v15  ;;  %2791 = vst.msk [vmem:[#allocation2 + $0x10] sm:$0xff] %vm6449_vm2, %v2775_v28  ;;  %vm6454_vm7 = vmmov %vm6437_vm1 }
 0x4ac   :  { %2792 = vst.msk [vmem:[#allocation2 + $0x18] sm:$0xff] %vm6450_vm3, %v2776_v29  ;;  %v2756_v58 = vmin.f32 %v2754_v14, %v2755_v6  ;;  %v2781_v37 = vsel %vm2765_vm11, 0.0, %v6451_v42  ;;  %vm6455_vm8 = vmmov %vm6437_vm1  ;;  %v2782_v56 = vsel %vm2766_vm12, 0.0, %v6456_v11 }
 0x4ad   :  { %vm2769_vm0 = vcmp.lt.f32.partialorder %v6420_v22, %v2747_v35  ;;  %vm2770_vm4 = vcmp.lt.f32.partialorder %v6421_v31, %v2747_v35  ;;  %2793 = vst.msk [vmem:[#allocation2 + $0x20] sm:$0xff] %vm6452_vm5, %v2777_v38  ;;  %v2783_v22 = vsel %vm2767_vm13, 0.0, %v6457_v23  ;;  %v6458_v31 = vld [vmem:[#allocation37_spill] sm:$0xff]  ;;  %vm6460_vm9 = vmmov %vm6437_vm1 }
 0x4ae   :  { %2794 = vst.msk [vmem:[#allocation2 + $0x28] sm:$0xff] %vm6453_vm6, %v2778_v62  ;;  %v2784_v3 = vsel %vm2768_vm14, 0.0, %v6458_v31  ;;  %v2785_v43 = vsel %vm2769_vm0, 0.0, %v6459_v55  ;;  %vm2771_vm10 = vcmp.lt.f32.partialorder %v6422_v33, %v2756_v58  ;;  %vm2772_vm11 = vcmp.lt.f32.partialorder %v6423_v8, %v2756_v58  ;;  %vm6463_vm12 = vmmov %vm6437_vm1 }
 0x4af   :  { %2795 = vst.msk [vmem:[#allocation2 + $0x30] sm:$0xff] %vm6454_vm7, %v2779_v17  ;;  %v2786_v51 = vsel %vm2770_vm4, 0.0, %v6461_v12  ;;  %vm6464_vm13 = vmmov %vm6437_vm1  ;;  %v2787_v2 = vsel %vm2771_vm10, 0.0, %v6465_v61  ;;  %v2788_v47 = vsel %vm2772_vm11, 0.0, %v6466_v24 }
 0x4b0   :  { %2796 = vst.msk [vmem:[#allocation2 + $0x38] sm:$0xff] %vm6455_vm8, %v2780_v34  ;;  %vm6467_vm14 = vmmov %vm6437_vm1 }
 0x4b1   :  { %2797 = vst.msk [vmem:[#allocation2 + $0x40] sm:$0xff] %vm6460_vm9, %v2781_v37  ;;  %vm6468_vm2 = vmmov %vm6437_vm1 }
 0x4b2   :  { %2798 = vst.msk [vmem:[#allocation2 + $0x48] sm:$0xff] %vm6462_vm15, %v2782_v56  ;;  %vm6469_vm3 = vmmov %vm6437_vm1 }
 0x4b3   :  { %2799 = vst.msk [vmem:[#allocation2 + $0x50] sm:$0xff] %vm6463_vm12, %v2783_v22 }
 0x4b4   :  { %2800 = vst.msk [vmem:[#allocation2 + $0x58] sm:$0xff] %vm6437_vm1, %v2784_v3 }
 0x4b5   :  { %2801 = vst.msk [vmem:[#allocation2 + $0x60] sm:$0xff] %vm6464_vm13, %v2785_v43 }
 0x4b6   :  { %2802 = vst.msk [vmem:[#allocation2 + $0x68] sm:$0xff] %vm6467_vm14, %v2786_v51 }
 0x4b7   :  { %2803 = vst.msk [vmem:[#allocation2 + $0x70] sm:$0xff] %vm6468_vm2, %v2787_v2 }
 0x4b8   :  { %2804 = vst.msk [vmem:[#allocation2 + $0x78] sm:$0xff] %vm6469_vm3, %v2788_v47 }
 0x4b9   :  { %3392 = shalt.err (!%p3389_p4)
}
 0x4ba   :  { %s3405_s21 = smov 128   ;;  %s3406_s22 = smov 8  }
 0x4bb   :  { %2816 = dma.vmem_to_hbm [thread:$0]  %s2811_s19, 2048, %s6023_s9, [#allocation3], %s3405_s21, %s3405_s21, %s3406_s22  }
 0x4bc   :  { %3401 = dma.done.wait [#allocation3], 2048  }
 0x4bd   :  { %3402 = vsyncadd [#allocation3], 4294965248 }
 0x4be   :  { %2820 = vsyncpa [#allocation3], 1 }

</bundles_post_ra>
